<compile_context>
chip_gen: v6e
topology: v6e:2x2x1
jax: 0.10.0
libtpu: 0.0.40
codegen_flags: <defaults>
</compile_context>

<pallas_src>
import jax
import jax.numpy as jnp
from jax.experimental import pallas as pl
from jax.experimental.pallas import tpu as pltpu

HIDDEN_SIZE = 50
INPUT_SIZE = 1
NUM_CLASSES = 1
NUM_LAYERS = 1
SEQ_LENGTH = 13

LANE = 128  # TPU vreg lane width


def lstm_kernel(x_ref, w_ih_ref, bias_ref, w_hh_ref, w_fc_ref, b_fc_ref,
                out_ref):
    """Full LSTM recurrence over T steps + FC head in one invocation.

    x_ref:    (T, B, 1)  f32   time-major input (input_size == 1).
    w_ih_ref: (1, 4*Hp)  f32   W_ih^T row, gate order [i, f, o, g], each gate
                               block zero-padded to Hp = 128 lanes.
    bias_ref: (1, 4*Hp)  f32   b_ih + b_hh, same order / padding.
    w_hh_ref: (Hp, 4*Hp) f32   W_hh^T, same column order, rows >= H zero.
    w_fc_ref: (1, Hp)    f32   final Linear weight row, zero-padded.
    b_fc_ref: (1, 1)     f32   final Linear bias (SMEM scalar).
    out_ref:  (B, 1)     f32
    """
    T = x_ref.shape[0]
    Hp = w_hh_ref.shape[0]
    B = out_ref.shape[0]

    # Hoisted constant loads (reused every step).
    w_ih_row = w_ih_ref[...]        # (1, 4Hp)
    bias = bias_ref[...]            # (1, 4Hp)
    w_hh = w_hh_ref[...]            # (Hp, 4Hp)
    w_fc = w_fc_ref[...]            # (1, Hp)

    def cell(gates, c):
        # [i, f, o] are contiguous -> one sigmoid over a lane-aligned block.
        sig = jax.nn.sigmoid(gates[:, : 3 * Hp])
        i_g = sig[:, 0 * Hp:1 * Hp]
        f_g = sig[:, 1 * Hp:2 * Hp]
        o_g = sig[:, 2 * Hp:3 * Hp]
        g_g = jnp.tanh(gates[:, 3 * Hp:4 * Hp])
        c_new = f_g * c + i_g * g_g
        h_new = o_g * jnp.tanh(c_new)
        return h_new, c_new

    # t = 0: h_0 == 0, so the h @ W_hh term vanishes.
    gates0 = x_ref[0] * w_ih_row + bias          # (B,1)*(1,4Hp) -> (B,4Hp)
    c0 = jnp.zeros((B, Hp), jnp.float32)
    h, c = cell(gates0, c0)

    # Remaining steps, fully unrolled (T is a small compile-time constant).
    for t in range(1, T):
        gates = (x_ref[t] * w_ih_row + bias
                 + jnp.dot(h, w_hh, preferred_element_type=jnp.float32))
        h, c = cell(gates, c)

    # Final Linear head (num_classes == 1): VPU multiply + XLU lane reduce.
    # Padded lanes of h and w_fc are exactly zero, so the reduce is exact.
    out = jnp.sum(h * w_fc, axis=1, keepdims=True) + b_fc_ref[0, 0]
    out_ref[...] = out.astype(out_ref.dtype)


def lstm_forward(x, params):
    """x: (B, T, I) float32 (PyTorch batch_first layout). Returns (B, C)."""
    w_ih, w_hh, b_ih, b_hh, w_fc, b_fc = params
    B, T, I = x.shape
    H = w_hh.shape[1]
    C = w_fc.shape[0]
    assert I == 1, "kernel's input projection is specialized for input_size == 1"
    assert C == 1, "kernel's FC head is specialized for num_classes == 1"
    Hp = ((H + LANE - 1) // LANE) * LANE      # 50 -> 128

    def reorder_pad_cols(m):
        """(..., 4H) PyTorch gate order [i,f,g,o] -> [i,f,o,g], each gate
        block zero-padded from H to Hp columns -> (..., 4*Hp)."""
        i_b = m[..., 0 * H:1 * H]
        f_b = m[..., 1 * H:2 * H]
        g_b = m[..., 2 * H:3 * H]
        o_b = m[..., 3 * H:4 * H]
        pad = [(0, 0)] * (m.ndim - 1) + [(0, Hp - H)]
        return jnp.concatenate(
            [jnp.pad(blk, pad) for blk in (i_b, f_b, o_b, g_b)], axis=-1)

    # ---- one-time parameter / layout massaging in plain JAX ---------------
    x_tb1 = jnp.transpose(x.astype(jnp.float32), (1, 0, 2))       # (T, B, 1)

    w_ih_row = reorder_pad_cols(
        jnp.transpose(w_ih.astype(jnp.float32)))                  # (1, 4Hp)
    bias = reorder_pad_cols(
        (b_ih + b_hh).astype(jnp.float32).reshape(1, 4 * H))      # (1, 4Hp)

    w_hh_t = reorder_pad_cols(jnp.transpose(w_hh.astype(jnp.float32)))  # (H, 4Hp)
    w_hh_p = jnp.pad(w_hh_t, ((0, Hp - H), (0, 0)))               # (Hp, 4Hp)

    w_fc_p = jnp.pad(w_fc.astype(jnp.float32), ((0, 0), (0, Hp - H)))   # (1, Hp)
    b_fc_s = b_fc.reshape(1, 1).astype(jnp.float32)               # (1, 1)

    vmem = pl.BlockSpec(memory_space=pltpu.MemorySpace.VMEM)
    smem = pl.BlockSpec(memory_space=pltpu.MemorySpace.SMEM)

    # Gridless call: all operands (< 0.5 MiB total) stay VMEM-resident for
    # the whole kernel; the T-step recurrence is a single unrolled body.
    # TODO(synk): if B is ever scaled up, add a "parallel" batch grid axis
    # (2 TCs on v7x) and bf16 weights for the h @ W_hh matmul.
    return pl.pallas_call(
        lstm_kernel,
        out_shape=jax.ShapeDtypeStruct((B, C), jnp.float32),
        in_specs=[vmem, vmem, vmem, vmem, vmem, smem],
        out_specs=vmem,
    )(x_tb1, w_ih_row, bias, w_hh_p, w_fc_p, b_fc_s)


def init_params(key, input_size=INPUT_SIZE, hidden_size=HIDDEN_SIZE,
                num_classes=NUM_CLASSES):
    """Parameter init matching PyTorch shapes:
       W_ih (4H, I), W_hh (4H, H), b_ih (4H,), b_hh (4H,),
       W_fc (C, H), b_fc (C,). Uniform(-1/sqrt(H), 1/sqrt(H))."""
    H = hidden_size
    k = 1.0 / jnp.sqrt(jnp.float32(H))
    ks = jax.random.split(key, 6)
    w_ih = jax.random.uniform(ks[0], (4 * H, input_size), jnp.float32, -k, k)
    w_hh = jax.random.uniform(ks[1], (4 * H, H), jnp.float32, -k, k)
    b_ih = jax.random.uniform(ks[2], (4 * H,), jnp.float32, -k, k)
    b_hh = jax.random.uniform(ks[3], (4 * H,), jnp.float32, -k, k)
    w_fc = jax.random.uniform(ks[4], (num_classes, H), jnp.float32, -k, k)
    b_fc = jax.random.uniform(ks[5], (num_classes,), jnp.float32, -k, k)
    return (w_ih, w_hh, b_ih, b_hh, w_fc, b_fc)


def lstm_forward_ref(x, params):
    """Pure-JAX reference (mirrors PyTorch nn.LSTM + nn.Linear forward)."""
    w_ih, w_hh, b_ih, b_hh, w_fc, b_fc = params
    B, T, _ = x.shape
    H = w_hh.shape[1]
    h = jnp.zeros((B, H), jnp.float32)
    c = jnp.zeros((B, H), jnp.float32)
    for t in range(T):
        gates = x[:, t, :] @ w_ih.T + b_ih + h @ w_hh.T + b_hh
        i_g = jax.nn.sigmoid(gates[:, 0 * H:1 * H])
        f_g = jax.nn.sigmoid(gates[:, 1 * H:2 * H])
        g_g = jnp.tanh(gates[:, 2 * H:3 * H])
        o_g = jax.nn.sigmoid(gates[:, 3 * H:4 * H])
        c = f_g * c + i_g * g_g
        h = o_g * jnp.tanh(c)
    return h @ w_fc.T + b_fc


if __name__ == "__main__":
    key = jax.random.PRNGKey(0)
    k_x, k_p = jax.random.split(key)

    B = 2
    x = jax.random.normal(k_x, (B, SEQ_LENGTH, INPUT_SIZE), jnp.float32)
    params = init_params(k_p)

    out = jax.block_until_ready(lstm_forward(x, params))
    ref = jax.block_until_ready(lstm_forward_ref(x, params))

    assert out.shape == (B, NUM_CLASSES)
    assert jnp.allclose(out, ref, rtol=1e-3, atol=1e-3)

    print("KERNEL_OK")
</pallas_src>

<mosaic_0001>
module attributes {stable_mosaic.version = 11 : i64} {
  func.func @lstm_kernel(%arg0: memref<13x2x1xf32, #tpu.memory_space<vmem>>, %arg1: memref<1x512xf32, #tpu.memory_space<vmem>>, %arg2: memref<1x512xf32, #tpu.memory_space<vmem>>, %arg3: memref<128x512xf32, #tpu.memory_space<vmem>>, %arg4: memref<1x128xf32, #tpu.memory_space<vmem>>, %arg5: memref<1x1xf32, #tpu.memory_space<smem>>, %arg6: memref<2x1xf32, #tpu.memory_space<vmem>>) attributes {dimension_semantics = [], scalar_prefetch = 0 : i64, scratch_operands = 0 : i64, tpu.core_type = #tpu.core_type<tc>} {
    %c0 = arith.constant 0 : index
    %c0_0 = arith.constant 0 : index
    %0 = vector.load %arg1[%c0, %c0_0] : memref<1x512xf32, #tpu.memory_space<vmem>>, vector<1x512xf32>
    %c0_1 = arith.constant 0 : index
    %c0_2 = arith.constant 0 : index
    %1 = vector.load %arg2[%c0_1, %c0_2] : memref<1x512xf32, #tpu.memory_space<vmem>>, vector<1x512xf32>
    %c0_3 = arith.constant 0 : index
    %c0_4 = arith.constant 0 : index
    %2 = vector.load %arg3[%c0_3, %c0_4] : memref<128x512xf32, #tpu.memory_space<vmem>>, vector<128x512xf32>
    %c0_5 = arith.constant 0 : index
    %c0_6 = arith.constant 0 : index
    %3 = vector.load %arg4[%c0_5, %c0_6] : memref<1x128xf32, #tpu.memory_space<vmem>>, vector<1x128xf32>
    %c0_7 = arith.constant 0 : index
    %c0_8 = arith.constant 0 : index
    %c0_9 = arith.constant 0 : index
    %4 = vector.load %arg0[%c0_7, %c0_8, %c0_9] : memref<13x2x1xf32, #tpu.memory_space<vmem>>, vector<1x2x1xf32>
    %5 = vector.shape_cast %4 : vector<1x2x1xf32> to vector<2x1xf32>
    %6 = vector.broadcast %5 : vector<2x1xf32> to vector<2x512xf32>
    %7 = vector.broadcast %0 : vector<1x512xf32> to vector<2x512xf32>
    %8 = arith.mulf %6, %7 : vector<2x512xf32>
    %9 = vector.broadcast %1 : vector<1x512xf32> to vector<2x512xf32>
    %10 = arith.addf %8, %9 : vector<2x512xf32>
    %cst = arith.constant 0.000000e+00 : f32
    %11 = vector.broadcast %cst : f32 to vector<2x128xf32>
    %12 = vector.extract_strided_slice %10 {offsets = [0, 0], sizes = [2, 384], strides = [1, 1]} : vector<2x512xf32> to vector<2x384xf32>
    %13 = arith.negf %12 : vector<2x384xf32>
    %14 = math.exp %13 : vector<2x384xf32>
    %cst_10 = arith.constant 1.000000e+00 : f32
    %15 = vector.broadcast %cst_10 : f32 to vector<2x384xf32>
    %16 = arith.addf %15, %14 : vector<2x384xf32>
    %17 = arith.divf %15, %16 : vector<2x384xf32>
    %18 = vector.extract_strided_slice %17 {offsets = [0, 0], sizes = [2, 128], strides = [1, 1]} : vector<2x384xf32> to vector<2x128xf32>
    %19 = vector.extract_strided_slice %17 {offsets = [0, 128], sizes = [2, 128], strides = [1, 1]} : vector<2x384xf32> to vector<2x128xf32>
    %20 = vector.extract_strided_slice %17 {offsets = [0, 256], sizes = [2, 128], strides = [1, 1]} : vector<2x384xf32> to vector<2x128xf32>
    %21 = vector.extract_strided_slice %10 {offsets = [0, 384], sizes = [2, 128], strides = [1, 1]} : vector<2x512xf32> to vector<2x128xf32>
    %22 = math.tanh %21 : vector<2x128xf32>
    %23 = arith.mulf %19, %11 : vector<2x128xf32>
    %24 = arith.mulf %18, %22 : vector<2x128xf32>
    %25 = arith.addf %23, %24 : vector<2x128xf32>
    %26 = math.tanh %25 : vector<2x128xf32>
    %27 = arith.mulf %20, %26 : vector<2x128xf32>
    %c1 = arith.constant 1 : index
    %c0_11 = arith.constant 0 : index
    %c0_12 = arith.constant 0 : index
    %28 = vector.load %arg0[%c1, %c0_11, %c0_12] : memref<13x2x1xf32, #tpu.memory_space<vmem>>, vector<1x2x1xf32>
    %29 = vector.shape_cast %28 : vector<1x2x1xf32> to vector<2x1xf32>
    %30 = vector.broadcast %29 : vector<2x1xf32> to vector<2x512xf32>
    %31 = vector.broadcast %0 : vector<1x512xf32> to vector<2x512xf32>
    %32 = arith.mulf %30, %31 : vector<2x512xf32>
    %33 = vector.broadcast %1 : vector<1x512xf32> to vector<2x512xf32>
    %34 = arith.addf %32, %33 : vector<2x512xf32>
    %cst_13 = arith.constant dense<0.000000e+00> : vector<2x512xf32>
    %35 = tpu.matmul %27, %2, %cst_13 {dimension_numbers = #tpu.dot_dimension_numbers<[1], [0], [0], [1], [0, 0, 1, 1], [], []>} : vector<2x128xf32>, vector<128x512xf32>, vector<2x512xf32> -> vector<2x512xf32>
    %36 = arith.addf %34, %35 : vector<2x512xf32>
    %37 = vector.extract_strided_slice %36 {offsets = [0, 0], sizes = [2, 384], strides = [1, 1]} : vector<2x512xf32> to vector<2x384xf32>
    %38 = arith.negf %37 : vector<2x384xf32>
    %39 = math.exp %38 : vector<2x384xf32>
    %cst_14 = arith.constant 1.000000e+00 : f32
    %40 = vector.broadcast %cst_14 : f32 to vector<2x384xf32>
    %41 = arith.addf %40, %39 : vector<2x384xf32>
    %42 = arith.divf %40, %41 : vector<2x384xf32>
    %43 = vector.extract_strided_slice %42 {offsets = [0, 0], sizes = [2, 128], strides = [1, 1]} : vector<2x384xf32> to vector<2x128xf32>
    %44 = vector.extract_strided_slice %42 {offsets = [0, 128], sizes = [2, 128], strides = [1, 1]} : vector<2x384xf32> to vector<2x128xf32>
    %45 = vector.extract_strided_slice %42 {offsets = [0, 256], sizes = [2, 128], strides = [1, 1]} : vector<2x384xf32> to vector<2x128xf32>
    %46 = vector.extract_strided_slice %36 {offsets = [0, 384], sizes = [2, 128], strides = [1, 1]} : vector<2x512xf32> to vector<2x128xf32>
    %47 = math.tanh %46 : vector<2x128xf32>
    %48 = arith.mulf %44, %25 : vector<2x128xf32>
    %49 = arith.mulf %43, %47 : vector<2x128xf32>
    %50 = arith.addf %48, %49 : vector<2x128xf32>
    %51 = math.tanh %50 : vector<2x128xf32>
    %52 = arith.mulf %45, %51 : vector<2x128xf32>
    %c2 = arith.constant 2 : index
    %c0_15 = arith.constant 0 : index
    %c0_16 = arith.constant 0 : index
    %53 = vector.load %arg0[%c2, %c0_15, %c0_16] : memref<13x2x1xf32, #tpu.memory_space<vmem>>, vector<1x2x1xf32>
    %54 = vector.shape_cast %53 : vector<1x2x1xf32> to vector<2x1xf32>
    %55 = vector.broadcast %54 : vector<2x1xf32> to vector<2x512xf32>
    %56 = vector.broadcast %0 : vector<1x512xf32> to vector<2x512xf32>
    %57 = arith.mulf %55, %56 : vector<2x512xf32>
    %58 = vector.broadcast %1 : vector<1x512xf32> to vector<2x512xf32>
    %59 = arith.addf %57, %58 : vector<2x512xf32>
    %cst_17 = arith.constant dense<0.000000e+00> : vector<2x512xf32>
    %60 = tpu.matmul %52, %2, %cst_17 {dimension_numbers = #tpu.dot_dimension_numbers<[1], [0], [0], [1], [0, 0, 1, 1], [], []>} : vector<2x128xf32>, vector<128x512xf32>, vector<2x512xf32> -> vector<2x512xf32>
    %61 = arith.addf %59, %60 : vector<2x512xf32>
    %62 = vector.extract_strided_slice %61 {offsets = [0, 0], sizes = [2, 384], strides = [1, 1]} : vector<2x512xf32> to vector<2x384xf32>
    %63 = arith.negf %62 : vector<2x384xf32>
    %64 = math.exp %63 : vector<2x384xf32>
    %cst_18 = arith.constant 1.000000e+00 : f32
    %65 = vector.broadcast %cst_18 : f32 to vector<2x384xf32>
    %66 = arith.addf %65, %64 : vector<2x384xf32>
    %67 = arith.divf %65, %66 : vector<2x384xf32>
    %68 = vector.extract_strided_slice %67 {offsets = [0, 0], sizes = [2, 128], strides = [1, 1]} : vector<2x384xf32> to vector<2x128xf32>
    %69 = vector.extract_strided_slice %67 {offsets = [0, 128], sizes = [2, 128], strides = [1, 1]} : vector<2x384xf32> to vector<2x128xf32>
    %70 = vector.extract_strided_slice %67 {offsets = [0, 256], sizes = [2, 128], strides = [1, 1]} : vector<2x384xf32> to vector<2x128xf32>
    %71 = vector.extract_strided_slice %61 {offsets = [0, 384], sizes = [2, 128], strides = [1, 1]} : vector<2x512xf32> to vector<2x128xf32>
    %72 = math.tanh %71 : vector<2x128xf32>
    %73 = arith.mulf %69, %50 : vector<2x128xf32>
    %74 = arith.mulf %68, %72 : vector<2x128xf32>
    %75 = arith.addf %73, %74 : vector<2x128xf32>
    %76 = math.tanh %75 : vector<2x128xf32>
    %77 = arith.mulf %70, %76 : vector<2x128xf32>
    %c3 = arith.constant 3 : index
    %c0_19 = arith.constant 0 : index
    %c0_20 = arith.constant 0 : index
    %78 = vector.load %arg0[%c3, %c0_19, %c0_20] : memref<13x2x1xf32, #tpu.memory_space<vmem>>, vector<1x2x1xf32>
    %79 = vector.shape_cast %78 : vector<1x2x1xf32> to vector<2x1xf32>
    %80 = vector.broadcast %79 : vector<2x1xf32> to vector<2x512xf32>
    %81 = vector.broadcast %0 : vector<1x512xf32> to vector<2x512xf32>
    %82 = arith.mulf %80, %81 : vector<2x512xf32>
    %83 = vector.broadcast %1 : vector<1x512xf32> to vector<2x512xf32>
    %84 = arith.addf %82, %83 : vector<2x512xf32>
    %cst_21 = arith.constant dense<0.000000e+00> : vector<2x512xf32>
    %85 = tpu.matmul %77, %2, %cst_21 {dimension_numbers = #tpu.dot_dimension_numbers<[1], [0], [0], [1], [0, 0, 1, 1], [], []>} : vector<2x128xf32>, vector<128x512xf32>, vector<2x512xf32> -> vector<2x512xf32>
    %86 = arith.addf %84, %85 : vector<2x512xf32>
    %87 = vector.extract_strided_slice %86 {offsets = [0, 0], sizes = [2, 384], strides = [1, 1]} : vector<2x512xf32> to vector<2x384xf32>
    %88 = arith.negf %87 : vector<2x384xf32>
    %89 = math.exp %88 : vector<2x384xf32>
    %cst_22 = arith.constant 1.000000e+00 : f32
    %90 = vector.broadcast %cst_22 : f32 to vector<2x384xf32>
    %91 = arith.addf %90, %89 : vector<2x384xf32>
    %92 = arith.divf %90, %91 : vector<2x384xf32>
    %93 = vector.extract_strided_slice %92 {offsets = [0, 0], sizes = [2, 128], strides = [1, 1]} : vector<2x384xf32> to vector<2x128xf32>
    %94 = vector.extract_strided_slice %92 {offsets = [0, 128], sizes = [2, 128], strides = [1, 1]} : vector<2x384xf32> to vector<2x128xf32>
    %95 = vector.extract_strided_slice %92 {offsets = [0, 256], sizes = [2, 128], strides = [1, 1]} : vector<2x384xf32> to vector<2x128xf32>
    %96 = vector.extract_strided_slice %86 {offsets = [0, 384], sizes = [2, 128], strides = [1, 1]} : vector<2x512xf32> to vector<2x128xf32>
    %97 = math.tanh %96 : vector<2x128xf32>
    %98 = arith.mulf %94, %75 : vector<2x128xf32>
    %99 = arith.mulf %93, %97 : vector<2x128xf32>
    %100 = arith.addf %98, %99 : vector<2x128xf32>
    %101 = math.tanh %100 : vector<2x128xf32>
    %102 = arith.mulf %95, %101 : vector<2x128xf32>
    %c4 = arith.constant 4 : index
    %c0_23 = arith.constant 0 : index
    %c0_24 = arith.constant 0 : index
    %103 = vector.load %arg0[%c4, %c0_23, %c0_24] : memref<13x2x1xf32, #tpu.memory_space<vmem>>, vector<1x2x1xf32>
    %104 = vector.shape_cast %103 : vector<1x2x1xf32> to vector<2x1xf32>
    %105 = vector.broadcast %104 : vector<2x1xf32> to vector<2x512xf32>
    %106 = vector.broadcast %0 : vector<1x512xf32> to vector<2x512xf32>
    %107 = arith.mulf %105, %106 : vector<2x512xf32>
    %108 = vector.broadcast %1 : vector<1x512xf32> to vector<2x512xf32>
    %109 = arith.addf %107, %108 : vector<2x512xf32>
    %cst_25 = arith.constant dense<0.000000e+00> : vector<2x512xf32>
    %110 = tpu.matmul %102, %2, %cst_25 {dimension_numbers = #tpu.dot_dimension_numbers<[1], [0], [0], [1], [0, 0, 1, 1], [], []>} : vector<2x128xf32>, vector<128x512xf32>, vector<2x512xf32> -> vector<2x512xf32>
    %111 = arith.addf %109, %110 : vector<2x512xf32>
    %112 = vector.extract_strided_slice %111 {offsets = [0, 0], sizes = [2, 384], strides = [1, 1]} : vector<2x512xf32> to vector<2x384xf32>
    %113 = arith.negf %112 : vector<2x384xf32>
    %114 = math.exp %113 : vector<2x384xf32>
    %cst_26 = arith.constant 1.000000e+00 : f32
    %115 = vector.broadcast %cst_26 : f32 to vector<2x384xf32>
    %116 = arith.addf %115, %114 : vector<2x384xf32>
    %117 = arith.divf %115, %116 : vector<2x384xf32>
    %118 = vector.extract_strided_slice %117 {offsets = [0, 0], sizes = [2, 128], strides = [1, 1]} : vector<2x384xf32> to vector<2x128xf32>
    %119 = vector.extract_strided_slice %117 {offsets = [0, 128], sizes = [2, 128], strides = [1, 1]} : vector<2x384xf32> to vector<2x128xf32>
    %120 = vector.extract_strided_slice %117 {offsets = [0, 256], sizes = [2, 128], strides = [1, 1]} : vector<2x384xf32> to vector<2x128xf32>
    %121 = vector.extract_strided_slice %111 {offsets = [0, 384], sizes = [2, 128], strides = [1, 1]} : vector<2x512xf32> to vector<2x128xf32>
    %122 = math.tanh %121 : vector<2x128xf32>
    %123 = arith.mulf %119, %100 : vector<2x128xf32>
    %124 = arith.mulf %118, %122 : vector<2x128xf32>
    %125 = arith.addf %123, %124 : vector<2x128xf32>
    %126 = math.tanh %125 : vector<2x128xf32>
    %127 = arith.mulf %120, %126 : vector<2x128xf32>
    %c5 = arith.constant 5 : index
    %c0_27 = arith.constant 0 : index
    %c0_28 = arith.constant 0 : index
    %128 = vector.load %arg0[%c5, %c0_27, %c0_28] : memref<13x2x1xf32, #tpu.memory_space<vmem>>, vector<1x2x1xf32>
    %129 = vector.shape_cast %128 : vector<1x2x1xf32> to vector<2x1xf32>
    %130 = vector.broadcast %129 : vector<2x1xf32> to vector<2x512xf32>
    %131 = vector.broadcast %0 : vector<1x512xf32> to vector<2x512xf32>
    %132 = arith.mulf %130, %131 : vector<2x512xf32>
    %133 = vector.broadcast %1 : vector<1x512xf32> to vector<2x512xf32>
    %134 = arith.addf %132, %133 : vector<2x512xf32>
    %cst_29 = arith.constant dense<0.000000e+00> : vector<2x512xf32>
    %135 = tpu.matmul %127, %2, %cst_29 {dimension_numbers = #tpu.dot_dimension_numbers<[1], [0], [0], [1], [0, 0, 1, 1], [], []>} : vector<2x128xf32>, vector<128x512xf32>, vector<2x512xf32> -> vector<2x512xf32>
    %136 = arith.addf %134, %135 : vector<2x512xf32>
    %137 = vector.extract_strided_slice %136 {offsets = [0, 0], sizes = [2, 384], strides = [1, 1]} : vector<2x512xf32> to vector<2x384xf32>
    %138 = arith.negf %137 : vector<2x384xf32>
    %139 = math.exp %138 : vector<2x384xf32>
    %cst_30 = arith.constant 1.000000e+00 : f32
    %140 = vector.broadcast %cst_30 : f32 to vector<2x384xf32>
    %141 = arith.addf %140, %139 : vector<2x384xf32>
    %142 = arith.divf %140, %141 : vector<2x384xf32>
    %143 = vector.extract_strided_slice %142 {offsets = [0, 0], sizes = [2, 128], strides = [1, 1]} : vector<2x384xf32> to vector<2x128xf32>
    %144 = vector.extract_strided_slice %142 {offsets = [0, 128], sizes = [2, 128], strides = [1, 1]} : vector<2x384xf32> to vector<2x128xf32>
    %145 = vector.extract_strided_slice %142 {offsets = [0, 256], sizes = [2, 128], strides = [1, 1]} : vector<2x384xf32> to vector<2x128xf32>
    %146 = vector.extract_strided_slice %136 {offsets = [0, 384], sizes = [2, 128], strides = [1, 1]} : vector<2x512xf32> to vector<2x128xf32>
    %147 = math.tanh %146 : vector<2x128xf32>
    %148 = arith.mulf %144, %125 : vector<2x128xf32>
    %149 = arith.mulf %143, %147 : vector<2x128xf32>
    %150 = arith.addf %148, %149 : vector<2x128xf32>
    %151 = math.tanh %150 : vector<2x128xf32>
    %152 = arith.mulf %145, %151 : vector<2x128xf32>
    %c6 = arith.constant 6 : index
    %c0_31 = arith.constant 0 : index
    %c0_32 = arith.constant 0 : index
    %153 = vector.load %arg0[%c6, %c0_31, %c0_32] : memref<13x2x1xf32, #tpu.memory_space<vmem>>, vector<1x2x1xf32>
    %154 = vector.shape_cast %153 : vector<1x2x1xf32> to vector<2x1xf32>
    %155 = vector.broadcast %154 : vector<2x1xf32> to vector<2x512xf32>
    %156 = vector.broadcast %0 : vector<1x512xf32> to vector<2x512xf32>
    %157 = arith.mulf %155, %156 : vector<2x512xf32>
    %158 = vector.broadcast %1 : vector<1x512xf32> to vector<2x512xf32>
    %159 = arith.addf %157, %158 : vector<2x512xf32>
    %cst_33 = arith.constant dense<0.000000e+00> : vector<2x512xf32>
    %160 = tpu.matmul %152, %2, %cst_33 {dimension_numbers = #tpu.dot_dimension_numbers<[1], [0], [0], [1], [0, 0, 1, 1], [], []>} : vector<2x128xf32>, vector<128x512xf32>, vector<2x512xf32> -> vector<2x512xf32>
    %161 = arith.addf %159, %160 : vector<2x512xf32>
    %162 = vector.extract_strided_slice %161 {offsets = [0, 0], sizes = [2, 384], strides = [1, 1]} : vector<2x512xf32> to vector<2x384xf32>
    %163 = arith.negf %162 : vector<2x384xf32>
    %164 = math.exp %163 : vector<2x384xf32>
    %cst_34 = arith.constant 1.000000e+00 : f32
    %165 = vector.broadcast %cst_34 : f32 to vector<2x384xf32>
    %166 = arith.addf %165, %164 : vector<2x384xf32>
    %167 = arith.divf %165, %166 : vector<2x384xf32>
    %168 = vector.extract_strided_slice %167 {offsets = [0, 0], sizes = [2, 128], strides = [1, 1]} : vector<2x384xf32> to vector<2x128xf32>
    %169 = vector.extract_strided_slice %167 {offsets = [0, 128], sizes = [2, 128], strides = [1, 1]} : vector<2x384xf32> to vector<2x128xf32>
    %170 = vector.extract_strided_slice %167 {offsets = [0, 256], sizes = [2, 128], strides = [1, 1]} : vector<2x384xf32> to vector<2x128xf32>
    %171 = vector.extract_strided_slice %161 {offsets = [0, 384], sizes = [2, 128], strides = [1, 1]} : vector<2x512xf32> to vector<2x128xf32>
    %172 = math.tanh %171 : vector<2x128xf32>
    %173 = arith.mulf %169, %150 : vector<2x128xf32>
    %174 = arith.mulf %168, %172 : vector<2x128xf32>
    %175 = arith.addf %173, %174 : vector<2x128xf32>
    %176 = math.tanh %175 : vector<2x128xf32>
    %177 = arith.mulf %170, %176 : vector<2x128xf32>
    %c7 = arith.constant 7 : index
    %c0_35 = arith.constant 0 : index
    %c0_36 = arith.constant 0 : index
    %178 = vector.load %arg0[%c7, %c0_35, %c0_36] : memref<13x2x1xf32, #tpu.memory_space<vmem>>, vector<1x2x1xf32>
    %179 = vector.shape_cast %178 : vector<1x2x1xf32> to vector<2x1xf32>
    %180 = vector.broadcast %179 : vector<2x1xf32> to vector<2x512xf32>
    %181 = vector.broadcast %0 : vector<1x512xf32> to vector<2x512xf32>
    %182 = arith.mulf %180, %181 : vector<2x512xf32>
    %183 = vector.broadcast %1 : vector<1x512xf32> to vector<2x512xf32>
    %184 = arith.addf %182, %183 : vector<2x512xf32>
    %cst_37 = arith.constant dense<0.000000e+00> : vector<2x512xf32>
    %185 = tpu.matmul %177, %2, %cst_37 {dimension_numbers = #tpu.dot_dimension_numbers<[1], [0], [0], [1], [0, 0, 1, 1], [], []>} : vector<2x128xf32>, vector<128x512xf32>, vector<2x512xf32> -> vector<2x512xf32>
    %186 = arith.addf %184, %185 : vector<2x512xf32>
    %187 = vector.extract_strided_slice %186 {offsets = [0, 0], sizes = [2, 384], strides = [1, 1]} : vector<2x512xf32> to vector<2x384xf32>
    %188 = arith.negf %187 : vector<2x384xf32>
    %189 = math.exp %188 : vector<2x384xf32>
    %cst_38 = arith.constant 1.000000e+00 : f32
    %190 = vector.broadcast %cst_38 : f32 to vector<2x384xf32>
    %191 = arith.addf %190, %189 : vector<2x384xf32>
    %192 = arith.divf %190, %191 : vector<2x384xf32>
    %193 = vector.extract_strided_slice %192 {offsets = [0, 0], sizes = [2, 128], strides = [1, 1]} : vector<2x384xf32> to vector<2x128xf32>
    %194 = vector.extract_strided_slice %192 {offsets = [0, 128], sizes = [2, 128], strides = [1, 1]} : vector<2x384xf32> to vector<2x128xf32>
    %195 = vector.extract_strided_slice %192 {offsets = [0, 256], sizes = [2, 128], strides = [1, 1]} : vector<2x384xf32> to vector<2x128xf32>
    %196 = vector.extract_strided_slice %186 {offsets = [0, 384], sizes = [2, 128], strides = [1, 1]} : vector<2x512xf32> to vector<2x128xf32>
    %197 = math.tanh %196 : vector<2x128xf32>
    %198 = arith.mulf %194, %175 : vector<2x128xf32>
    %199 = arith.mulf %193, %197 : vector<2x128xf32>
    %200 = arith.addf %198, %199 : vector<2x128xf32>
    %201 = math.tanh %200 : vector<2x128xf32>
    %202 = arith.mulf %195, %201 : vector<2x128xf32>
    %c8 = arith.constant 8 : index
    %c0_39 = arith.constant 0 : index
    %c0_40 = arith.constant 0 : index
    %203 = vector.load %arg0[%c8, %c0_39, %c0_40] : memref<13x2x1xf32, #tpu.memory_space<vmem>>, vector<1x2x1xf32>
    %204 = vector.shape_cast %203 : vector<1x2x1xf32> to vector<2x1xf32>
    %205 = vector.broadcast %204 : vector<2x1xf32> to vector<2x512xf32>
    %206 = vector.broadcast %0 : vector<1x512xf32> to vector<2x512xf32>
    %207 = arith.mulf %205, %206 : vector<2x512xf32>
    %208 = vector.broadcast %1 : vector<1x512xf32> to vector<2x512xf32>
    %209 = arith.addf %207, %208 : vector<2x512xf32>
    %cst_41 = arith.constant dense<0.000000e+00> : vector<2x512xf32>
    %210 = tpu.matmul %202, %2, %cst_41 {dimension_numbers = #tpu.dot_dimension_numbers<[1], [0], [0], [1], [0, 0, 1, 1], [], []>} : vector<2x128xf32>, vector<128x512xf32>, vector<2x512xf32> -> vector<2x512xf32>
    %211 = arith.addf %209, %210 : vector<2x512xf32>
    %212 = vector.extract_strided_slice %211 {offsets = [0, 0], sizes = [2, 384], strides = [1, 1]} : vector<2x512xf32> to vector<2x384xf32>
    %213 = arith.negf %212 : vector<2x384xf32>
    %214 = math.exp %213 : vector<2x384xf32>
    %cst_42 = arith.constant 1.000000e+00 : f32
    %215 = vector.broadcast %cst_42 : f32 to vector<2x384xf32>
    %216 = arith.addf %215, %214 : vector<2x384xf32>
    %217 = arith.divf %215, %216 : vector<2x384xf32>
    %218 = vector.extract_strided_slice %217 {offsets = [0, 0], sizes = [2, 128], strides = [1, 1]} : vector<2x384xf32> to vector<2x128xf32>
    %219 = vector.extract_strided_slice %217 {offsets = [0, 128], sizes = [2, 128], strides = [1, 1]} : vector<2x384xf32> to vector<2x128xf32>
    %220 = vector.extract_strided_slice %217 {offsets = [0, 256], sizes = [2, 128], strides = [1, 1]} : vector<2x384xf32> to vector<2x128xf32>
    %221 = vector.extract_strided_slice %211 {offsets = [0, 384], sizes = [2, 128], strides = [1, 1]} : vector<2x512xf32> to vector<2x128xf32>
    %222 = math.tanh %221 : vector<2x128xf32>
    %223 = arith.mulf %219, %200 : vector<2x128xf32>
    %224 = arith.mulf %218, %222 : vector<2x128xf32>
    %225 = arith.addf %223, %224 : vector<2x128xf32>
    %226 = math.tanh %225 : vector<2x128xf32>
    %227 = arith.mulf %220, %226 : vector<2x128xf32>
    %c9 = arith.constant 9 : index
    %c0_43 = arith.constant 0 : index
    %c0_44 = arith.constant 0 : index
    %228 = vector.load %arg0[%c9, %c0_43, %c0_44] : memref<13x2x1xf32, #tpu.memory_space<vmem>>, vector<1x2x1xf32>
    %229 = vector.shape_cast %228 : vector<1x2x1xf32> to vector<2x1xf32>
    %230 = vector.broadcast %229 : vector<2x1xf32> to vector<2x512xf32>
    %231 = vector.broadcast %0 : vector<1x512xf32> to vector<2x512xf32>
    %232 = arith.mulf %230, %231 : vector<2x512xf32>
    %233 = vector.broadcast %1 : vector<1x512xf32> to vector<2x512xf32>
    %234 = arith.addf %232, %233 : vector<2x512xf32>
    %cst_45 = arith.constant dense<0.000000e+00> : vector<2x512xf32>
    %235 = tpu.matmul %227, %2, %cst_45 {dimension_numbers = #tpu.dot_dimension_numbers<[1], [0], [0], [1], [0, 0, 1, 1], [], []>} : vector<2x128xf32>, vector<128x512xf32>, vector<2x512xf32> -> vector<2x512xf32>
    %236 = arith.addf %234, %235 : vector<2x512xf32>
    %237 = vector.extract_strided_slice %236 {offsets = [0, 0], sizes = [2, 384], strides = [1, 1]} : vector<2x512xf32> to vector<2x384xf32>
    %238 = arith.negf %237 : vector<2x384xf32>
    %239 = math.exp %238 : vector<2x384xf32>
    %cst_46 = arith.constant 1.000000e+00 : f32
    %240 = vector.broadcast %cst_46 : f32 to vector<2x384xf32>
    %241 = arith.addf %240, %239 : vector<2x384xf32>
    %242 = arith.divf %240, %241 : vector<2x384xf32>
    %243 = vector.extract_strided_slice %242 {offsets = [0, 0], sizes = [2, 128], strides = [1, 1]} : vector<2x384xf32> to vector<2x128xf32>
    %244 = vector.extract_strided_slice %242 {offsets = [0, 128], sizes = [2, 128], strides = [1, 1]} : vector<2x384xf32> to vector<2x128xf32>
    %245 = vector.extract_strided_slice %242 {offsets = [0, 256], sizes = [2, 128], strides = [1, 1]} : vector<2x384xf32> to vector<2x128xf32>
    %246 = vector.extract_strided_slice %236 {offsets = [0, 384], sizes = [2, 128], strides = [1, 1]} : vector<2x512xf32> to vector<2x128xf32>
    %247 = math.tanh %246 : vector<2x128xf32>
    %248 = arith.mulf %244, %225 : vector<2x128xf32>
    %249 = arith.mulf %243, %247 : vector<2x128xf32>
    %250 = arith.addf %248, %249 : vector<2x128xf32>
    %251 = math.tanh %250 : vector<2x128xf32>
    %252 = arith.mulf %245, %251 : vector<2x128xf32>
    %c10 = arith.constant 10 : index
    %c0_47 = arith.constant 0 : index
    %c0_48 = arith.constant 0 : index
    %253 = vector.load %arg0[%c10, %c0_47, %c0_48] : memref<13x2x1xf32, #tpu.memory_space<vmem>>, vector<1x2x1xf32>
    %254 = vector.shape_cast %253 : vector<1x2x1xf32> to vector<2x1xf32>
    %255 = vector.broadcast %254 : vector<2x1xf32> to vector<2x512xf32>
    %256 = vector.broadcast %0 : vector<1x512xf32> to vector<2x512xf32>
    %257 = arith.mulf %255, %256 : vector<2x512xf32>
    %258 = vector.broadcast %1 : vector<1x512xf32> to vector<2x512xf32>
    %259 = arith.addf %257, %258 : vector<2x512xf32>
    %cst_49 = arith.constant dense<0.000000e+00> : vector<2x512xf32>
    %260 = tpu.matmul %252, %2, %cst_49 {dimension_numbers = #tpu.dot_dimension_numbers<[1], [0], [0], [1], [0, 0, 1, 1], [], []>} : vector<2x128xf32>, vector<128x512xf32>, vector<2x512xf32> -> vector<2x512xf32>
    %261 = arith.addf %259, %260 : vector<2x512xf32>
    %262 = vector.extract_strided_slice %261 {offsets = [0, 0], sizes = [2, 384], strides = [1, 1]} : vector<2x512xf32> to vector<2x384xf32>
    %263 = arith.negf %262 : vector<2x384xf32>
    %264 = math.exp %263 : vector<2x384xf32>
    %cst_50 = arith.constant 1.000000e+00 : f32
    %265 = vector.broadcast %cst_50 : f32 to vector<2x384xf32>
    %266 = arith.addf %265, %264 : vector<2x384xf32>
    %267 = arith.divf %265, %266 : vector<2x384xf32>
    %268 = vector.extract_strided_slice %267 {offsets = [0, 0], sizes = [2, 128], strides = [1, 1]} : vector<2x384xf32> to vector<2x128xf32>
    %269 = vector.extract_strided_slice %267 {offsets = [0, 128], sizes = [2, 128], strides = [1, 1]} : vector<2x384xf32> to vector<2x128xf32>
    %270 = vector.extract_strided_slice %267 {offsets = [0, 256], sizes = [2, 128], strides = [1, 1]} : vector<2x384xf32> to vector<2x128xf32>
    %271 = vector.extract_strided_slice %261 {offsets = [0, 384], sizes = [2, 128], strides = [1, 1]} : vector<2x512xf32> to vector<2x128xf32>
    %272 = math.tanh %271 : vector<2x128xf32>
    %273 = arith.mulf %269, %250 : vector<2x128xf32>
    %274 = arith.mulf %268, %272 : vector<2x128xf32>
    %275 = arith.addf %273, %274 : vector<2x128xf32>
    %276 = math.tanh %275 : vector<2x128xf32>
    %277 = arith.mulf %270, %276 : vector<2x128xf32>
    %c11 = arith.constant 11 : index
    %c0_51 = arith.constant 0 : index
    %c0_52 = arith.constant 0 : index
    %278 = vector.load %arg0[%c11, %c0_51, %c0_52] : memref<13x2x1xf32, #tpu.memory_space<vmem>>, vector<1x2x1xf32>
    %279 = vector.shape_cast %278 : vector<1x2x1xf32> to vector<2x1xf32>
    %280 = vector.broadcast %279 : vector<2x1xf32> to vector<2x512xf32>
    %281 = vector.broadcast %0 : vector<1x512xf32> to vector<2x512xf32>
    %282 = arith.mulf %280, %281 : vector<2x512xf32>
    %283 = vector.broadcast %1 : vector<1x512xf32> to vector<2x512xf32>
    %284 = arith.addf %282, %283 : vector<2x512xf32>
    %cst_53 = arith.constant dense<0.000000e+00> : vector<2x512xf32>
    %285 = tpu.matmul %277, %2, %cst_53 {dimension_numbers = #tpu.dot_dimension_numbers<[1], [0], [0], [1], [0, 0, 1, 1], [], []>} : vector<2x128xf32>, vector<128x512xf32>, vector<2x512xf32> -> vector<2x512xf32>
    %286 = arith.addf %284, %285 : vector<2x512xf32>
    %287 = vector.extract_strided_slice %286 {offsets = [0, 0], sizes = [2, 384], strides = [1, 1]} : vector<2x512xf32> to vector<2x384xf32>
    %288 = arith.negf %287 : vector<2x384xf32>
    %289 = math.exp %288 : vector<2x384xf32>
    %cst_54 = arith.constant 1.000000e+00 : f32
    %290 = vector.broadcast %cst_54 : f32 to vector<2x384xf32>
    %291 = arith.addf %290, %289 : vector<2x384xf32>
    %292 = arith.divf %290, %291 : vector<2x384xf32>
    %293 = vector.extract_strided_slice %292 {offsets = [0, 0], sizes = [2, 128], strides = [1, 1]} : vector<2x384xf32> to vector<2x128xf32>
    %294 = vector.extract_strided_slice %292 {offsets = [0, 128], sizes = [2, 128], strides = [1, 1]} : vector<2x384xf32> to vector<2x128xf32>
    %295 = vector.extract_strided_slice %292 {offsets = [0, 256], sizes = [2, 128], strides = [1, 1]} : vector<2x384xf32> to vector<2x128xf32>
    %296 = vector.extract_strided_slice %286 {offsets = [0, 384], sizes = [2, 128], strides = [1, 1]} : vector<2x512xf32> to vector<2x128xf32>
    %297 = math.tanh %296 : vector<2x128xf32>
    %298 = arith.mulf %294, %275 : vector<2x128xf32>
    %299 = arith.mulf %293, %297 : vector<2x128xf32>
    %300 = arith.addf %298, %299 : vector<2x128xf32>
    %301 = math.tanh %300 : vector<2x128xf32>
    %302 = arith.mulf %295, %301 : vector<2x128xf32>
    %c12 = arith.constant 12 : index
    %c0_55 = arith.constant 0 : index
    %c0_56 = arith.constant 0 : index
    %303 = vector.load %arg0[%c12, %c0_55, %c0_56] : memref<13x2x1xf32, #tpu.memory_space<vmem>>, vector<1x2x1xf32>
    %304 = vector.shape_cast %303 : vector<1x2x1xf32> to vector<2x1xf32>
    %305 = vector.broadcast %304 : vector<2x1xf32> to vector<2x512xf32>
    %306 = vector.broadcast %0 : vector<1x512xf32> to vector<2x512xf32>
    %307 = arith.mulf %305, %306 : vector<2x512xf32>
    %308 = vector.broadcast %1 : vector<1x512xf32> to vector<2x512xf32>
    %309 = arith.addf %307, %308 : vector<2x512xf32>
    %cst_57 = arith.constant dense<0.000000e+00> : vector<2x512xf32>
    %310 = tpu.matmul %302, %2, %cst_57 {dimension_numbers = #tpu.dot_dimension_numbers<[1], [0], [0], [1], [0, 0, 1, 1], [], []>} : vector<2x128xf32>, vector<128x512xf32>, vector<2x512xf32> -> vector<2x512xf32>
    %311 = arith.addf %309, %310 : vector<2x512xf32>
    %312 = vector.extract_strided_slice %311 {offsets = [0, 0], sizes = [2, 384], strides = [1, 1]} : vector<2x512xf32> to vector<2x384xf32>
    %313 = arith.negf %312 : vector<2x384xf32>
    %314 = math.exp %313 : vector<2x384xf32>
    %cst_58 = arith.constant 1.000000e+00 : f32
    %315 = vector.broadcast %cst_58 : f32 to vector<2x384xf32>
    %316 = arith.addf %315, %314 : vector<2x384xf32>
    %317 = arith.divf %315, %316 : vector<2x384xf32>
    %318 = vector.extract_strided_slice %317 {offsets = [0, 0], sizes = [2, 128], strides = [1, 1]} : vector<2x384xf32> to vector<2x128xf32>
    %319 = vector.extract_strided_slice %317 {offsets = [0, 128], sizes = [2, 128], strides = [1, 1]} : vector<2x384xf32> to vector<2x128xf32>
    %320 = vector.extract_strided_slice %317 {offsets = [0, 256], sizes = [2, 128], strides = [1, 1]} : vector<2x384xf32> to vector<2x128xf32>
    %321 = vector.extract_strided_slice %311 {offsets = [0, 384], sizes = [2, 128], strides = [1, 1]} : vector<2x512xf32> to vector<2x128xf32>
    %322 = math.tanh %321 : vector<2x128xf32>
    %323 = arith.mulf %319, %300 : vector<2x128xf32>
    %324 = arith.mulf %318, %322 : vector<2x128xf32>
    %325 = arith.addf %323, %324 : vector<2x128xf32>
    %326 = math.tanh %325 : vector<2x128xf32>
    %327 = arith.mulf %320, %326 : vector<2x128xf32>
    %328 = vector.broadcast %3 : vector<1x128xf32> to vector<2x128xf32>
    %329 = arith.mulf %327, %328 : vector<2x128xf32>
    %cst_59 = arith.constant dense<0.000000e+00> : vector<2xf32>
    %330 = vector.multi_reduction <add>, %329, %cst_59 [1] : vector<2x128xf32> to vector<2xf32>
    %331 = vector.shape_cast %330 : vector<2xf32> to vector<2x1xf32>
    %c0_60 = arith.constant 0 : index
    %c0_61 = arith.constant 0 : index
    %332 = memref.load %arg5[%c0_60, %c0_61] : memref<1x1xf32, #tpu.memory_space<smem>>
    %333 = vector.broadcast %332 : f32 to vector<2x1xf32>
    %334 = arith.addf %331, %333 : vector<2x1xf32>
    %c0_62 = arith.constant 0 : index
    %c0_63 = arith.constant 0 : index
    %335 = vector.load %arg6[%c0_62, %c0_63] : memref<2x1xf32, #tpu.memory_space<vmem>>, vector<2x1xf32>
    tpu.vector_store %arg6[%c0_62, %c0_63], %334 {strides = array<i32>} : memref<2x1xf32, #tpu.memory_space<vmem>>, vector<2x1xf32>,
    return
  }
}

</mosaic_0001>

<bundles_post_ra>
// kernel: tpu_custom_call.1
= control target key start
LH: loop header
LB: loop body
LE: loop exit
PB: predicated region body
PF: predicated region fallthrough
CT: control target
= control target key end

     0   :  { %12 = vsyncpa [#allocation4], 0  ;;  %s2843_s21 = smov [#allocation3]   ;;  %s4280_s0 = inlined_call_operand.vmem [shape: f32[13,2,1], index: 0, kind: input, shape index: {}]   ;;  %s4281_s1 = inlined_call_operand.vmem [shape: f32[1,512], index: 1, kind: input, shape index: {}]   ;;  %s4282_s2 = inlined_call_operand.vmem [shape: f32[1,512], index: 2, kind: input, shape index: {}]   ;;  %s4283_s3 = inlined_call_operand.hbm [shape: f32[128,512], index: 3, kind: input, shape index: {}]   ;;  %s4284_s4 = inlined_call_operand.vmem [shape: f32[1,128], index: 4, kind: input, shape index: {}]   ;;  %s4285_s5 = inlined_call_operand.<no memory space> [shape: f32[1,1], index: 5, kind: input, shape index: {}]   ;;  %s4286_s6 = inlined_call_operand.vmem [shape: f32[2,1], index: 6, kind: output, shape index: {}]  }
   0x1   :  { %s24_s22 = sshll.u32 %s2843_s21, 4  ;;  %s25_s22 = int_to_ptr.vmem [resolvable:$true] %s24_s22 }
   0x2   :  { %s2829_s23 = scalar_lea.vmem %s25_s22, 8192  ;;  %p2834_p1 = scmp.lt.s32.totalorder %s25_s22, %s25_s22 }
   0x3   :  { %p2830_p0 = scmp.ne.s32.totalorder %s25_s22, %s2829_s23  ;;  %p2835_p2 = scmp.lt.s32.totalorder %s2829_s23, %s2829_s23 }
   0x5   :  { %p2836_p3 = por %p2835_p2, %p2834_p1 }
   0x7   :  { %p2837_p4 = pnand %p2836_p3, %p2830_p0 }
   0x9   :  { %2840 = shalt.err (!%p2837_p4)
}
   0xa   :  { %s2844_s24 = smov 512   ;;  %s2845_s25 = smov 32  }
   0xb   :  { %30 = dma.hbm_to_vmem [thread:$0]  %s4283_s3, 8192, %s25_s22, [#allocation4], %s2844_s24, %s2844_s24, %s2845_s25  }
   0xc   :  { %2841 = dma.done.wait [#allocation4], 8192  }
   0xd   :  { %2842 = vsyncadd [#allocation4], 4294959104  ;;  %v2846_v0 = vmov 0   ;;  %v105_v1 = vld [vmem:[%s4280_s0] sm:$0x3]  ;;  %v2907_v8 = vld [vmem:[#allocation3 + $0x1e8] sm:$0xff] }
   0xe   :  { %2483 = vset.pattern.permute.xlu0 %v2846_v0  ;;  %2484 = vset.pattern.permute.xlu1 %v2846_v0  ;;  %v2429_v2 = vld [vmem:[%s4280_s0 + $0x2] sm:$0x3]  ;;  %v2441_v3 = vld [vmem:[%s4280_s0 + $0x8] sm:$0x3]  ;;  %v2449_v4 = vld [vmem:[%s4280_s0 + $0xc] sm:$0x3] }
   0xf   :  { %108 = vperm.xlu0 %2483, %v105_v1   ;;  %v2457_v5 = vld [vmem:[%s4280_s0 + $0x10] sm:$0x3]  ;;  %v2465_v6 = vld [vmem:[%s4280_s0 + $0x14] sm:$0x3]  ;;  %v2473_v7 = vld [vmem:[%s4280_s0 + $0x18] sm:$0x3]  ;;  %200 = vmatprep.subr.mxu0 %v2907_v8 }
  0x10   :  { %4433 = vst [vmem:[#allocation6_spill] sm:$0xff] %v2907_v8  ;;  %v2909_v9 = vld [vmem:[#allocation3 + $0x1f8] sm:$0xff]  ;;  %v2913_v10 = vld [vmem:[#allocation3 + $0x1e0] sm:$0xff]  ;;  %v2915_v11 = vld [vmem:[#allocation3 + $0x1f0] sm:$0xff]  ;;  %vm2412_vm0 = vcmask 1041408   ;;  %vm2419_vm1 = vcmask 1024  }
  0x11   :  { %4434 = vst [vmem:[#allocation7_spill] sm:$0xff] %v2909_v9  ;;  %271 = vmatprep.subr.mxu1 %v2909_v9  ;;  %201 = vmatpush1.msra.mxu0 %v2913_v10  ;;  %v2919_v12 = vld [vmem:[#allocation3 + $0x1c8] sm:$0xff]  ;;  %v2921_v13 = vld [vmem:[#allocation3 + $0x1d8] sm:$0xff]  ;;  %v2924_v14 = vld [vmem:[#allocation3 + $0x1c0] sm:$0xff] }
  0x12   :  { %272 = vmatpush1.msra.mxu1 %v2915_v11  ;;  %202 = vmatprep.subr.mxu0 %v2919_v12  ;;  %v2926_v15 = vld [vmem:[#allocation3 + $0x1d0] sm:$0xff]  ;;  %v2930_v16 = vld [vmem:[#allocation3 + $0x1a8] sm:$0xff]  ;;  %v2932_v17 = vld [vmem:[#allocation3 + $0x1b8] sm:$0xff] }
  0x13   :  { %189 = vperm.xlu0 %2483, %v2429_v2   ;;  %273 = vmatprep.subr.mxu1 %v2921_v13  ;;  %v2936_v18 = vld [vmem:[#allocation3 + $0x1a0] sm:$0xff]  ;;  %v2938_v19 = vld [vmem:[#allocation3 + $0x1b0] sm:$0xff]  ;;  %v2942_v20 = vld [vmem:[#allocation3 + $0x188] sm:$0xff] }
  0x14   :  { %203 = vmatpush1.msra.mxu0 %v2924_v14  ;;  %274 = vmatpush1.msra.mxu1 %v2926_v15  ;;  %v2944_v21 = vld [vmem:[#allocation3 + $0x198] sm:$0xff]  ;;  %v2948_v22 = vld [vmem:[#allocation3 + $0x180] sm:$0xff]  ;;  %v2950_v23 = vld [vmem:[#allocation3 + $0x190] sm:$0xff] }
  0x15   :  { %204 = vmatprep.subr.mxu0 %v2930_v16  ;;  %275 = vmatprep.subr.mxu1 %v2932_v17  ;;  %v2954_v24 = vld [vmem:[#allocation3 + $0x168] sm:$0xff]  ;;  %v2956_v25 = vld [vmem:[#allocation3 + $0x178] sm:$0xff]  ;;  %v2960_v26 = vld [vmem:[#allocation3 + $0x160] sm:$0xff] }
  0x16   :  { %205 = vmatpush1.msra.mxu0 %v2936_v18  ;;  %276 = vmatpush1.msra.mxu1 %v2938_v19  ;;  %v2962_v27 = vld [vmem:[#allocation3 + $0x170] sm:$0xff]  ;;  %v2966_v28 = vld [vmem:[#allocation3 + $0x148] sm:$0xff]  ;;  %v2968_v29 = vld [vmem:[#allocation3 + $0x158] sm:$0xff] }
  0x17   :  { %744 = vperm.xlu0 %2483, %v2441_v3   ;;  %206 = vmatprep.subr.mxu0 %v2942_v20  ;;  %v2972_v30 = vld [vmem:[#allocation3 + $0x140] sm:$0xff]  ;;  %v2974_v31 = vld [vmem:[#allocation3 + $0x150] sm:$0xff]  ;;  %v2978_v32 = vld [vmem:[#allocation3 + $0x128] sm:$0xff] }
  0x18   :  { %277 = vmatprep.subr.mxu1 %v2944_v21  ;;  %207 = vmatpush1.msra.mxu0 %v2948_v22  ;;  %v2980_v33 = vld [vmem:[#allocation3 + $0x138] sm:$0xff]  ;;  %v2984_v34 = vld [vmem:[#allocation3 + $0x120] sm:$0xff]  ;;  %v2986_v35 = vld [vmem:[#allocation3 + $0x130] sm:$0xff] }
  0x19   :  { %278 = vmatpush1.msra.mxu1 %v2950_v23  ;;  %208 = vmatprep.subr.mxu0 %v2954_v24  ;;  %v2990_v36 = vld [vmem:[#allocation3 + $0x108] sm:$0xff]  ;;  %v2992_v37 = vld [vmem:[#allocation3 + $0x118] sm:$0xff]  ;;  %v2994_v38 = vld [vmem:[#allocation3 + $0x100] sm:$0xff] }
  0x1a   :  { %279 = vmatprep.subr.mxu1 %v2956_v25  ;;  %209 = vmatpush1.msra.mxu0 %v2960_v26  ;;  %v2998_v39 = vld [vmem:[#allocation3 + $0x110] sm:$0xff]  ;;  %v3000_v40 = vld [vmem:[#allocation3 + $0xe8] sm:$0xff]  ;;  %v3002_v41 = vld [vmem:[#allocation3 + $0xf8] sm:$0xff] }
  0x1b   :  { %1114 = vperm.xlu0 %2483, %v2449_v4   ;;  %280 = vmatpush1.msra.mxu1 %v2962_v27  ;;  %v3006_v42 = vld [vmem:[#allocation3 + $0xe0] sm:$0xff]  ;;  %v3008_v43 = vld [vmem:[#allocation3 + $0xf0] sm:$0xff]  ;;  %v3010_v44 = vld [vmem:[#allocation3 + $0xc8] sm:$0xff] }
  0x1c   :  { %210 = vmatprep.subr.mxu0 %v2966_v28  ;;  %281 = vmatprep.subr.mxu1 %v2968_v29  ;;  %v3014_v45 = vld [vmem:[#allocation3 + $0xd8] sm:$0xff]  ;;  %v3016_v46 = vld [vmem:[#allocation3 + $0xc0] sm:$0xff]  ;;  %v3020_v47 = vld [vmem:[#allocation3 + $0xd0] sm:$0xff] }
  0x1d   :  { %211 = vmatpush1.msra.mxu0 %v2972_v30  ;;  %282 = vmatpush1.msra.mxu1 %v2974_v31  ;;  %v3022_v48 = vld [vmem:[#allocation3 + $0xa8] sm:$0xff]  ;;  %v3026_v49 = vld [vmem:[#allocation3 + $0xb8] sm:$0xff]  ;;  %v3028_v50 = vld [vmem:[#allocation3 + $0xa0] sm:$0xff] }
  0x1e   :  { %212 = vmatprep.subr.mxu0 %v2978_v32  ;;  %283 = vmatprep.subr.mxu1 %v2980_v33  ;;  %4435 = vst [vmem:[#allocation8_spill] sm:$0xff] %v3028_v50  ;;  %v3032_v51 = vld [vmem:[#allocation3 + $0xb0] sm:$0xff]  ;;  %v3034_v52 = vld [vmem:[#allocation3 + $0x88] sm:$0xff]  ;;  %v3038_v53 = vld [vmem:[#allocation3 + $0x98] sm:$0xff] }
  0x1f   :  { %1484 = vperm.xlu0 %2483, %v2457_v5   ;;  %213 = vmatpush1.msra.mxu0 %v2984_v34  ;;  %4436 = vst [vmem:[#allocation9_spill] sm:$0xff] %v3032_v51  ;;  %4437 = vst [vmem:[#allocation10_spill] sm:$0xff] %v3034_v52  ;;  %v3040_v54 = vld [vmem:[#allocation3 + $0x80] sm:$0xff]  ;;  %v3044_v55 = vld [vmem:[#allocation3 + $0x90] sm:$0xff] }
  0x20   :  { %284 = vmatpush1.msra.mxu1 %v2986_v35  ;;  %214 = vmatprep.subr.mxu0 %v2990_v36  ;;  %4438 = vst [vmem:[#allocation11_spill] sm:$0xff] %v3038_v53  ;;  %4439 = vst [vmem:[#allocation12_spill] sm:$0xff] %v3040_v54  ;;  %v3046_v56 = vld [vmem:[#allocation3 + $0x68] sm:$0xff]  ;;  %v3050_v57 = vld [vmem:[#allocation3 + $0x78] sm:$0xff] }
  0x21   :  { %285 = vmatprep.subr.mxu1 %v2992_v37  ;;  %215 = vmatpush1.msra.mxu0 %v2994_v38  ;;  %4440 = vst [vmem:[#allocation13_spill] sm:$0xff] %v3044_v55  ;;  %4441 = vst [vmem:[#allocation14_spill] sm:$0xff] %v3046_v56  ;;  %v3052_v58 = vld [vmem:[#allocation3 + $0x60] sm:$0xff]  ;;  %v3056_v59 = vld [vmem:[#allocation3 + $0x70] sm:$0xff] }
  0x22   :  { %286 = vmatpush1.msra.mxu1 %v2998_v39  ;;  %216 = vmatprep.subr.mxu0 %v3000_v40  ;;  %4442 = vst [vmem:[#allocation15_spill] sm:$0xff] %v3050_v57  ;;  %4443 = vst [vmem:[#allocation16_spill] sm:$0xff] %v3052_v58  ;;  %v3058_v60 = vld [vmem:[#allocation3 + $0x48] sm:$0xff]  ;;  %v3062_v61 = vld [vmem:[#allocation3 + $0x58] sm:$0xff] }
  0x23   :  { %1854 = vperm.xlu0 %2483, %v2465_v6   ;;  %287 = vmatprep.subr.mxu1 %v3002_v41  ;;  %4444 = vst [vmem:[#allocation17_spill] sm:$0xff] %v3056_v59  ;;  %4445 = vst [vmem:[#allocation18_spill] sm:$0xff] %v3058_v60  ;;  %v3064_v62 = vld [vmem:[#allocation3 + $0x40] sm:$0xff]  ;;  %v3068_v63 = vld [vmem:[#allocation3 + $0x50] sm:$0xff] }
  0x24   :  { %217 = vmatpush1.msra.mxu0 %v3006_v42  ;;  %288 = vmatpush1.msra.mxu1 %v3008_v43  ;;  %4446 = vst [vmem:[#allocation19_spill] sm:$0xff] %v3062_v61  ;;  %4447 = vst [vmem:[#allocation20_spill] sm:$0xff] %v3064_v62  ;;  %v3070_v0 = vld [vmem:[#allocation3 + $0x28] sm:$0xff]  ;;  %v3074_v1 = vld [vmem:[#allocation3 + $0x38] sm:$0xff] }
  0x25   :  { %218 = vmatprep.subr.mxu0 %v3010_v44  ;;  %289 = vmatprep.subr.mxu1 %v3014_v45  ;;  %4448 = vst [vmem:[#allocation21_spill] sm:$0xff] %v3068_v63  ;;  %4449 = vst [vmem:[#allocation22_spill] sm:$0xff] %v3070_v0  ;;  %v3076_v2 = vld [vmem:[#allocation3 + $0x20] sm:$0xff]  ;;  %v3080_v3 = vld [vmem:[#allocation3 + $0x30] sm:$0xff] }
  0x26   :  { %219 = vmatpush1.msra.mxu0 %v3016_v46  ;;  %290 = vmatpush1.msra.mxu1 %v3020_v47  ;;  %4450 = vst [vmem:[#allocation23_spill] sm:$0xff] %v3074_v1  ;;  %4451 = vst [vmem:[#allocation24_spill] sm:$0xff] %v3076_v2  ;;  %v3082_v4 = vld [vmem:[#allocation3 + $0x8] sm:$0xff]  ;;  %v3086_v5 = vld [vmem:[#allocation3 + $0x18] sm:$0xff] }
  0x27   :  { %2224 = vperm.xlu0 %2483, %v2473_v7   ;;  %220 = vmatprep.subr.mxu0 %v3022_v48  ;;  %4452 = vst [vmem:[#allocation25_spill] sm:$0xff] %v3080_v3  ;;  %4453 = vst [vmem:[#allocation26_spill] sm:$0xff] %v3082_v4  ;;  %v3088_v6 = vld [vmem:[#allocation3] sm:$0xff]  ;;  %v3092_v7 = vld [vmem:[#allocation3 + $0x10] sm:$0xff] }
  0x28   :  { %291 = vmatprep.subr.mxu1 %v3026_v49  ;;  %221 = vmatpush1.msra.mxu0 %v3028_v50  ;;  %4454 = vst [vmem:[#allocation27_spill] sm:$0xff] %v3086_v5  ;;  %4455 = vst [vmem:[#allocation28_spill] sm:$0xff] %v3088_v6 }
  0x29   :  { %292 = vmatpush1.msra.mxu1 %v3032_v51  ;;  %222 = vmatprep.subr.mxu0 %v3034_v52  ;;  %4456 = vst [vmem:[#allocation29_spill] sm:$0xff] %v3092_v7 }
  0x2a   :  { %293 = vmatprep.subr.mxu1 %v3038_v53  ;;  %223 = vmatpush1.msra.mxu0 %v3040_v54 }
  0x2b   :  { %294 = vmatpush1.msra.mxu1 %v3044_v55  ;;  %224 = vmatprep.subr.mxu0 %v3046_v56 }
  0x2c   :  { %295 = vmatprep.subr.mxu1 %v3050_v57  ;;  %225 = vmatpush1.msra.mxu0 %v3052_v58 }
  0x2d   :  { %296 = vmatpush1.msra.mxu1 %v3056_v59  ;;  %226 = vmatprep.subr.mxu0 %v3058_v60 }
  0x2e   :  { %297 = vmatprep.subr.mxu1 %v3062_v61  ;;  %227 = vmatpush1.msra.mxu0 %v3064_v62 }
  0x2f   :  { %298 = vmatpush1.msra.mxu1 %v3068_v63  ;;  %228 = vmatprep.subr.mxu0 %v3070_v0  ;;  %v4305_v63 = vmov 0.0  }
  0x30   :  { %299 = vmatprep.subr.mxu1 %v3074_v1  ;;  %229 = vmatpush1.msra.mxu0 %v3076_v2  ;;  %v112_v2 = vlaneseq }
  0x31   :  { %300 = vmatpush1.msra.mxu1 %v3080_v3  ;;  %230 = vmatprep.subr.mxu0 %v3082_v4 }
  0x32   :  { %301 = vmatprep.subr.mxu1 %v3086_v5  ;;  %231 = vmatpush1.msra.mxu0 %v3088_v6  ;;  %v113_v1 = vshrl.u32 %v112_v2, 7  ;;  %v38_v5 = vld [vmem:[%s4281_s1] sm:$0xf] }
  0x33   :  { %264 = vmatprep.mubr.f32.mxu0 %v4305_v63  ;;  %302 = vmatpush1.msra.mxu1 %v3092_v7  ;;  %v39_v6 = vld [vmem:[%s4282_s2] sm:$0xf] }
  0x34   :  { %335 = vmatprep.mubr.f32.mxu1 %v4305_v63  ;;  %385 = vmatprep.subr.mxu0 %v2907_v8  ;;  %v114_v3 = vsub.s32 0, %v113_v1  ;;  %v118_v0 = vsub.s32 1, %v113_v1  ;;  %v122_v2 = vsub.s32 2, %v113_v1  ;;  %v126_v55 = vsub.s32 3, %v113_v1 }
  0x35   :  { %456 = vmatprep.subr.mxu1 %v2909_v9 }
  0x36   :  { %v3109_v4 = vrot.slane %v38_v5, %v114_v3  ;;  %v3111_v7 = vrot.slane %v38_v5, %v118_v0  ;;  %v3113_v63 = vrot.slane %v39_v6, %v114_v3  ;;  %v3115_v8 = vrot.slane %v39_v6, %v118_v0 }
  0x37   :  { %v3121_v58 = vrot.slane %v38_v5, %v122_v2  ;;  %v3124_v3 = vrot.slane %v39_v6, %v122_v2  ;;  %v3126_v54 = vrot.slane %v38_v5, %v126_v55 }
  0x38   :  { %4457 = vst [vmem:[#allocation30_spill] sm:$0xff] %v3109_v4  ;;  %4458 = vst [vmem:[#allocation31_spill] sm:$0xff] %v3111_v7 }
  0x39   :  { %4459 = vst [vmem:[#allocation32_spill] sm:$0xff] %v3113_v63  ;;  %4460 = vst [vmem:[#allocation33_spill] sm:$0xff] %v3115_v8 }
  0x3a   :  { %4461 = vst [vmem:[#allocation34_spill] sm:$0xff] %v3121_v58  ;;  %4462 = vst [vmem:[#allocation35_spill] sm:$0xff] %v3124_v3 }
  0x8a   :  { %v109_v9 = vpop.permute.xlu0 %108 }
  0x8b   :  { %v132_v62 = vmul.f32 %v3109_v4, %v109_v9  ;;  %v133_v61 = vmul.f32 %v3111_v7, %v109_v9  ;;  %v134_v0 = vmul.f32 %v3121_v58, %v109_v9  ;;  %v135_v7 = vmul.f32 %v3126_v54, %v109_v9 }
  0x8d   :  { %v157_v60 = vadd.f32 %v3113_v63, %v132_v62  ;;  %v158_v59 = vadd.f32 %v3115_v8, %v133_v61  ;;  %v159_v4 = vadd.f32 %v3124_v3, %v134_v0  ;;  %v3130_v62 = vrot.slane %v39_v6, %v126_v55 }
  0x8f   :  { %v2426_v57 = vmul.f32 -1.442695, %v157_v60  ;;  %v2427_v56 = vmul.f32 -1.442695, %v158_v59  ;;  %v2428_v61 = vmul.f32 -1.442695, %v159_v4  ;;  %v160_v8 = vadd.f32 %v3130_v62, %v135_v7 }
  0x91   :  { %2485 = vpow2.f32 %v2426_v57 }
  0x92   :  { %2487 = vpow2.f32 %v2427_v56 }
  0x93   :  { %2489 = vpow2.f32 %v2428_v61  ;;  %v4466_v61 = vld [vmem:[#allocation15_spill] sm:$0xff] }
  0x94   :  { %2491 = vtanh.f32 %v160_v8  ;;  %v4463_v8 = vld [vmem:[#allocation12_spill] sm:$0xff] }
  0x9e   :  { %v2486_v60 = vpop.eup %2485 }
  0x9f   :  { %v2488_v59 = vpop.eup %2487  ;;  %v170_v57 = vadd.f32 1.0, %v2486_v60  ;;  %v4467_v60 = vld [vmem:[#allocation16_spill] sm:$0xff] }
  0xa0   :  { %v171_v56 = vadd.f32 1.0, %v2488_v59  ;;  %v2490_v1 = vpop.eup %2489  ;;  %v4468_v59 = vld [vmem:[#allocation17_spill] sm:$0xff] }
  0xa1   :  { %2493 = vrcp.f32 %v170_v57  ;;  %v2492_v5 = vpop.eup %2491  ;;  %v172_v0 = vadd.f32 1.0, %v2490_v1  ;;  %v4469_v57 = vld [vmem:[#allocation18_spill] sm:$0xff]  ;;  %v4471_v1 = vld [vmem:[#allocation20_spill] sm:$0xff] }
  0xa2   :  { %2495 = vrcp.f32 %v171_v56  ;;  %v4470_v56 = vld [vmem:[#allocation19_spill] sm:$0xff] }
  0xa3   :  { %2497 = vrcp.f32 %v172_v0  ;;  %v4474_v0 = vld [vmem:[#allocation23_spill] sm:$0xff] }
  0xae   :  { %v2494_v2 = vpop.eup %2493 }
  0xaf   :  { %v2496_v58 = vpop.eup %2495  ;;  %v181_v3 = vmul.f32 %v2494_v2, %v2492_v5  ;;  %v4472_v5 = vld [vmem:[#allocation21_spill] sm:$0xff]  ;;  %v4473_v2 = vld [vmem:[#allocation22_spill] sm:$0xff] }
  0xb0   :  { %v180_v9 = vmul.f32 0.0, %v2496_v58  ;;  %v2498_v4 = vpop.eup %2497  ;;  %v4464_v58 = vld [vmem:[#allocation13_spill] sm:$0xff] }
  0xb2   :  { %v3133_v55 = vadd.f32 %v181_v3, %v180_v9  ;;  %v4465_v3 = vld [vmem:[#allocation14_spill] sm:$0xff]  ;;  %v4475_v9 = vld [vmem:[#allocation24_spill] sm:$0xff] }
  0xb4   :  { %2499 = vtanh.f32 %v3133_v55 }
  0xc1   :  { %v2500_v6 = vpop.eup %2499 }
  0xc2   :  { %v184_v7 = vmul.f32 %v2500_v6, %v2498_v4  ;;  %v4476_v4 = vld [vmem:[#allocation25_spill] sm:$0xff]  ;;  %v4477_v6 = vld [vmem:[#allocation26_spill] sm:$0xff] }
  0xc4   :  { %265 = vmatmul.mubr.f32.vlgmr.msra.gmra.mxu0 %v184_v7  ;;  %336 = vmatmul.mubr.f32.vlgmr.msra.gmra.mxu1 %v184_v7  ;;  %v4478_v7 = vld [vmem:[#allocation27_spill] sm:$0xff] }
  0xc5   :  { %386 = vmatpush1.msra.mxu0 %v2913_v10  ;;  %457 = vmatpush1.msra.mxu1 %v2915_v11 }
  0xc6   :  { %387 = vmatprep.subr.mxu0 %v2919_v12  ;;  %458 = vmatprep.subr.mxu1 %v2921_v13 }
  0xc7   :  { %388 = vmatpush1.msra.mxu0 %v2924_v14  ;;  %459 = vmatpush1.msra.mxu1 %v2926_v15 }
  0xc8   :  { %389 = vmatprep.subr.mxu0 %v2930_v16  ;;  %460 = vmatprep.subr.mxu1 %v2932_v17 }
  0xc9   :  { %390 = vmatpush1.msra.mxu0 %v2936_v18  ;;  %461 = vmatpush1.msra.mxu1 %v2938_v19 }
  0xca   :  { %391 = vmatprep.subr.mxu0 %v2942_v20  ;;  %462 = vmatprep.subr.mxu1 %v2944_v21 }
  0xcb   :  { %392 = vmatpush1.msra.mxu0 %v2948_v22  ;;  %463 = vmatpush1.msra.mxu1 %v2950_v23 }
  0xcc   :  { %393 = vmatprep.subr.mxu0 %v2954_v24  ;;  %464 = vmatprep.subr.mxu1 %v2956_v25 }
  0xcd   :  { %394 = vmatpush1.msra.mxu0 %v2960_v26  ;;  %465 = vmatpush1.msra.mxu1 %v2962_v27 }
  0xce   :  { %395 = vmatprep.subr.mxu0 %v2966_v28  ;;  %466 = vmatprep.subr.mxu1 %v2968_v29 }
  0xcf   :  { %396 = vmatpush1.msra.mxu0 %v2972_v30  ;;  %467 = vmatpush1.msra.mxu1 %v2974_v31 }
  0xd0   :  { %397 = vmatprep.subr.mxu0 %v2978_v32  ;;  %468 = vmatprep.subr.mxu1 %v2980_v33 }
  0xd1   :  { %398 = vmatpush1.msra.mxu0 %v2984_v34  ;;  %469 = vmatpush1.msra.mxu1 %v2986_v35 }
  0xd2   :  { %399 = vmatprep.subr.mxu0 %v2990_v36  ;;  %470 = vmatprep.subr.mxu1 %v2992_v37 }
  0xd3   :  { %400 = vmatpush1.msra.mxu0 %v2994_v38  ;;  %471 = vmatpush1.msra.mxu1 %v2998_v39 }
  0xd4   :  { %401 = vmatprep.subr.mxu0 %v3000_v40  ;;  %472 = vmatprep.subr.mxu1 %v3002_v41 }
  0xd5   :  { %402 = vmatpush1.msra.mxu0 %v3006_v42  ;;  %473 = vmatpush1.msra.mxu1 %v3008_v43 }
  0xd6   :  { %403 = vmatprep.subr.mxu0 %v3010_v44  ;;  %474 = vmatprep.subr.mxu1 %v3014_v45 }
  0xd7   :  { %404 = vmatpush1.msra.mxu0 %v3016_v46  ;;  %475 = vmatpush1.msra.mxu1 %v3020_v47 }
  0xd8   :  { %405 = vmatprep.subr.mxu0 %v3022_v48  ;;  %476 = vmatprep.subr.mxu1 %v3026_v49 }
  0xd9   :  { %406 = vmatpush1.msra.mxu0 %v3028_v50  ;;  %477 = vmatpush1.msra.mxu1 %v3032_v51 }
  0xda   :  { %407 = vmatprep.subr.mxu0 %v3034_v52  ;;  %478 = vmatprep.subr.mxu1 %v3038_v53  ;;  %v4488_v52 = vld [vmem:[#allocation35_spill] sm:$0xff] }
  0xdb   :  { %408 = vmatpush1.msra.mxu0 %v4463_v8  ;;  %479 = vmatpush1.msra.mxu1 %v4464_v58  ;;  %v4487_v8 = vld [vmem:[#allocation34_spill] sm:$0xff] }
  0xdc   :  { %409 = vmatprep.subr.mxu0 %v4465_v3  ;;  %480 = vmatprep.subr.mxu1 %v4466_v61 }
  0xdd   :  { %410 = vmatpush1.msra.mxu0 %v4467_v60  ;;  %481 = vmatpush1.msra.mxu1 %v4468_v59  ;;  %v4479_v59 = vld [vmem:[#allocation28_spill] sm:$0xff] }
  0xde   :  { %411 = vmatprep.subr.mxu0 %v4469_v57  ;;  %482 = vmatprep.subr.mxu1 %v4470_v56  ;;  %v4480_v57 = vmov 0.0   ;;  %v4481_v56 = vld [vmem:[#allocation29_spill] sm:$0xff] }
  0xdf   :  { %412 = vmatpush1.msra.mxu0 %v4471_v1  ;;  %483 = vmatpush1.msra.mxu1 %v4472_v5  ;;  %v4482_v5 = vld [vmem:[#allocation6_spill] sm:$0xff] }
  0xe0   :  { %413 = vmatprep.subr.mxu0 %v4473_v2  ;;  %484 = vmatprep.subr.mxu1 %v4474_v0  ;;  %v4483_v2 = vld [vmem:[#allocation7_spill] sm:$0xff] }
  0xe1   :  { %414 = vmatpush1.msra.mxu0 %v4475_v9  ;;  %485 = vmatpush1.msra.mxu1 %v4476_v4  ;;  %v2433_v4 = vld [vmem:[%s4280_s0 + $0x4] sm:$0x3] }
  0xe2   :  { %415 = vmatprep.subr.mxu0 %v4477_v6  ;;  %486 = vmatprep.subr.mxu1 %v4478_v7  ;;  %v2437_v7 = vld [vmem:[%s4280_s0 + $0x6] sm:$0x3]  ;;  %v4485_v6 = vld [vmem:[#allocation31_spill] sm:$0xff] }
  0xe3   :  { %416 = vmatpush1.msra.mxu0 %v4479_v59  ;;  %449 = vmatprep.mubr.f32.mxu0 %v4480_v57 }
  0xe4   :  { %487 = vmatpush1.msra.mxu1 %v4481_v56  ;;  %520 = vmatprep.mubr.f32.mxu1 %v4480_v57  ;;  %v2445_v56 = vld [vmem:[%s4280_s0 + $0xa] sm:$0x3]  ;;  %v4484_v57 = vld [vmem:[#allocation30_spill] sm:$0xff] }
  0xe5   :  { %570 = vmatprep.subr.mxu0 %v4482_v5  ;;  %641 = vmatprep.subr.mxu1 %v4483_v2  ;;  %v2453_v5 = vld [vmem:[%s4280_s0 + $0xe] sm:$0x3]  ;;  %v2461_v2 = vld [vmem:[%s4280_s0 + $0x12] sm:$0x3] }
  0xe6   :  { %374 = vperm.xlu1 %2484, %v2433_v4   ;;  %v2469_v4 = vld [vmem:[%s4280_s0 + $0x16] sm:$0x3] }
  0xea   :  { %559 = vperm.xlu1 %2484, %v2437_v7   ;;  %v190_v7 = vpop.permute.xlu0 %189 }
  0xeb   :  { %v192_v59 = vmul.f32 %v190_v7, %v4484_v57  ;;  %v194_v53 = vmul.f32 %v190_v7, %v4487_v8 }
  0xed   :  { %v196_v9 = vadd.f32 %v192_v59, %v3113_v63  ;;  %v198_v51 = vadd.f32 %v194_v53, %v4488_v52 }
  0xee   :  { %929 = vperm.xlu1 %2484, %v2445_v56   ;;  %v193_v56 = vmul.f32 %v190_v7, %v4485_v6  ;;  %v195_v6 = vmul.f32 %v190_v7, %v3126_v54 }
  0xf2   :  { %1299 = vperm.xlu1 %2484, %v2453_v5   ;;  %v4486_v5 = vld [vmem:[#allocation33_spill] sm:$0xff] }
  0xf3   :  { %v197_v60 = vadd.f32 %v193_v56, %v4486_v5 }
  0xf6   :  { %1669 = vperm.xlu1 %2484, %v2461_v2  }
  0xfa   :  { %2039 = vperm.xlu1 %2484, %v2469_v4  }
 0x184   :  { %v266_v0 = vpop.f32.mrf.mxu0  ;;  %v337_v4 = vpop.f32.mrf.mxu1 }
 0x185   :  { %v342_v1 = vadd.f32 %v266_v0, %v196_v9  ;;  %v344_v57 = vadd.f32 %v337_v4, %v198_v51  ;;  %v199_v0 = vadd.f32 %v195_v6, %v3130_v62 }
 0x186   :  { %v268_v61 = vpop.f32.mrf.mxu0  ;;  %v339_v50 = vpop.f32.mrf.mxu1 }
 0x187   :  { %v2430_v3 = vmul.f32 -1.442695, %v342_v1  ;;  %v343_v58 = vadd.f32 %v268_v61, %v197_v60  ;;  %v2432_v59 = vmul.f32 -1.442695, %v344_v57  ;;  %v345_v56 = vadd.f32 %v339_v50, %v199_v0  ;;  %v4492_v0 = vld [vmem:[#allocation11_spill] sm:$0xff] }
 0x189   :  { %2501 = vpow2.f32 %v2430_v3  ;;  %v2431_v2 = vmul.f32 -1.442695, %v343_v58 }
 0x18b   :  { %2503 = vpow2.f32 %v2431_v2 }
 0x18c   :  { %2505 = vpow2.f32 %v2432_v59  ;;  %v4491_v59 = vld [vmem:[#allocation10_spill] sm:$0xff] }
 0x196   :  { %v2502_v9 = vpop.eup %2501 }
 0x197   :  { %v355_v5 = vadd.f32 1.0, %v2502_v9  ;;  %v4493_v9 = vld [vmem:[#allocation12_spill] sm:$0xff] }
 0x198   :  { %v2504_v1 = vpop.eup %2503 }
 0x199   :  { %2507 = vrcp.f32 %v355_v5  ;;  %v356_v58 = vadd.f32 1.0, %v2504_v1  ;;  %v2506_v3 = vpop.eup %2505  ;;  %v4490_v5 = vld [vmem:[#allocation9_spill] sm:$0xff]  ;;  %v4495_v1 = vld [vmem:[#allocation14_spill] sm:$0xff] }
 0x19a   :  { %2509 = vtanh.f32 %v345_v56  ;;  %v357_v51 = vadd.f32 1.0, %v2506_v3  ;;  %v4494_v56 = vld [vmem:[#allocation13_spill] sm:$0xff]  ;;  %v4497_v3 = vld [vmem:[#allocation16_spill] sm:$0xff] }
 0x19b   :  { %2511 = vrcp.f32 %v356_v58  ;;  %v4496_v58 = vld [vmem:[#allocation15_spill] sm:$0xff] }
 0x19c   :  { %2513 = vrcp.f32 %v357_v51  ;;  %v4501_v51 = vld [vmem:[#allocation20_spill] sm:$0xff] }
 0x1a6   :  { %v2508_v61 = vpop.eup %2507 }
 0x1a7   :  { %v2510_v60 = vpop.eup %2509 }
 0x1a8   :  { %v2512_v53 = vpop.eup %2511  ;;  %v366_v2 = vmul.f32 %v2510_v60, %v2508_v61  ;;  %v4498_v61 = vld [vmem:[#allocation17_spill] sm:$0xff]  ;;  %v4499_v60 = vld [vmem:[#allocation18_spill] sm:$0xff] }
 0x1a9   :  { %v365_v7 = vmul.f32 %v2512_v53, %v3133_v55  ;;  %v2514_v50 = vpop.eup %2513  ;;  %v4489_v55 = vld [vmem:[#allocation8_spill] sm:$0xff]  ;;  %v4500_v53 = vld [vmem:[#allocation19_spill] sm:$0xff] }
 0x1ab   :  { %v3229_v57 = vadd.f32 %v366_v2, %v365_v7  ;;  %v4502_v7 = vld [vmem:[#allocation21_spill] sm:$0xff]  ;;  %v4503_v2 = vld [vmem:[#allocation22_spill] sm:$0xff] }
 0x1ad   :  { %2515 = vtanh.f32 %v3229_v57 }
 0x1ba   :  { %v2516_v6 = vpop.eup %2515 }
 0x1bb   :  { %v369_v4 = vmul.f32 %v2516_v6, %v2514_v50  ;;  %v4504_v50 = vld [vmem:[#allocation23_spill] sm:$0xff]  ;;  %v4505_v6 = vld [vmem:[#allocation24_spill] sm:$0xff] }
 0x1bd   :  { %450 = vmatmul.mubr.f32.vlgmr.msra.gmra.mxu0 %v369_v4  ;;  %521 = vmatmul.mubr.f32.vlgmr.msra.gmra.mxu1 %v369_v4  ;;  %v4506_v4 = vld [vmem:[#allocation25_spill] sm:$0xff] }
 0x1be   :  { %571 = vmatpush1.msra.mxu0 %v2913_v10  ;;  %642 = vmatpush1.msra.mxu1 %v2915_v11 }
 0x1bf   :  { %572 = vmatprep.subr.mxu0 %v2919_v12  ;;  %643 = vmatprep.subr.mxu1 %v2921_v13 }
 0x1c0   :  { %573 = vmatpush1.msra.mxu0 %v2924_v14  ;;  %644 = vmatpush1.msra.mxu1 %v2926_v15 }
 0x1c1   :  { %574 = vmatprep.subr.mxu0 %v2930_v16  ;;  %645 = vmatprep.subr.mxu1 %v2932_v17 }
 0x1c2   :  { %575 = vmatpush1.msra.mxu0 %v2936_v18  ;;  %646 = vmatpush1.msra.mxu1 %v2938_v19 }
 0x1c3   :  { %576 = vmatprep.subr.mxu0 %v2942_v20  ;;  %647 = vmatprep.subr.mxu1 %v2944_v21 }
 0x1c4   :  { %577 = vmatpush1.msra.mxu0 %v2948_v22  ;;  %648 = vmatpush1.msra.mxu1 %v2950_v23 }
 0x1c5   :  { %578 = vmatprep.subr.mxu0 %v2954_v24  ;;  %649 = vmatprep.subr.mxu1 %v2956_v25 }
 0x1c6   :  { %579 = vmatpush1.msra.mxu0 %v2960_v26  ;;  %650 = vmatpush1.msra.mxu1 %v2962_v27 }
 0x1c7   :  { %580 = vmatprep.subr.mxu0 %v2966_v28  ;;  %651 = vmatprep.subr.mxu1 %v2968_v29 }
 0x1c8   :  { %581 = vmatpush1.msra.mxu0 %v2972_v30  ;;  %652 = vmatpush1.msra.mxu1 %v2974_v31 }
 0x1c9   :  { %582 = vmatprep.subr.mxu0 %v2978_v32  ;;  %653 = vmatprep.subr.mxu1 %v2980_v33 }
 0x1ca   :  { %583 = vmatpush1.msra.mxu0 %v2984_v34  ;;  %654 = vmatpush1.msra.mxu1 %v2986_v35 }
 0x1cb   :  { %584 = vmatprep.subr.mxu0 %v2990_v36  ;;  %655 = vmatprep.subr.mxu1 %v2992_v37 }
 0x1cc   :  { %585 = vmatpush1.msra.mxu0 %v2994_v38  ;;  %656 = vmatpush1.msra.mxu1 %v2998_v39 }
 0x1cd   :  { %586 = vmatprep.subr.mxu0 %v3000_v40  ;;  %657 = vmatprep.subr.mxu1 %v3002_v41 }
 0x1ce   :  { %587 = vmatpush1.msra.mxu0 %v3006_v42  ;;  %658 = vmatpush1.msra.mxu1 %v3008_v43 }
 0x1cf   :  { %588 = vmatprep.subr.mxu0 %v3010_v44  ;;  %659 = vmatprep.subr.mxu1 %v3014_v45 }
 0x1d0   :  { %589 = vmatpush1.msra.mxu0 %v3016_v46  ;;  %660 = vmatpush1.msra.mxu1 %v3020_v47 }
 0x1d1   :  { %590 = vmatprep.subr.mxu0 %v3022_v48  ;;  %661 = vmatprep.subr.mxu1 %v3026_v49 }
 0x1d2   :  { %591 = vmatpush1.msra.mxu0 %v4489_v55  ;;  %662 = vmatpush1.msra.mxu1 %v4490_v5 }
 0x1d3   :  { %592 = vmatprep.subr.mxu0 %v4491_v59  ;;  %663 = vmatprep.subr.mxu1 %v4492_v0 }
 0x1d4   :  { %593 = vmatpush1.msra.mxu0 %v4493_v9  ;;  %664 = vmatpush1.msra.mxu1 %v4494_v56 }
 0x1d5   :  { %594 = vmatprep.subr.mxu0 %v4495_v1  ;;  %665 = vmatprep.subr.mxu1 %v4496_v58  ;;  %v4507_v58 = vld [vmem:[#allocation26_spill] sm:$0xff] }
 0x1d6   :  { %595 = vmatpush1.msra.mxu0 %v4497_v3  ;;  %666 = vmatpush1.msra.mxu1 %v4498_v61  ;;  %v4508_v3 = vld [vmem:[#allocation27_spill] sm:$0xff]  ;;  %v4509_v61 = vld [vmem:[#allocation28_spill] sm:$0xff] }
 0x1d7   :  { %596 = vmatprep.subr.mxu0 %v4499_v60  ;;  %667 = vmatprep.subr.mxu1 %v4500_v53  ;;  %v4510_v60 = vmov 0.0   ;;  %v4511_v53 = vld [vmem:[#allocation29_spill] sm:$0xff] }
 0x1d8   :  { %597 = vmatpush1.msra.mxu0 %v4501_v51  ;;  %668 = vmatpush1.msra.mxu1 %v4502_v7  ;;  %v4512_v7 = vld [vmem:[#allocation6_spill] sm:$0xff] }
 0x1d9   :  { %598 = vmatprep.subr.mxu0 %v4503_v2  ;;  %669 = vmatprep.subr.mxu1 %v4504_v50  ;;  %v4513_v2 = vld [vmem:[#allocation7_spill] sm:$0xff]  ;;  %v375_v50 = vpop.permute.xlu1 %374 }
 0x1da   :  { %599 = vmatpush1.msra.mxu0 %v4505_v6  ;;  %670 = vmatpush1.msra.mxu1 %v4506_v4  ;;  %v4514_v6 = vld [vmem:[#allocation30_spill] sm:$0xff]  ;;  %v4515_v4 = vld [vmem:[#allocation31_spill] sm:$0xff] }
 0x1db   :  { %600 = vmatprep.subr.mxu0 %v4507_v58  ;;  %671 = vmatprep.subr.mxu1 %v4508_v3  ;;  %v377_v51 = vmul.f32 %v375_v50, %v4514_v6  ;;  %v378_v1 = vmul.f32 %v375_v50, %v4515_v4  ;;  %v4516_v3 = vld [vmem:[#allocation33_spill] sm:$0xff]  ;;  %v380_v6 = vmul.f32 %v375_v50, %v3126_v54 }
 0x1dc   :  { %601 = vmatpush1.msra.mxu0 %v4509_v61  ;;  %634 = vmatprep.mubr.f32.mxu0 %v4510_v60 }
 0x1dd   :  { %672 = vmatpush1.msra.mxu1 %v4511_v53  ;;  %705 = vmatprep.mubr.f32.mxu1 %v4510_v60  ;;  %v381_v58 = vadd.f32 %v377_v51, %v3113_v63  ;;  %v382_v56 = vadd.f32 %v378_v1, %v4516_v3  ;;  %v379_v60 = vmul.f32 %v375_v50, %v4487_v8 }
 0x1de   :  { %755 = vmatprep.subr.mxu0 %v4512_v7  ;;  %826 = vmatprep.subr.mxu1 %v4513_v2  ;;  %v384_v51 = vadd.f32 %v380_v6, %v3130_v62 }
 0x1df   :  { %v383_v2 = vadd.f32 %v379_v60, %v4488_v52 }
 0x27d   :  { %v451_v61 = vpop.f32.mrf.mxu0  ;;  %v522_v5 = vpop.f32.mrf.mxu1 }
 0x27e   :  { %v527_v9 = vadd.f32 %v451_v61, %v381_v58  ;;  %v529_v4 = vadd.f32 %v522_v5, %v383_v2 }
 0x27f   :  { %v453_v0 = vpop.f32.mrf.mxu0  ;;  %v524_v63 = vpop.f32.mrf.mxu1 }
 0x280   :  { %v2434_v59 = vmul.f32 -1.442695, %v527_v9  ;;  %v528_v53 = vadd.f32 %v453_v0, %v382_v56  ;;  %v2436_v1 = vmul.f32 -1.442695, %v529_v4  ;;  %v530_v58 = vadd.f32 %v524_v63, %v384_v51  ;;  %v4536_v4 = vld [vmem:[#allocation28_spill] sm:$0xff] }
 0x281   :  { %v4537_v51 = vmov 0.0  }
 0x282   :  { %2517 = vpow2.f32 %v2434_v59  ;;  %v2435_v7 = vmul.f32 -1.442695, %v528_v53 }
 0x284   :  { %2519 = vpow2.f32 %v2435_v7 }
 0x285   :  { %2521 = vpow2.f32 %v2436_v1  ;;  %v4538_v1 = vld [vmem:[#allocation29_spill] sm:$0xff] }
 0x28f   :  { %v2518_v3 = vpop.eup %2517 }
 0x290   :  { %v540_v61 = vadd.f32 1.0, %v2518_v3 }
 0x291   :  { %v2520_v9 = vpop.eup %2519 }
 0x292   :  { %2523 = vrcp.f32 %v540_v61  ;;  %v541_v0 = vadd.f32 1.0, %v2520_v9  ;;  %v2522_v59 = vpop.eup %2521  ;;  %v4540_v61 = vld [vmem:[#allocation7_spill] sm:$0xff]  ;;  %v560_v9 = vpop.permute.xlu1 %559 }
 0x293   :  { %2525 = vtanh.f32 %v530_v58  ;;  %v542_v7 = vadd.f32 1.0, %v2522_v59  ;;  %v4539_v58 = vld [vmem:[#allocation6_spill] sm:$0xff] }
 0x294   :  { %2527 = vrcp.f32 %v541_v0  ;;  %v4541_v0 = vld [vmem:[#allocation30_spill] sm:$0xff] }
 0x295   :  { %2529 = vrcp.f32 %v542_v7  ;;  %v562_v59 = vmul.f32 %v560_v9, %v4541_v0 }
 0x29f   :  { %v2524_v56 = vpop.eup %2523 }
 0x2a0   :  { %v2526_v60 = vpop.eup %2525 }
 0x2a1   :  { %v2528_v53 = vpop.eup %2527  ;;  %v551_v2 = vmul.f32 %v2526_v60, %v2524_v56  ;;  %v4542_v56 = vld [vmem:[#allocation31_spill] sm:$0xff] }
 0x2a2   :  { %v550_v5 = vmul.f32 %v2528_v53, %v3229_v57  ;;  %v2530_v63 = vpop.eup %2529  ;;  %v4535_v57 = vld [vmem:[#allocation27_spill] sm:$0xff]  ;;  %v563_v60 = vmul.f32 %v560_v9, %v4542_v56  ;;  %v4543_v53 = vld [vmem:[#allocation32_spill] sm:$0xff]  ;;  %v565_v56 = vmul.f32 %v560_v9, %v3126_v54 }
 0x2a3   :  { %v566_v7 = vadd.f32 %v562_v59, %v4543_v53 }
 0x2a4   :  { %v3307_v50 = vadd.f32 %v551_v2, %v550_v5 }
 0x2a6   :  { %2531 = vtanh.f32 %v3307_v50 }
 0x2b3   :  { %v2532_v3 = vpop.eup %2531 }
 0x2b4   :  { %v554_v6 = vmul.f32 %v2532_v3, %v2530_v63  ;;  %v4544_v63 = vld [vmem:[#allocation33_spill] sm:$0xff] }
 0x2b5   :  { %v567_v3 = vadd.f32 %v563_v60, %v4544_v63 }
 0x2b6   :  { %635 = vmatmul.mubr.f32.vlgmr.msra.gmra.mxu0 %v554_v6  ;;  %706 = vmatmul.mubr.f32.vlgmr.msra.gmra.mxu1 %v554_v6 }
 0x2b7   :  { %756 = vmatpush1.msra.mxu0 %v2913_v10  ;;  %827 = vmatpush1.msra.mxu1 %v2915_v11  ;;  %v4517_v10 = vld [vmem:[#allocation9_spill] sm:$0xff]  ;;  %v4518_v11 = vld [vmem:[#allocation10_spill] sm:$0xff] }
 0x2b8   :  { %757 = vmatprep.subr.mxu0 %v2919_v12  ;;  %828 = vmatprep.subr.mxu1 %v2921_v13  ;;  %v4519_v12 = vld [vmem:[#allocation11_spill] sm:$0xff]  ;;  %v4520_v13 = vld [vmem:[#allocation12_spill] sm:$0xff] }
 0x2b9   :  { %758 = vmatpush1.msra.mxu0 %v2924_v14  ;;  %829 = vmatpush1.msra.mxu1 %v2926_v15  ;;  %v4521_v14 = vld [vmem:[#allocation13_spill] sm:$0xff]  ;;  %v4522_v15 = vld [vmem:[#allocation14_spill] sm:$0xff] }
 0x2ba   :  { %759 = vmatprep.subr.mxu0 %v2930_v16  ;;  %830 = vmatprep.subr.mxu1 %v2932_v17  ;;  %v4523_v16 = vld [vmem:[#allocation15_spill] sm:$0xff]  ;;  %v4524_v17 = vld [vmem:[#allocation16_spill] sm:$0xff] }
 0x2bb   :  { %760 = vmatpush1.msra.mxu0 %v2936_v18  ;;  %831 = vmatpush1.msra.mxu1 %v2938_v19  ;;  %v4525_v18 = vld [vmem:[#allocation17_spill] sm:$0xff]  ;;  %v4526_v19 = vld [vmem:[#allocation18_spill] sm:$0xff] }
 0x2bc   :  { %761 = vmatprep.subr.mxu0 %v2942_v20  ;;  %832 = vmatprep.subr.mxu1 %v2944_v21  ;;  %v4527_v20 = vld [vmem:[#allocation19_spill] sm:$0xff]  ;;  %v4528_v21 = vld [vmem:[#allocation20_spill] sm:$0xff] }
 0x2bd   :  { %762 = vmatpush1.msra.mxu0 %v2948_v22  ;;  %833 = vmatpush1.msra.mxu1 %v2950_v23  ;;  %v4529_v22 = vld [vmem:[#allocation21_spill] sm:$0xff]  ;;  %v4530_v23 = vld [vmem:[#allocation22_spill] sm:$0xff] }
 0x2be   :  { %763 = vmatprep.subr.mxu0 %v2954_v24  ;;  %834 = vmatprep.subr.mxu1 %v2956_v25  ;;  %v4531_v24 = vld [vmem:[#allocation23_spill] sm:$0xff]  ;;  %v4532_v25 = vld [vmem:[#allocation24_spill] sm:$0xff] }
 0x2bf   :  { %764 = vmatpush1.msra.mxu0 %v2960_v26  ;;  %835 = vmatpush1.msra.mxu1 %v2962_v27  ;;  %v4533_v26 = vld [vmem:[#allocation25_spill] sm:$0xff]  ;;  %v4534_v27 = vld [vmem:[#allocation26_spill] sm:$0xff] }
 0x2c0   :  { %765 = vmatprep.subr.mxu0 %v2966_v28  ;;  %836 = vmatprep.subr.mxu1 %v2968_v29 }
 0x2c1   :  { %766 = vmatpush1.msra.mxu0 %v2972_v30  ;;  %837 = vmatpush1.msra.mxu1 %v2974_v31 }
 0x2c2   :  { %767 = vmatprep.subr.mxu0 %v2978_v32  ;;  %838 = vmatprep.subr.mxu1 %v2980_v33 }
 0x2c3   :  { %768 = vmatpush1.msra.mxu0 %v2984_v34  ;;  %839 = vmatpush1.msra.mxu1 %v2986_v35 }
 0x2c4   :  { %769 = vmatprep.subr.mxu0 %v2990_v36  ;;  %840 = vmatprep.subr.mxu1 %v2992_v37 }
 0x2c5   :  { %770 = vmatpush1.msra.mxu0 %v2994_v38  ;;  %841 = vmatpush1.msra.mxu1 %v2998_v39 }
 0x2c6   :  { %771 = vmatprep.subr.mxu0 %v3000_v40  ;;  %842 = vmatprep.subr.mxu1 %v3002_v41 }
 0x2c7   :  { %772 = vmatpush1.msra.mxu0 %v3006_v42  ;;  %843 = vmatpush1.msra.mxu1 %v3008_v43 }
 0x2c8   :  { %773 = vmatprep.subr.mxu0 %v3010_v44  ;;  %844 = vmatprep.subr.mxu1 %v3014_v45 }
 0x2c9   :  { %774 = vmatpush1.msra.mxu0 %v3016_v46  ;;  %845 = vmatpush1.msra.mxu1 %v3020_v47 }
 0x2ca   :  { %775 = vmatprep.subr.mxu0 %v3022_v48  ;;  %846 = vmatprep.subr.mxu1 %v3026_v49 }
 0x2cb   :  { %776 = vmatpush1.msra.mxu0 %v4489_v55  ;;  %847 = vmatpush1.msra.mxu1 %v4517_v10 }
 0x2cc   :  { %777 = vmatprep.subr.mxu0 %v4518_v11  ;;  %848 = vmatprep.subr.mxu1 %v4519_v12 }
 0x2cd   :  { %778 = vmatpush1.msra.mxu0 %v4520_v13  ;;  %849 = vmatpush1.msra.mxu1 %v4521_v14 }
 0x2ce   :  { %779 = vmatprep.subr.mxu0 %v4522_v15  ;;  %850 = vmatprep.subr.mxu1 %v4523_v16 }
 0x2cf   :  { %780 = vmatpush1.msra.mxu0 %v4524_v17  ;;  %851 = vmatpush1.msra.mxu1 %v4525_v18 }
 0x2d0   :  { %781 = vmatprep.subr.mxu0 %v4526_v19  ;;  %852 = vmatprep.subr.mxu1 %v4527_v20 }
 0x2d1   :  { %782 = vmatpush1.msra.mxu0 %v4528_v21  ;;  %853 = vmatpush1.msra.mxu1 %v4529_v22 }
 0x2d2   :  { %783 = vmatprep.subr.mxu0 %v4530_v23  ;;  %854 = vmatprep.subr.mxu1 %v4531_v24 }
 0x2d3   :  { %784 = vmatpush1.msra.mxu0 %v4532_v25  ;;  %855 = vmatpush1.msra.mxu1 %v4533_v26 }
 0x2d4   :  { %785 = vmatprep.subr.mxu0 %v4534_v27  ;;  %856 = vmatprep.subr.mxu1 %v4535_v57 }
 0x2d5   :  { %786 = vmatpush1.msra.mxu0 %v4536_v4  ;;  %819 = vmatprep.mubr.f32.mxu0 %v4537_v51 }
 0x2d6   :  { %857 = vmatpush1.msra.mxu1 %v4538_v1  ;;  %890 = vmatprep.mubr.f32.mxu1 %v4537_v51 }
 0x2d7   :  { %940 = vmatprep.subr.mxu0 %v4539_v58  ;;  %1011 = vmatprep.subr.mxu1 %v4540_v61  ;;  %v564_v58 = vmul.f32 %v560_v9, %v4487_v8 }
 0x2d9   :  { %v568_v57 = vadd.f32 %v564_v58, %v4488_v52 }
 0x376   :  { %v636_v5 = vpop.f32.mrf.mxu0  ;;  %v707_v61 = vpop.f32.mrf.mxu1 }
 0x377   :  { %v712_v2 = vadd.f32 %v636_v5, %v566_v7  ;;  %v714_v0 = vadd.f32 %v707_v61, %v568_v57  ;;  %v569_v7 = vadd.f32 %v565_v56, %v3130_v62 }
 0x378   :  { %v638_v6 = vpop.f32.mrf.mxu0  ;;  %v709_v27 = vpop.f32.mrf.mxu1 }
 0x379   :  { %v2438_v4 = vmul.f32 -1.442695, %v712_v2  ;;  %v713_v1 = vadd.f32 %v638_v6, %v567_v3  ;;  %v2440_v59 = vmul.f32 -1.442695, %v714_v0  ;;  %v715_v60 = vadd.f32 %v709_v27, %v569_v7  ;;  %v3397_v7 = vld [vmem:[#allocation3 + $0x1d8] sm:$0xff] }
 0x37b   :  { %2533 = vpow2.f32 %v2438_v4  ;;  %v2439_v51 = vmul.f32 -1.442695, %v713_v1 }
 0x37d   :  { %2535 = vpow2.f32 %v2439_v51 }
 0x37e   :  { %2537 = vpow2.f32 %v2440_v59  ;;  %v3391_v59 = vld [vmem:[#allocation3 + $0x1f0] sm:$0xff] }
 0x388   :  { %v2534_v5 = vpop.eup %2533 }
 0x389   :  { %v725_v63 = vadd.f32 1.0, %v2534_v5  ;;  %v3400_v5 = vld [vmem:[#allocation3 + $0x1c0] sm:$0xff] }
 0x38a   :  { %v2536_v2 = vpop.eup %2535 }
 0x38b   :  { %2539 = vrcp.f32 %v725_v63  ;;  %v726_v4 = vadd.f32 1.0, %v2536_v2  ;;  %v2538_v51 = vpop.eup %2537  ;;  %v3388_v63 = vld [vmem:[#allocation3 + $0x1e0] sm:$0xff]  ;;  %v3406_v2 = vld [vmem:[#allocation3 + $0x1a8] sm:$0xff] }
 0x38c   :  { %2541 = vtanh.f32 %v715_v60  ;;  %v727_v57 = vadd.f32 1.0, %v2538_v51  ;;  %v3403_v60 = vld [vmem:[#allocation3 + $0x1d0] sm:$0xff]  ;;  %v3412_v51 = vld [vmem:[#allocation3 + $0x1a0] sm:$0xff] }
 0x38d   :  { %2543 = vrcp.f32 %v726_v4  ;;  %v3409_v4 = vld [vmem:[#allocation3 + $0x1b8] sm:$0xff] }
 0x38e   :  { %2545 = vrcp.f32 %v727_v57  ;;  %v3424_v57 = vld [vmem:[#allocation3 + $0x180] sm:$0xff] }
 0x398   :  { %v2540_v1 = vpop.eup %2539 }
 0x399   :  { %v2542_v3 = vpop.eup %2541 }
 0x39a   :  { %v2544_v6 = vpop.eup %2543  ;;  %v736_v58 = vmul.f32 %v2542_v3, %v2540_v1  ;;  %v3415_v1 = vld [vmem:[#allocation3 + $0x1b0] sm:$0xff]  ;;  %v3418_v3 = vld [vmem:[#allocation3 + $0x188] sm:$0xff] }
 0x39b   :  { %v735_v9 = vmul.f32 %v2544_v6, %v3307_v50  ;;  %v2546_v27 = vpop.eup %2545  ;;  %v3394_v50 = vld [vmem:[#allocation3 + $0x1c8] sm:$0xff]  ;;  %v3421_v6 = vld [vmem:[#allocation3 + $0x198] sm:$0xff] }
 0x39d   :  { %v3385_v0 = vadd.f32 %v736_v58, %v735_v9  ;;  %v3427_v9 = vld [vmem:[#allocation3 + $0x190] sm:$0xff]  ;;  %v3430_v58 = vld [vmem:[#allocation3 + $0x168] sm:$0xff] }
 0x39f   :  { %2547 = vtanh.f32 %v3385_v0 }
 0x3ac   :  { %v2548_v56 = vpop.eup %2547 }
 0x3ad   :  { %v739_v61 = vmul.f32 %v2548_v56, %v2546_v27  ;;  %v3433_v27 = vld [vmem:[#allocation3 + $0x178] sm:$0xff]  ;;  %v3436_v56 = vld [vmem:[#allocation3 + $0x160] sm:$0xff] }
 0x3af   :  { %820 = vmatmul.mubr.f32.vlgmr.msra.gmra.mxu0 %v739_v61  ;;  %891 = vmatmul.mubr.f32.vlgmr.msra.gmra.mxu1 %v739_v61  ;;  %v3439_v61 = vld [vmem:[#allocation3 + $0x170] sm:$0xff] }
 0x3b0   :  { %941 = vmatpush1.msra.mxu0 %v3388_v63  ;;  %1012 = vmatpush1.msra.mxu1 %v3391_v59 }
 0x3b1   :  { %942 = vmatprep.subr.mxu0 %v3394_v50  ;;  %1013 = vmatprep.subr.mxu1 %v3397_v7 }
 0x3b2   :  { %943 = vmatpush1.msra.mxu0 %v3400_v5  ;;  %1014 = vmatpush1.msra.mxu1 %v3403_v60 }
 0x3b3   :  { %944 = vmatprep.subr.mxu0 %v3406_v2  ;;  %1015 = vmatprep.subr.mxu1 %v3409_v4 }
 0x3b4   :  { %945 = vmatpush1.msra.mxu0 %v3412_v51  ;;  %1016 = vmatpush1.msra.mxu1 %v3415_v1 }
 0x3b5   :  { %946 = vmatprep.subr.mxu0 %v3418_v3  ;;  %1017 = vmatprep.subr.mxu1 %v3421_v6 }
 0x3b6   :  { %947 = vmatpush1.msra.mxu0 %v3424_v57  ;;  %1018 = vmatpush1.msra.mxu1 %v3427_v9 }
 0x3b7   :  { %948 = vmatprep.subr.mxu0 %v3430_v58  ;;  %1019 = vmatprep.subr.mxu1 %v3433_v27 }
 0x3b8   :  { %949 = vmatpush1.msra.mxu0 %v3436_v56  ;;  %1020 = vmatpush1.msra.mxu1 %v3439_v61 }
 0x3b9   :  { %950 = vmatprep.subr.mxu0 %v2966_v28  ;;  %1021 = vmatprep.subr.mxu1 %v2968_v29  ;;  %v4545_v28 = vld [vmem:[#allocation26_spill] sm:$0xff]  ;;  %v4546_v29 = vld [vmem:[#allocation27_spill] sm:$0xff] }
 0x3ba   :  { %951 = vmatpush1.msra.mxu0 %v2972_v30  ;;  %1022 = vmatpush1.msra.mxu1 %v2974_v31  ;;  %v4547_v30 = vld [vmem:[#allocation28_spill] sm:$0xff]  ;;  %v4548_v31 = vmov 0.0  }
 0x3bb   :  { %952 = vmatprep.subr.mxu0 %v2978_v32  ;;  %1023 = vmatprep.subr.mxu1 %v2980_v33  ;;  %v4549_v32 = vld [vmem:[#allocation29_spill] sm:$0xff]  ;;  %v3488_v33 = vld [vmem:[#allocation3 + $0x1e8] sm:$0xff] }
 0x3bc   :  { %953 = vmatpush1.msra.mxu0 %v2984_v34  ;;  %1024 = vmatpush1.msra.mxu1 %v2986_v35  ;;  %4550 = vst [vmem:[#allocation34_spill] sm:$0xff] %v3488_v33  ;;  %v3491_v34 = vld [vmem:[#allocation3 + $0x1f8] sm:$0xff]  ;;  %v745_v35 = vpop.permute.xlu0 %744 }
 0x3bd   :  { %954 = vmatprep.subr.mxu0 %v2990_v36  ;;  %1025 = vmatprep.subr.mxu1 %v2992_v37  ;;  %4551 = vst [vmem:[#allocation35_spill] sm:$0xff] %v3491_v34  ;;  %v4552_v36 = vld [vmem:[#allocation30_spill] sm:$0xff] }
 0x3be   :  { %955 = vmatpush1.msra.mxu0 %v2994_v38  ;;  %1026 = vmatpush1.msra.mxu1 %v2998_v39  ;;  %v747_v37 = vmul.f32 %v745_v35, %v4552_v36  ;;  %v4553_v38 = vld [vmem:[#allocation31_spill] sm:$0xff] }
 0x3bf   :  { %956 = vmatprep.subr.mxu0 %v3000_v40  ;;  %1027 = vmatprep.subr.mxu1 %v3002_v41  ;;  %v748_v39 = vmul.f32 %v745_v35, %v4553_v38 }
 0x3c0   :  { %957 = vmatpush1.msra.mxu0 %v3006_v42  ;;  %1028 = vmatpush1.msra.mxu1 %v3008_v43  ;;  %v751_v40 = vadd.f32 %v747_v37, %v4543_v53  ;;  %v4554_v43 = vld [vmem:[#allocation33_spill] sm:$0xff] }
 0x3c1   :  { %958 = vmatprep.subr.mxu0 %v3010_v44  ;;  %1029 = vmatprep.subr.mxu1 %v3014_v45  ;;  %v752_v44 = vadd.f32 %v748_v39, %v4554_v43  ;;  %v3527_v37 = vld [vmem:[#allocation3 + $0x158] sm:$0xff]  ;;  %v3530_v39 = vld [vmem:[#allocation3 + $0x140] sm:$0xff] }
 0x3c2   :  { %959 = vmatpush1.msra.mxu0 %v3016_v46  ;;  %1030 = vmatpush1.msra.mxu1 %v3020_v47 }
 0x3c3   :  { %960 = vmatprep.subr.mxu0 %v3022_v48  ;;  %1031 = vmatprep.subr.mxu1 %v3026_v49  ;;  %v749_v49 = vmul.f32 %v745_v35, %v4487_v8 }
 0x3c4   :  { %961 = vmatpush1.msra.mxu0 %v4489_v55  ;;  %1032 = vmatpush1.msra.mxu1 %v4517_v10 }
 0x3c5   :  { %962 = vmatprep.subr.mxu0 %v4518_v11  ;;  %1033 = vmatprep.subr.mxu1 %v4519_v12  ;;  %v753_v10 = vadd.f32 %v749_v49, %v4488_v52  ;;  %v750_v12 = vmul.f32 %v745_v35, %v3126_v54  ;;  %v3557_v49 = vld [vmem:[#allocation3 + $0x110] sm:$0xff] }
 0x3c6   :  { %963 = vmatpush1.msra.mxu0 %v4520_v13  ;;  %1034 = vmatpush1.msra.mxu1 %v4521_v14 }
 0x3c7   :  { %964 = vmatprep.subr.mxu0 %v4522_v15  ;;  %1035 = vmatprep.subr.mxu1 %v4523_v16  ;;  %v754_v15 = vadd.f32 %v750_v12, %v3130_v62  ;;  %v3569_v12 = vld [vmem:[#allocation3 + $0xf0] sm:$0xff] }
 0x3c8   :  { %965 = vmatpush1.msra.mxu0 %v4524_v17  ;;  %1036 = vmatpush1.msra.mxu1 %v4525_v18 }
 0x3c9   :  { %966 = vmatprep.subr.mxu0 %v4526_v19  ;;  %1037 = vmatprep.subr.mxu1 %v4527_v20 }
 0x3ca   :  { %967 = vmatpush1.msra.mxu0 %v4528_v21  ;;  %1038 = vmatpush1.msra.mxu1 %v4529_v22 }
 0x3cb   :  { %968 = vmatprep.subr.mxu0 %v4530_v23  ;;  %1039 = vmatprep.subr.mxu1 %v4531_v24 }
 0x3cc   :  { %969 = vmatpush1.msra.mxu0 %v4532_v25  ;;  %1040 = vmatpush1.msra.mxu1 %v4533_v26 }
 0x3cd   :  { %970 = vmatprep.subr.mxu0 %v4545_v28  ;;  %1041 = vmatprep.subr.mxu1 %v4546_v29 }
 0x3ce   :  { %971 = vmatpush1.msra.mxu0 %v4547_v30  ;;  %1004 = vmatprep.mubr.f32.mxu0 %v4548_v31 }
 0x3cf   :  { %1042 = vmatpush1.msra.mxu1 %v4549_v32  ;;  %1075 = vmatprep.mubr.f32.mxu1 %v4548_v31 }
 0x3d0   :  { %1125 = vmatprep.subr.mxu0 %v3488_v33  ;;  %1196 = vmatprep.subr.mxu1 %v3491_v34 }
 0x46f   :  { %v821_v41 = vpop.f32.mrf.mxu0  ;;  %v892_v55 = vpop.f32.mrf.mxu1 }
 0x470   :  { %v897_v42 = vadd.f32 %v821_v41, %v751_v40  ;;  %v899_v11 = vadd.f32 %v892_v55, %v753_v10  ;;  %v3533_v40 = vld [vmem:[#allocation3 + $0x150] sm:$0xff]  ;;  %v3536_v41 = vld [vmem:[#allocation3 + $0x128] sm:$0xff]  ;;  %v3563_v10 = vld [vmem:[#allocation3 + $0xf8] sm:$0xff] }
 0x471   :  { %v823_v45 = vpop.f32.mrf.mxu0  ;;  %v894_v13 = vpop.f32.mrf.mxu1  ;;  %v3560_v55 = vld [vmem:[#allocation3 + $0xe8] sm:$0xff] }
 0x472   :  { %v2442_v46 = vmul.f32 -1.442695, %v897_v42  ;;  %v898_v47 = vadd.f32 %v823_v45, %v752_v44  ;;  %v2444_v14 = vmul.f32 -1.442695, %v899_v11  ;;  %v900_v17 = vadd.f32 %v894_v13, %v754_v15  ;;  %v3539_v42 = vld [vmem:[#allocation3 + $0x138] sm:$0xff]  ;;  %v3542_v44 = vld [vmem:[#allocation3 + $0x120] sm:$0xff] }
 0x473   :  { %v3545_v45 = vld [vmem:[#allocation3 + $0x130] sm:$0xff]  ;;  %v3566_v11 = vld [vmem:[#allocation3 + $0xe0] sm:$0xff]  ;;  %v3572_v13 = vld [vmem:[#allocation3 + $0xc8] sm:$0xff] }
 0x474   :  { %2549 = vpow2.f32 %v2442_v46  ;;  %v2443_v48 = vmul.f32 -1.442695, %v898_v47  ;;  %v3548_v46 = vld [vmem:[#allocation3 + $0x108] sm:$0xff]  ;;  %v3551_v47 = vld [vmem:[#allocation3 + $0x118] sm:$0xff]  ;;  %v3578_v15 = vld [vmem:[#allocation3 + $0xc0] sm:$0xff] }
 0x476   :  { %2551 = vpow2.f32 %v2443_v48  ;;  %v3554_v48 = vld [vmem:[#allocation3 + $0x100] sm:$0xff] }
 0x477   :  { %2553 = vpow2.f32 %v2444_v14  ;;  %v3575_v14 = vld [vmem:[#allocation3 + $0xd8] sm:$0xff] }
 0x481   :  { %v2550_v16 = vpop.eup %2549 }
 0x482   :  { %v910_v18 = vadd.f32 1.0, %v2550_v16  ;;  %v3581_v16 = vld [vmem:[#allocation3 + $0xd0] sm:$0xff] }
 0x483   :  { %v2552_v19 = vpop.eup %2551 }
 0x484   :  { %2555 = vrcp.f32 %v910_v18  ;;  %v911_v20 = vadd.f32 1.0, %v2552_v19  ;;  %v2554_v21 = vpop.eup %2553  ;;  %v3587_v18 = vld [vmem:[#allocation3 + $0xb8] sm:$0xff]  ;;  %v3590_v19 = vld [vmem:[#allocation3 + $0xa0] sm:$0xff] }
 0x485   :  { %2557 = vtanh.f32 %v900_v17  ;;  %v912_v25 = vadd.f32 1.0, %v2554_v21  ;;  %v3584_v17 = vld [vmem:[#allocation3 + $0xa8] sm:$0xff]  ;;  %4555 = vst [vmem:[#allocation8_spill] sm:$0xff] %v3590_v19 }
 0x486   :  { %2559 = vrcp.f32 %v911_v20  ;;  %v3593_v20 = vld [vmem:[#allocation3 + $0xb0] sm:$0xff]  ;;  %v3596_v21 = vld [vmem:[#allocation3 + $0x88] sm:$0xff] }
 0x487   :  { %2561 = vrcp.f32 %v912_v25  ;;  %4556 = vst [vmem:[#allocation9_spill] sm:$0xff] %v3593_v20  ;;  %4557 = vst [vmem:[#allocation10_spill] sm:$0xff] %v3596_v21  ;;  %v3608_v25 = vld [vmem:[#allocation3 + $0x68] sm:$0xff] }
 0x488   :  { %4561 = vst [vmem:[#allocation14_spill] sm:$0xff] %v3608_v25 }
 0x491   :  { %v2556_v22 = vpop.eup %2555 }
 0x492   :  { %v2558_v23 = vpop.eup %2557 }
 0x493   :  { %v2560_v24 = vpop.eup %2559  ;;  %v921_v28 = vmul.f32 %v2558_v23, %v2556_v22  ;;  %v3599_v22 = vld [vmem:[#allocation3 + $0x98] sm:$0xff]  ;;  %v3602_v23 = vld [vmem:[#allocation3 + $0x80] sm:$0xff] }
 0x494   :  { %v920_v26 = vmul.f32 %v2560_v24, %v3385_v0  ;;  %v2562_v30 = vpop.eup %2561  ;;  %v3524_v0 = vld [vmem:[#allocation3 + $0x148] sm:$0xff]  ;;  %4558 = vst [vmem:[#allocation11_spill] sm:$0xff] %v3599_v22  ;;  %4559 = vst [vmem:[#allocation12_spill] sm:$0xff] %v3602_v23  ;;  %v3605_v24 = vld [vmem:[#allocation3 + $0x90] sm:$0xff] }
 0x495   :  { %4560 = vst [vmem:[#allocation13_spill] sm:$0xff] %v3605_v24 }
 0x496   :  { %v3503_v29 = vadd.f32 %v921_v28, %v920_v26  ;;  %v3611_v26 = vld [vmem:[#allocation3 + $0x78] sm:$0xff]  ;;  %v3614_v28 = vld [vmem:[#allocation3 + $0x60] sm:$0xff] }
 0x497   :  { %4562 = vst [vmem:[#allocation15_spill] sm:$0xff] %v3611_v26  ;;  %4563 = vst [vmem:[#allocation16_spill] sm:$0xff] %v3614_v28 }
 0x498   :  { %2563 = vtanh.f32 %v3503_v29 }
 0x4a5   :  { %v2564_v32 = vpop.eup %2563 }
 0x4a6   :  { %v924_v35 = vmul.f32 %v2564_v32, %v2562_v30  ;;  %v3617_v30 = vld [vmem:[#allocation3 + $0x70] sm:$0xff]  ;;  %v3620_v32 = vld [vmem:[#allocation3 + $0x48] sm:$0xff] }
 0x4a7   :  { %4564 = vst [vmem:[#allocation17_spill] sm:$0xff] %v3617_v30  ;;  %4565 = vst [vmem:[#allocation18_spill] sm:$0xff] %v3620_v32 }
 0x4a8   :  { %1005 = vmatmul.mubr.f32.vlgmr.msra.gmra.mxu0 %v924_v35  ;;  %1076 = vmatmul.mubr.f32.vlgmr.msra.gmra.mxu1 %v924_v35  ;;  %v3623_v35 = vld [vmem:[#allocation3 + $0x58] sm:$0xff] }
 0x4a9   :  { %1126 = vmatpush1.msra.mxu0 %v3388_v63  ;;  %1197 = vmatpush1.msra.mxu1 %v3391_v59  ;;  %4566 = vst [vmem:[#allocation19_spill] sm:$0xff] %v3623_v35 }
 0x4aa   :  { %1127 = vmatprep.subr.mxu0 %v3394_v50  ;;  %1198 = vmatprep.subr.mxu1 %v3397_v7 }
 0x4ab   :  { %1128 = vmatpush1.msra.mxu0 %v3400_v5  ;;  %1199 = vmatpush1.msra.mxu1 %v3403_v60 }
 0x4ac   :  { %1129 = vmatprep.subr.mxu0 %v3406_v2  ;;  %1200 = vmatprep.subr.mxu1 %v3409_v4 }
 0x4ad   :  { %1130 = vmatpush1.msra.mxu0 %v3412_v51  ;;  %1201 = vmatpush1.msra.mxu1 %v3415_v1 }
 0x4ae   :  { %1131 = vmatprep.subr.mxu0 %v3418_v3  ;;  %1202 = vmatprep.subr.mxu1 %v3421_v6 }
 0x4af   :  { %1132 = vmatpush1.msra.mxu0 %v3424_v57  ;;  %1203 = vmatpush1.msra.mxu1 %v3427_v9 }
 0x4b0   :  { %1133 = vmatprep.subr.mxu0 %v3430_v58  ;;  %1204 = vmatprep.subr.mxu1 %v3433_v27 }
 0x4b1   :  { %1134 = vmatpush1.msra.mxu0 %v3436_v56  ;;  %1205 = vmatpush1.msra.mxu1 %v3439_v61 }
 0x4b2   :  { %1135 = vmatprep.subr.mxu0 %v3524_v0  ;;  %1206 = vmatprep.subr.mxu1 %v3527_v37 }
 0x4b3   :  { %1136 = vmatpush1.msra.mxu0 %v3530_v39  ;;  %1207 = vmatpush1.msra.mxu1 %v3533_v40 }
 0x4b4   :  { %1137 = vmatprep.subr.mxu0 %v3536_v41  ;;  %1208 = vmatprep.subr.mxu1 %v3539_v42 }
 0x4b5   :  { %1138 = vmatpush1.msra.mxu0 %v3542_v44  ;;  %1209 = vmatpush1.msra.mxu1 %v3545_v45 }
 0x4b6   :  { %1139 = vmatprep.subr.mxu0 %v3548_v46  ;;  %1210 = vmatprep.subr.mxu1 %v3551_v47 }
 0x4b7   :  { %1140 = vmatpush1.msra.mxu0 %v3554_v48  ;;  %1211 = vmatpush1.msra.mxu1 %v3557_v49 }
 0x4b8   :  { %1141 = vmatprep.subr.mxu0 %v3560_v55  ;;  %1212 = vmatprep.subr.mxu1 %v3563_v10 }
 0x4b9   :  { %1142 = vmatpush1.msra.mxu0 %v3566_v11  ;;  %1213 = vmatpush1.msra.mxu1 %v3569_v12 }
 0x4ba   :  { %1143 = vmatprep.subr.mxu0 %v3572_v13  ;;  %1214 = vmatprep.subr.mxu1 %v3575_v14 }
 0x4bb   :  { %1144 = vmatpush1.msra.mxu0 %v3578_v15  ;;  %1215 = vmatpush1.msra.mxu1 %v3581_v16 }
 0x4bc   :  { %1145 = vmatprep.subr.mxu0 %v3584_v17  ;;  %1216 = vmatprep.subr.mxu1 %v3587_v18 }
 0x4bd   :  { %1146 = vmatpush1.msra.mxu0 %v3590_v19  ;;  %1217 = vmatpush1.msra.mxu1 %v3593_v20 }
 0x4be   :  { %1147 = vmatprep.subr.mxu0 %v3596_v21  ;;  %1218 = vmatprep.subr.mxu1 %v3599_v22 }
 0x4bf   :  { %1148 = vmatpush1.msra.mxu0 %v3602_v23  ;;  %1219 = vmatpush1.msra.mxu1 %v3605_v24 }
 0x4c0   :  { %1149 = vmatprep.subr.mxu0 %v3608_v25  ;;  %1220 = vmatprep.subr.mxu1 %v3611_v26  ;;  %v3626_v25 = vld [vmem:[#allocation3 + $0x40] sm:$0xff]  ;;  %v3629_v26 = vld [vmem:[#allocation3 + $0x50] sm:$0xff] }
 0x4c1   :  { %1150 = vmatpush1.msra.mxu0 %v3614_v28  ;;  %1221 = vmatpush1.msra.mxu1 %v3617_v30  ;;  %4567 = vst [vmem:[#allocation20_spill] sm:$0xff] %v3626_v25  ;;  %4568 = vst [vmem:[#allocation21_spill] sm:$0xff] %v3629_v26  ;;  %v3632_v28 = vld [vmem:[#allocation3 + $0x28] sm:$0xff]  ;;  %v3635_v30 = vld [vmem:[#allocation3 + $0x38] sm:$0xff] }
 0x4c2   :  { %1151 = vmatprep.subr.mxu0 %v3620_v32  ;;  %1222 = vmatprep.subr.mxu1 %v3623_v35  ;;  %4569 = vst [vmem:[#allocation22_spill] sm:$0xff] %v3632_v28  ;;  %4570 = vst [vmem:[#allocation23_spill] sm:$0xff] %v3635_v30  ;;  %v3638_v32 = vld [vmem:[#allocation3 + $0x20] sm:$0xff]  ;;  %v3641_v35 = vld [vmem:[#allocation3 + $0x30] sm:$0xff] }
 0x4c3   :  { %1152 = vmatpush1.msra.mxu0 %v3626_v25  ;;  %1223 = vmatpush1.msra.mxu1 %v3629_v26  ;;  %4571 = vst [vmem:[#allocation24_spill] sm:$0xff] %v3638_v32  ;;  %4572 = vst [vmem:[#allocation25_spill] sm:$0xff] %v3641_v35  ;;  %v3644_v25 = vld [vmem:[#allocation3 + $0x8] sm:$0xff]  ;;  %v3647_v26 = vld [vmem:[#allocation3 + $0x18] sm:$0xff] }
 0x4c4   :  { %1153 = vmatprep.subr.mxu0 %v3632_v28  ;;  %1224 = vmatprep.subr.mxu1 %v3635_v30  ;;  %4573 = vst [vmem:[#allocation6_spill] sm:$0xff] %v3644_v25  ;;  %4574 = vst [vmem:[#allocation7_spill] sm:$0xff] %v3647_v26  ;;  %v3650_v28 = vld [vmem:[#allocation3] sm:$0xff]  ;;  %v3654_v30 = vld [vmem:[#allocation3 + $0x10] sm:$0xff] }
 0x4c5   :  { %1154 = vmatpush1.msra.mxu0 %v3638_v32  ;;  %1225 = vmatpush1.msra.mxu1 %v3641_v35  ;;  %4575 = vst [vmem:[#allocation32_spill] sm:$0xff] %v3650_v28  ;;  %4576 = vst [vmem:[#allocation26_spill] sm:$0xff] %v3654_v30 }
 0x4c6   :  { %1155 = vmatprep.subr.mxu0 %v3644_v25  ;;  %1226 = vmatprep.subr.mxu1 %v3647_v26  ;;  %v930_v25 = vpop.permute.xlu1 %929 }
 0x4c7   :  { %1156 = vmatpush1.msra.mxu0 %v3650_v28  ;;  %1189 = vmatprep.mubr.f32.mxu0 %v4548_v31  ;;  %v932_v35 = vmul.f32 %v930_v25, %v4552_v36  ;;  %v933_v26 = vmul.f32 %v930_v25, %v4553_v38  ;;  %v935_v38 = vmul.f32 %v930_v25, %v3126_v54 }
 0x4c8   :  { %1227 = vmatpush1.msra.mxu1 %v3654_v30  ;;  %1260 = vmatprep.mubr.f32.mxu1 %v4548_v31 }
 0x4c9   :  { %1310 = vmatprep.subr.mxu0 %v3488_v33  ;;  %1381 = vmatprep.subr.mxu1 %v3491_v34  ;;  %v936_v32 = vadd.f32 %v932_v35, %v4543_v53  ;;  %v937_v23 = vadd.f32 %v933_v26, %v4554_v43  ;;  %v934_v33 = vmul.f32 %v930_v25, %v4487_v8 }
 0x4cb   :  { %v938_v20 = vadd.f32 %v934_v33, %v4488_v52 }
 0x568   :  { %v1006_v28 = vpop.f32.mrf.mxu0  ;;  %v1077_v34 = vpop.f32.mrf.mxu1 }
 0x569   :  { %v1082_v24 = vadd.f32 %v1006_v28, %v936_v32  ;;  %v1084_v36 = vadd.f32 %v1077_v34, %v938_v20  ;;  %v939_v28 = vadd.f32 %v935_v38, %v3130_v62 }
 0x56a   :  { %v1008_v22 = vpop.f32.mrf.mxu0  ;;  %v1079_v19 = vpop.f32.mrf.mxu1 }
 0x56b   :  { %v2446_v21 = vmul.f32 -1.442695, %v1082_v24  ;;  %v1083_v30 = vadd.f32 %v1008_v22, %v937_v23  ;;  %v2448_v35 = vmul.f32 -1.442695, %v1084_v36  ;;  %v1085_v26 = vadd.f32 %v1079_v19, %v939_v28  ;;  %v4580_v28 = vld [vmem:[#allocation11_spill] sm:$0xff] }
 0x56d   :  { %2565 = vpow2.f32 %v2446_v21  ;;  %v2447_v31 = vmul.f32 -1.442695, %v1083_v30 }
 0x56f   :  { %2567 = vpow2.f32 %v2447_v31 }
 0x570   :  { %2569 = vpow2.f32 %v2448_v35  ;;  %v4579_v35 = vld [vmem:[#allocation10_spill] sm:$0xff] }
 0x57a   :  { %v2566_v32 = vpop.eup %2565 }
 0x57b   :  { %v1095_v43 = vadd.f32 1.0, %v2566_v32  ;;  %v4581_v32 = vld [vmem:[#allocation12_spill] sm:$0xff] }
 0x57c   :  { %v2568_v24 = vpop.eup %2567 }
 0x57d   :  { %2571 = vrcp.f32 %v1095_v43  ;;  %v1096_v21 = vadd.f32 1.0, %v2568_v24  ;;  %v2570_v31 = vpop.eup %2569  ;;  %v4577_v43 = vld [vmem:[#allocation8_spill] sm:$0xff]  ;;  %v4583_v24 = vld [vmem:[#allocation14_spill] sm:$0xff] }
 0x57e   :  { %2573 = vtanh.f32 %v1085_v26  ;;  %v1097_v34 = vadd.f32 1.0, %v2570_v31  ;;  %v4582_v26 = vld [vmem:[#allocation13_spill] sm:$0xff]  ;;  %v4585_v31 = vld [vmem:[#allocation16_spill] sm:$0xff] }
 0x57f   :  { %2575 = vrcp.f32 %v1096_v21  ;;  %v4584_v21 = vld [vmem:[#allocation15_spill] sm:$0xff] }
 0x580   :  { %2577 = vrcp.f32 %v1097_v34  ;;  %v4589_v34 = vld [vmem:[#allocation20_spill] sm:$0xff] }
 0x58a   :  { %v2572_v22 = vpop.eup %2571 }
 0x58b   :  { %v2574_v23 = vpop.eup %2573 }
 0x58c   :  { %v2576_v33 = vpop.eup %2575  ;;  %v1106_v25 = vmul.f32 %v2574_v23, %v2572_v22  ;;  %v4586_v22 = vld [vmem:[#allocation17_spill] sm:$0xff]  ;;  %v4587_v23 = vld [vmem:[#allocation18_spill] sm:$0xff] }
 0x58d   :  { %v1105_v20 = vmul.f32 %v2576_v33, %v3503_v29  ;;  %v2578_v38 = vpop.eup %2577  ;;  %v4578_v29 = vld [vmem:[#allocation9_spill] sm:$0xff]  ;;  %v4588_v33 = vld [vmem:[#allocation19_spill] sm:$0xff] }
 0x58f   :  { %v3669_v36 = vadd.f32 %v1106_v25, %v1105_v20  ;;  %v4590_v20 = vld [vmem:[#allocation21_spill] sm:$0xff]  ;;  %v4591_v25 = vld [vmem:[#allocation22_spill] sm:$0xff] }
 0x591   :  { %2579 = vtanh.f32 %v3669_v36 }
 0x59e   :  { %v2580_v19 = vpop.eup %2579 }
 0x59f   :  { %v1109_v30 = vmul.f32 %v2580_v19, %v2578_v38  ;;  %v4592_v38 = vld [vmem:[#allocation23_spill] sm:$0xff]  ;;  %v4593_v19 = vld [vmem:[#allocation24_spill] sm:$0xff] }
 0x5a1   :  { %1190 = vmatmul.mubr.f32.vlgmr.msra.gmra.mxu0 %v1109_v30  ;;  %1261 = vmatmul.mubr.f32.vlgmr.msra.gmra.mxu1 %v1109_v30  ;;  %v4594_v30 = vld [vmem:[#allocation25_spill] sm:$0xff] }
 0x5a2   :  { %1311 = vmatpush1.msra.mxu0 %v3388_v63  ;;  %1382 = vmatpush1.msra.mxu1 %v3391_v59 }
 0x5a3   :  { %1312 = vmatprep.subr.mxu0 %v3394_v50  ;;  %1383 = vmatprep.subr.mxu1 %v3397_v7 }
 0x5a4   :  { %1313 = vmatpush1.msra.mxu0 %v3400_v5  ;;  %1384 = vmatpush1.msra.mxu1 %v3403_v60 }
 0x5a5   :  { %1314 = vmatprep.subr.mxu0 %v3406_v2  ;;  %1385 = vmatprep.subr.mxu1 %v3409_v4 }
 0x5a6   :  { %1315 = vmatpush1.msra.mxu0 %v3412_v51  ;;  %1386 = vmatpush1.msra.mxu1 %v3415_v1 }
 0x5a7   :  { %1316 = vmatprep.subr.mxu0 %v3418_v3  ;;  %1387 = vmatprep.subr.mxu1 %v3421_v6 }
 0x5a8   :  { %1317 = vmatpush1.msra.mxu0 %v3424_v57  ;;  %1388 = vmatpush1.msra.mxu1 %v3427_v9 }
 0x5a9   :  { %1318 = vmatprep.subr.mxu0 %v3430_v58  ;;  %1389 = vmatprep.subr.mxu1 %v3433_v27 }
 0x5aa   :  { %1319 = vmatpush1.msra.mxu0 %v3436_v56  ;;  %1390 = vmatpush1.msra.mxu1 %v3439_v61 }
 0x5ab   :  { %1320 = vmatprep.subr.mxu0 %v3524_v0  ;;  %1391 = vmatprep.subr.mxu1 %v3527_v37 }
 0x5ac   :  { %1321 = vmatpush1.msra.mxu0 %v3530_v39  ;;  %1392 = vmatpush1.msra.mxu1 %v3533_v40 }
 0x5ad   :  { %1322 = vmatprep.subr.mxu0 %v3536_v41  ;;  %1393 = vmatprep.subr.mxu1 %v3539_v42 }
 0x5ae   :  { %1323 = vmatpush1.msra.mxu0 %v3542_v44  ;;  %1394 = vmatpush1.msra.mxu1 %v3545_v45 }
 0x5af   :  { %1324 = vmatprep.subr.mxu0 %v3548_v46  ;;  %1395 = vmatprep.subr.mxu1 %v3551_v47 }
 0x5b0   :  { %1325 = vmatpush1.msra.mxu0 %v3554_v48  ;;  %1396 = vmatpush1.msra.mxu1 %v3557_v49 }
 0x5b1   :  { %1326 = vmatprep.subr.mxu0 %v3560_v55  ;;  %1397 = vmatprep.subr.mxu1 %v3563_v10 }
 0x5b2   :  { %1327 = vmatpush1.msra.mxu0 %v3566_v11  ;;  %1398 = vmatpush1.msra.mxu1 %v3569_v12 }
 0x5b3   :  { %1328 = vmatprep.subr.mxu0 %v3572_v13  ;;  %1399 = vmatprep.subr.mxu1 %v3575_v14 }
 0x5b4   :  { %1329 = vmatpush1.msra.mxu0 %v3578_v15  ;;  %1400 = vmatpush1.msra.mxu1 %v3581_v16 }
 0x5b5   :  { %1330 = vmatprep.subr.mxu0 %v3584_v17  ;;  %1401 = vmatprep.subr.mxu1 %v3587_v18 }
 0x5b6   :  { %1331 = vmatpush1.msra.mxu0 %v4577_v43  ;;  %1402 = vmatpush1.msra.mxu1 %v4578_v29 }
 0x5b7   :  { %1332 = vmatprep.subr.mxu0 %v4579_v35  ;;  %1403 = vmatprep.subr.mxu1 %v4580_v28 }
 0x5b8   :  { %1333 = vmatpush1.msra.mxu0 %v4581_v32  ;;  %1404 = vmatpush1.msra.mxu1 %v4582_v26 }
 0x5b9   :  { %1334 = vmatprep.subr.mxu0 %v4583_v24  ;;  %1405 = vmatprep.subr.mxu1 %v4584_v21  ;;  %v4595_v21 = vld [vmem:[#allocation6_spill] sm:$0xff] }
 0x5ba   :  { %1335 = vmatpush1.msra.mxu0 %v4585_v31  ;;  %1406 = vmatpush1.msra.mxu1 %v4586_v22  ;;  %v4596_v31 = vld [vmem:[#allocation7_spill] sm:$0xff]  ;;  %v4597_v22 = vld [vmem:[#allocation32_spill] sm:$0xff] }
 0x5bb   :  { %1336 = vmatprep.subr.mxu0 %v4587_v23  ;;  %1407 = vmatprep.subr.mxu1 %v4588_v33  ;;  %v4598_v23 = vmov 0.0   ;;  %v4599_v33 = vld [vmem:[#allocation26_spill] sm:$0xff] }
 0x5bc   :  { %1337 = vmatpush1.msra.mxu0 %v4589_v34  ;;  %1408 = vmatpush1.msra.mxu1 %v4590_v20  ;;  %v4600_v20 = vld [vmem:[#allocation34_spill] sm:$0xff] }
 0x5bd   :  { %1338 = vmatprep.subr.mxu0 %v4591_v25  ;;  %1409 = vmatprep.subr.mxu1 %v4592_v38  ;;  %v4601_v25 = vld [vmem:[#allocation35_spill] sm:$0xff]  ;;  %v1115_v38 = vpop.permute.xlu0 %1114 }
 0x5be   :  { %1339 = vmatpush1.msra.mxu0 %v4593_v19  ;;  %1410 = vmatpush1.msra.mxu1 %v4594_v30  ;;  %v4602_v19 = vld [vmem:[#allocation30_spill] sm:$0xff]  ;;  %v4603_v30 = vld [vmem:[#allocation31_spill] sm:$0xff] }
 0x5bf   :  { %1340 = vmatprep.subr.mxu0 %v4595_v21  ;;  %1411 = vmatprep.subr.mxu1 %v4596_v31  ;;  %v1117_v34 = vmul.f32 %v1115_v38, %v4602_v19  ;;  %v1118_v24 = vmul.f32 %v1115_v38, %v4603_v30  ;;  %v1120_v30 = vmul.f32 %v1115_v38, %v3126_v54 }
 0x5c0   :  { %1341 = vmatpush1.msra.mxu0 %v4597_v22  ;;  %1374 = vmatprep.mubr.f32.mxu0 %v4598_v23  ;;  %v4604_v22 = vld [vmem:[#allocation33_spill] sm:$0xff] }
 0x5c1   :  { %1412 = vmatpush1.msra.mxu1 %v4599_v33  ;;  %1445 = vmatprep.mubr.f32.mxu1 %v4598_v23  ;;  %v1121_v21 = vadd.f32 %v1117_v34, %v4543_v53  ;;  %v1122_v32 = vadd.f32 %v1118_v24, %v4604_v22 }
 0x5c2   :  { %1495 = vmatprep.subr.mxu0 %v4600_v20  ;;  %1566 = vmatprep.subr.mxu1 %v4601_v25  ;;  %v1119_v20 = vmul.f32 %v1115_v38, %v4487_v8 }
 0x5c4   :  { %v1123_v29 = vadd.f32 %v1119_v20, %v4488_v52 }
 0x661   :  { %v1191_v31 = vpop.f32.mrf.mxu0  ;;  %v1262_v25 = vpop.f32.mrf.mxu1 }
 0x662   :  { %v1267_v26 = vadd.f32 %v1191_v31, %v1121_v21  ;;  %v1269_v19 = vadd.f32 %v1262_v25, %v1123_v29  ;;  %v1124_v21 = vadd.f32 %v1120_v30, %v3130_v62 }
 0x663   :  { %v1193_v28 = vpop.f32.mrf.mxu0  ;;  %v1264_v43 = vpop.f32.mrf.mxu1 }
 0x664   :  { %v2450_v35 = vmul.f32 -1.442695, %v1267_v26  ;;  %v1268_v33 = vadd.f32 %v1193_v28, %v1122_v32  ;;  %v2452_v34 = vmul.f32 -1.442695, %v1269_v19  ;;  %v1270_v24 = vadd.f32 %v1264_v43, %v1124_v21  ;;  %v4608_v21 = vld [vmem:[#allocation11_spill] sm:$0xff] }
 0x666   :  { %2581 = vpow2.f32 %v2450_v35  ;;  %v2451_v23 = vmul.f32 -1.442695, %v1268_v33 }
 0x668   :  { %2583 = vpow2.f32 %v2451_v23 }
 0x669   :  { %2585 = vpow2.f32 %v2452_v34  ;;  %v4607_v34 = vld [vmem:[#allocation10_spill] sm:$0xff] }
 0x673   :  { %v2582_v31 = vpop.eup %2581 }
 0x674   :  { %v1280_v22 = vadd.f32 1.0, %v2582_v31  ;;  %v4609_v31 = vld [vmem:[#allocation12_spill] sm:$0xff] }
 0x675   :  { %v2584_v26 = vpop.eup %2583 }
 0x676   :  { %2587 = vrcp.f32 %v1280_v22  ;;  %v1281_v35 = vadd.f32 1.0, %v2584_v26  ;;  %v2586_v28 = vpop.eup %2585  ;;  %v4606_v22 = vld [vmem:[#allocation9_spill] sm:$0xff]  ;;  %v4611_v26 = vld [vmem:[#allocation14_spill] sm:$0xff] }
 0x677   :  { %2589 = vtanh.f32 %v1270_v24  ;;  %v1282_v29 = vadd.f32 1.0, %v2586_v28  ;;  %v4610_v24 = vld [vmem:[#allocation13_spill] sm:$0xff]  ;;  %v4613_v28 = vld [vmem:[#allocation16_spill] sm:$0xff] }
 0x678   :  { %2591 = vrcp.f32 %v1281_v35  ;;  %v4612_v35 = vld [vmem:[#allocation15_spill] sm:$0xff] }
 0x679   :  { %2593 = vrcp.f32 %v1282_v29  ;;  %v4617_v29 = vld [vmem:[#allocation20_spill] sm:$0xff] }
 0x683   :  { %v2588_v32 = vpop.eup %2587 }
 0x684   :  { %v2590_v23 = vpop.eup %2589 }
 0x685   :  { %v2592_v33 = vpop.eup %2591  ;;  %v1291_v25 = vmul.f32 %v2590_v23, %v2588_v32  ;;  %v4614_v32 = vld [vmem:[#allocation17_spill] sm:$0xff]  ;;  %v4615_v23 = vld [vmem:[#allocation18_spill] sm:$0xff] }
 0x686   :  { %v1290_v20 = vmul.f32 %v2592_v33, %v3669_v36  ;;  %v2594_v43 = vpop.eup %2593  ;;  %v4605_v36 = vld [vmem:[#allocation8_spill] sm:$0xff]  ;;  %v4616_v33 = vld [vmem:[#allocation19_spill] sm:$0xff] }
 0x688   :  { %v3747_v38 = vadd.f32 %v1291_v25, %v1290_v20  ;;  %v4618_v20 = vld [vmem:[#allocation21_spill] sm:$0xff]  ;;  %v4619_v25 = vld [vmem:[#allocation22_spill] sm:$0xff] }
 0x68a   :  { %2595 = vtanh.f32 %v3747_v38 }
 0x697   :  { %v2596_v19 = vpop.eup %2595 }
 0x698   :  { %v1294_v30 = vmul.f32 %v2596_v19, %v2594_v43  ;;  %v4620_v43 = vld [vmem:[#allocation23_spill] sm:$0xff]  ;;  %v4621_v19 = vld [vmem:[#allocation24_spill] sm:$0xff] }
 0x69a   :  { %1375 = vmatmul.mubr.f32.vlgmr.msra.gmra.mxu0 %v1294_v30  ;;  %1446 = vmatmul.mubr.f32.vlgmr.msra.gmra.mxu1 %v1294_v30  ;;  %v4622_v30 = vld [vmem:[#allocation25_spill] sm:$0xff] }
 0x69b   :  { %1496 = vmatpush1.msra.mxu0 %v3388_v63  ;;  %1567 = vmatpush1.msra.mxu1 %v3391_v59 }
 0x69c   :  { %1497 = vmatprep.subr.mxu0 %v3394_v50  ;;  %1568 = vmatprep.subr.mxu1 %v3397_v7 }
 0x69d   :  { %1498 = vmatpush1.msra.mxu0 %v3400_v5  ;;  %1569 = vmatpush1.msra.mxu1 %v3403_v60 }
 0x69e   :  { %1499 = vmatprep.subr.mxu0 %v3406_v2  ;;  %1570 = vmatprep.subr.mxu1 %v3409_v4 }
 0x69f   :  { %1500 = vmatpush1.msra.mxu0 %v3412_v51  ;;  %1571 = vmatpush1.msra.mxu1 %v3415_v1 }
 0x6a0   :  { %1501 = vmatprep.subr.mxu0 %v3418_v3  ;;  %1572 = vmatprep.subr.mxu1 %v3421_v6 }
 0x6a1   :  { %1502 = vmatpush1.msra.mxu0 %v3424_v57  ;;  %1573 = vmatpush1.msra.mxu1 %v3427_v9 }
 0x6a2   :  { %1503 = vmatprep.subr.mxu0 %v3430_v58  ;;  %1574 = vmatprep.subr.mxu1 %v3433_v27 }
 0x6a3   :  { %1504 = vmatpush1.msra.mxu0 %v3436_v56  ;;  %1575 = vmatpush1.msra.mxu1 %v3439_v61 }
 0x6a4   :  { %1505 = vmatprep.subr.mxu0 %v3524_v0  ;;  %1576 = vmatprep.subr.mxu1 %v3527_v37 }
 0x6a5   :  { %1506 = vmatpush1.msra.mxu0 %v3530_v39  ;;  %1577 = vmatpush1.msra.mxu1 %v3533_v40 }
 0x6a6   :  { %1507 = vmatprep.subr.mxu0 %v3536_v41  ;;  %1578 = vmatprep.subr.mxu1 %v3539_v42 }
 0x6a7   :  { %1508 = vmatpush1.msra.mxu0 %v3542_v44  ;;  %1579 = vmatpush1.msra.mxu1 %v3545_v45 }
 0x6a8   :  { %1509 = vmatprep.subr.mxu0 %v3548_v46  ;;  %1580 = vmatprep.subr.mxu1 %v3551_v47 }
 0x6a9   :  { %1510 = vmatpush1.msra.mxu0 %v3554_v48  ;;  %1581 = vmatpush1.msra.mxu1 %v3557_v49 }
 0x6aa   :  { %1511 = vmatprep.subr.mxu0 %v3560_v55  ;;  %1582 = vmatprep.subr.mxu1 %v3563_v10 }
 0x6ab   :  { %1512 = vmatpush1.msra.mxu0 %v3566_v11  ;;  %1583 = vmatpush1.msra.mxu1 %v3569_v12 }
 0x6ac   :  { %1513 = vmatprep.subr.mxu0 %v3572_v13  ;;  %1584 = vmatprep.subr.mxu1 %v3575_v14 }
 0x6ad   :  { %1514 = vmatpush1.msra.mxu0 %v3578_v15  ;;  %1585 = vmatpush1.msra.mxu1 %v3581_v16 }
 0x6ae   :  { %1515 = vmatprep.subr.mxu0 %v3584_v17  ;;  %1586 = vmatprep.subr.mxu1 %v3587_v18 }
 0x6af   :  { %1516 = vmatpush1.msra.mxu0 %v4605_v36  ;;  %1587 = vmatpush1.msra.mxu1 %v4606_v22 }
 0x6b0   :  { %1517 = vmatprep.subr.mxu0 %v4607_v34  ;;  %1588 = vmatprep.subr.mxu1 %v4608_v21 }
 0x6b1   :  { %1518 = vmatpush1.msra.mxu0 %v4609_v31  ;;  %1589 = vmatpush1.msra.mxu1 %v4610_v24 }
 0x6b2   :  { %1519 = vmatprep.subr.mxu0 %v4611_v26  ;;  %1590 = vmatprep.subr.mxu1 %v4612_v35  ;;  %v4623_v35 = vld [vmem:[#allocation6_spill] sm:$0xff] }
 0x6b3   :  { %1520 = vmatpush1.msra.mxu0 %v4613_v28  ;;  %1591 = vmatpush1.msra.mxu1 %v4614_v32  ;;  %v4624_v28 = vld [vmem:[#allocation7_spill] sm:$0xff]  ;;  %v4625_v32 = vld [vmem:[#allocation32_spill] sm:$0xff] }
 0x6b4   :  { %1521 = vmatprep.subr.mxu0 %v4615_v23  ;;  %1592 = vmatprep.subr.mxu1 %v4616_v33  ;;  %v4626_v23 = vmov 0.0   ;;  %v4627_v33 = vld [vmem:[#allocation26_spill] sm:$0xff] }
 0x6b5   :  { %1522 = vmatpush1.msra.mxu0 %v4617_v29  ;;  %1593 = vmatpush1.msra.mxu1 %v4618_v20  ;;  %v4628_v20 = vld [vmem:[#allocation34_spill] sm:$0xff] }
 0x6b6   :  { %1523 = vmatprep.subr.mxu0 %v4619_v25  ;;  %1594 = vmatprep.subr.mxu1 %v4620_v43  ;;  %v4629_v25 = vld [vmem:[#allocation35_spill] sm:$0xff]  ;;  %v1300_v43 = vpop.permute.xlu1 %1299 }
 0x6b7   :  { %1524 = vmatpush1.msra.mxu0 %v4621_v19  ;;  %1595 = vmatpush1.msra.mxu1 %v4622_v30  ;;  %v4630_v19 = vld [vmem:[#allocation30_spill] sm:$0xff]  ;;  %v4631_v30 = vld [vmem:[#allocation31_spill] sm:$0xff] }
 0x6b8   :  { %1525 = vmatprep.subr.mxu0 %v4623_v35  ;;  %1596 = vmatprep.subr.mxu1 %v4624_v28  ;;  %v1302_v29 = vmul.f32 %v1300_v43, %v4630_v19  ;;  %v1303_v26 = vmul.f32 %v1300_v43, %v4631_v30  ;;  %v1305_v30 = vmul.f32 %v1300_v43, %v3126_v54 }
 0x6b9   :  { %1526 = vmatpush1.msra.mxu0 %v4625_v32  ;;  %1559 = vmatprep.mubr.f32.mxu0 %v4626_v23  ;;  %v4632_v32 = vld [vmem:[#allocation33_spill] sm:$0xff] }
 0x6ba   :  { %1597 = vmatpush1.msra.mxu1 %v4627_v33  ;;  %1630 = vmatprep.mubr.f32.mxu1 %v4626_v23  ;;  %v1306_v35 = vadd.f32 %v1302_v29, %v4543_v53  ;;  %v1307_v31 = vadd.f32 %v1303_v26, %v4632_v32 }
 0x6bb   :  { %1680 = vmatprep.subr.mxu0 %v4628_v20  ;;  %1751 = vmatprep.subr.mxu1 %v4629_v25  ;;  %v1304_v20 = vmul.f32 %v1300_v43, %v4487_v8 }
 0x6bd   :  { %v1308_v22 = vadd.f32 %v1304_v20, %v4488_v52 }
 0x75a   :  { %v1376_v28 = vpop.f32.mrf.mxu0  ;;  %v1447_v25 = vpop.f32.mrf.mxu1 }
 0x75b   :  { %v1452_v24 = vadd.f32 %v1376_v28, %v1306_v35  ;;  %v1454_v19 = vadd.f32 %v1447_v25, %v1308_v22  ;;  %v1309_v35 = vadd.f32 %v1305_v30, %v3130_v62 }
 0x75c   :  { %v1378_v21 = vpop.f32.mrf.mxu0  ;;  %v1449_v36 = vpop.f32.mrf.mxu1 }
 0x75d   :  { %v2454_v34 = vmul.f32 -1.442695, %v1452_v24  ;;  %v1453_v33 = vadd.f32 %v1378_v21, %v1307_v31  ;;  %v2456_v29 = vmul.f32 -1.442695, %v1454_v19  ;;  %v1455_v26 = vadd.f32 %v1449_v36, %v1309_v35 }
 0x75e   :  { %v4654_v35 = vmov 0.0  }
 0x75f   :  { %2597 = vpow2.f32 %v2454_v34  ;;  %v2455_v23 = vmul.f32 -1.442695, %v1453_v33 }
 0x761   :  { %2599 = vpow2.f32 %v2455_v23 }
 0x762   :  { %2601 = vpow2.f32 %v2456_v29  ;;  %v4653_v29 = vld [vmem:[#allocation32_spill] sm:$0xff] }
 0x76c   :  { %v2598_v28 = vpop.eup %2597 }
 0x76d   :  { %v1465_v32 = vadd.f32 1.0, %v2598_v28  ;;  %v4655_v28 = vld [vmem:[#allocation26_spill] sm:$0xff] }
 0x76e   :  { %v2600_v24 = vpop.eup %2599 }
 0x76f   :  { %2603 = vrcp.f32 %v1465_v32  ;;  %v1466_v34 = vadd.f32 1.0, %v2600_v24  ;;  %v2602_v21 = vpop.eup %2601  ;;  %v4652_v32 = vld [vmem:[#allocation7_spill] sm:$0xff] }
 0x770   :  { %2605 = vtanh.f32 %v1455_v26  ;;  %v1467_v22 = vadd.f32 1.0, %v2602_v21  ;;  %v4656_v26 = vld [vmem:[#allocation34_spill] sm:$0xff]  ;;  %v4657_v24 = vld [vmem:[#allocation35_spill] sm:$0xff] }
 0x771   :  { %2607 = vrcp.f32 %v1466_v34  ;;  %v1485_v34 = vpop.permute.xlu0 %1484  ;;  %v4658_v21 = vld [vmem:[#allocation30_spill] sm:$0xff] }
 0x772   :  { %2609 = vrcp.f32 %v1467_v22 }
 0x77c   :  { %v2604_v31 = vpop.eup %2603 }
 0x77d   :  { %v2606_v23 = vpop.eup %2605 }
 0x77e   :  { %v2608_v33 = vpop.eup %2607  ;;  %v1476_v25 = vmul.f32 %v2606_v23, %v2604_v31  ;;  %v1487_v31 = vmul.f32 %v1485_v34, %v4658_v21  ;;  %v4659_v23 = vld [vmem:[#allocation31_spill] sm:$0xff] }
 0x77f   :  { %v1475_v20 = vmul.f32 %v2608_v33, %v3747_v38  ;;  %v2610_v36 = vpop.eup %2609  ;;  %v4651_v38 = vld [vmem:[#allocation6_spill] sm:$0xff]  ;;  %v1488_v33 = vmul.f32 %v1485_v34, %v4659_v23  ;;  %v1490_v23 = vmul.f32 %v1485_v34, %v3126_v54 }
 0x780   :  { %v1491_v22 = vadd.f32 %v1487_v31, %v4543_v53 }
 0x781   :  { %v3825_v43 = vadd.f32 %v1476_v25, %v1475_v20 }
 0x783   :  { %2611 = vtanh.f32 %v3825_v43 }
 0x790   :  { %v2612_v19 = vpop.eup %2611 }
 0x791   :  { %v1479_v30 = vmul.f32 %v2612_v19, %v2610_v36  ;;  %v4660_v36 = vld [vmem:[#allocation33_spill] sm:$0xff] }
 0x792   :  { %v1492_v19 = vadd.f32 %v1488_v33, %v4660_v36 }
 0x793   :  { %1560 = vmatmul.mubr.f32.vlgmr.msra.gmra.mxu0 %v1479_v30  ;;  %1631 = vmatmul.mubr.f32.vlgmr.msra.gmra.mxu1 %v1479_v30 }
 0x794   :  { %1681 = vmatpush1.msra.mxu0 %v3388_v63  ;;  %1752 = vmatpush1.msra.mxu1 %v3391_v59  ;;  %v4633_v63 = vld [vmem:[#allocation8_spill] sm:$0xff]  ;;  %v4634_v59 = vld [vmem:[#allocation9_spill] sm:$0xff] }
 0x795   :  { %1682 = vmatprep.subr.mxu0 %v3394_v50  ;;  %1753 = vmatprep.subr.mxu1 %v3397_v7  ;;  %v4635_v50 = vld [vmem:[#allocation10_spill] sm:$0xff]  ;;  %v4636_v7 = vld [vmem:[#allocation11_spill] sm:$0xff] }
 0x796   :  { %1683 = vmatpush1.msra.mxu0 %v3400_v5  ;;  %1754 = vmatpush1.msra.mxu1 %v3403_v60  ;;  %v4637_v5 = vld [vmem:[#allocation12_spill] sm:$0xff]  ;;  %v4638_v60 = vld [vmem:[#allocation13_spill] sm:$0xff] }
 0x797   :  { %1684 = vmatprep.subr.mxu0 %v3406_v2  ;;  %1755 = vmatprep.subr.mxu1 %v3409_v4  ;;  %v4639_v2 = vld [vmem:[#allocation14_spill] sm:$0xff]  ;;  %v4640_v4 = vld [vmem:[#allocation15_spill] sm:$0xff] }
 0x798   :  { %1685 = vmatpush1.msra.mxu0 %v3412_v51  ;;  %1756 = vmatpush1.msra.mxu1 %v3415_v1  ;;  %v4641_v51 = vld [vmem:[#allocation16_spill] sm:$0xff]  ;;  %v4642_v1 = vld [vmem:[#allocation17_spill] sm:$0xff] }
 0x799   :  { %1686 = vmatprep.subr.mxu0 %v3418_v3  ;;  %1757 = vmatprep.subr.mxu1 %v3421_v6  ;;  %v4643_v3 = vld [vmem:[#allocation18_spill] sm:$0xff]  ;;  %v4644_v6 = vld [vmem:[#allocation19_spill] sm:$0xff] }
 0x79a   :  { %1687 = vmatpush1.msra.mxu0 %v3424_v57  ;;  %1758 = vmatpush1.msra.mxu1 %v3427_v9  ;;  %v4645_v57 = vld [vmem:[#allocation20_spill] sm:$0xff]  ;;  %v4646_v9 = vld [vmem:[#allocation21_spill] sm:$0xff] }
 0x79b   :  { %1688 = vmatprep.subr.mxu0 %v3430_v58  ;;  %1759 = vmatprep.subr.mxu1 %v3433_v27  ;;  %v4647_v58 = vld [vmem:[#allocation22_spill] sm:$0xff]  ;;  %v4648_v27 = vld [vmem:[#allocation23_spill] sm:$0xff] }
 0x79c   :  { %1689 = vmatpush1.msra.mxu0 %v3436_v56  ;;  %1760 = vmatpush1.msra.mxu1 %v3439_v61  ;;  %v4649_v56 = vld [vmem:[#allocation24_spill] sm:$0xff]  ;;  %v4650_v61 = vld [vmem:[#allocation25_spill] sm:$0xff] }
 0x79d   :  { %1690 = vmatprep.subr.mxu0 %v3524_v0  ;;  %1761 = vmatprep.subr.mxu1 %v3527_v37 }
 0x79e   :  { %1691 = vmatpush1.msra.mxu0 %v3530_v39  ;;  %1762 = vmatpush1.msra.mxu1 %v3533_v40 }
 0x79f   :  { %1692 = vmatprep.subr.mxu0 %v3536_v41  ;;  %1763 = vmatprep.subr.mxu1 %v3539_v42 }
 0x7a0   :  { %1693 = vmatpush1.msra.mxu0 %v3542_v44  ;;  %1764 = vmatpush1.msra.mxu1 %v3545_v45 }
 0x7a1   :  { %1694 = vmatprep.subr.mxu0 %v3548_v46  ;;  %1765 = vmatprep.subr.mxu1 %v3551_v47 }
 0x7a2   :  { %1695 = vmatpush1.msra.mxu0 %v3554_v48  ;;  %1766 = vmatpush1.msra.mxu1 %v3557_v49 }
 0x7a3   :  { %1696 = vmatprep.subr.mxu0 %v3560_v55  ;;  %1767 = vmatprep.subr.mxu1 %v3563_v10 }
 0x7a4   :  { %1697 = vmatpush1.msra.mxu0 %v3566_v11  ;;  %1768 = vmatpush1.msra.mxu1 %v3569_v12 }
 0x7a5   :  { %1698 = vmatprep.subr.mxu0 %v3572_v13  ;;  %1769 = vmatprep.subr.mxu1 %v3575_v14 }
 0x7a6   :  { %1699 = vmatpush1.msra.mxu0 %v3578_v15  ;;  %1770 = vmatpush1.msra.mxu1 %v3581_v16 }
 0x7a7   :  { %1700 = vmatprep.subr.mxu0 %v3584_v17  ;;  %1771 = vmatprep.subr.mxu1 %v3587_v18 }
 0x7a8   :  { %1701 = vmatpush1.msra.mxu0 %v4633_v63  ;;  %1772 = vmatpush1.msra.mxu1 %v4634_v59 }
 0x7a9   :  { %1702 = vmatprep.subr.mxu0 %v4635_v50  ;;  %1773 = vmatprep.subr.mxu1 %v4636_v7 }
 0x7aa   :  { %1703 = vmatpush1.msra.mxu0 %v4637_v5  ;;  %1774 = vmatpush1.msra.mxu1 %v4638_v60 }
 0x7ab   :  { %1704 = vmatprep.subr.mxu0 %v4639_v2  ;;  %1775 = vmatprep.subr.mxu1 %v4640_v4 }
 0x7ac   :  { %1705 = vmatpush1.msra.mxu0 %v4641_v51  ;;  %1776 = vmatpush1.msra.mxu1 %v4642_v1 }
 0x7ad   :  { %1706 = vmatprep.subr.mxu0 %v4643_v3  ;;  %1777 = vmatprep.subr.mxu1 %v4644_v6 }
 0x7ae   :  { %1707 = vmatpush1.msra.mxu0 %v4645_v57  ;;  %1778 = vmatpush1.msra.mxu1 %v4646_v9 }
 0x7af   :  { %1708 = vmatprep.subr.mxu0 %v4647_v58  ;;  %1779 = vmatprep.subr.mxu1 %v4648_v27 }
 0x7b0   :  { %1709 = vmatpush1.msra.mxu0 %v4649_v56  ;;  %1780 = vmatpush1.msra.mxu1 %v4650_v61 }
 0x7b1   :  { %1710 = vmatprep.subr.mxu0 %v4651_v38  ;;  %1781 = vmatprep.subr.mxu1 %v4652_v32 }
 0x7b2   :  { %1711 = vmatpush1.msra.mxu0 %v4653_v29  ;;  %1744 = vmatprep.mubr.f32.mxu0 %v4654_v35 }
 0x7b3   :  { %1782 = vmatpush1.msra.mxu1 %v4655_v28  ;;  %1815 = vmatprep.mubr.f32.mxu1 %v4654_v35 }
 0x7b4   :  { %1865 = vmatprep.subr.mxu0 %v4656_v26  ;;  %1936 = vmatprep.subr.mxu1 %v4657_v24  ;;  %v1489_v26 = vmul.f32 %v1485_v34, %v4487_v8 }
 0x7b6   :  { %v1493_v32 = vadd.f32 %v1489_v26, %v4488_v52 }
 0x853   :  { %v1561_v20 = vpop.f32.mrf.mxu0  ;;  %v1632_v24 = vpop.f32.mrf.mxu1 }
 0x854   :  { %v1637_v25 = vadd.f32 %v1561_v20, %v1491_v22  ;;  %v1639_v21 = vadd.f32 %v1632_v24, %v1493_v32  ;;  %v1494_v22 = vadd.f32 %v1490_v23, %v3130_v62 }
 0x855   :  { %v1563_v30 = vpop.f32.mrf.mxu0  ;;  %v1634_v38 = vpop.f32.mrf.mxu1 }
 0x856   :  { %v2458_v29 = vmul.f32 -1.442695, %v1637_v25  ;;  %v1638_v28 = vadd.f32 %v1563_v30, %v1492_v19  ;;  %v2460_v31 = vmul.f32 -1.442695, %v1639_v21  ;;  %v1640_v33 = vadd.f32 %v1634_v38, %v1494_v22  ;;  %v3915_v22 = vld [vmem:[#allocation3 + $0x1d8] sm:$0xff] }
 0x858   :  { %2613 = vpow2.f32 %v2458_v29  ;;  %v2459_v35 = vmul.f32 -1.442695, %v1638_v28 }
 0x85a   :  { %2615 = vpow2.f32 %v2459_v35 }
 0x85b   :  { %2617 = vpow2.f32 %v2460_v31  ;;  %v3909_v31 = vld [vmem:[#allocation3 + $0x1f0] sm:$0xff] }
 0x865   :  { %v2614_v20 = vpop.eup %2613 }
 0x866   :  { %v1650_v36 = vadd.f32 1.0, %v2614_v20  ;;  %v3918_v20 = vld [vmem:[#allocation3 + $0x1c0] sm:$0xff] }
 0x867   :  { %v2616_v25 = vpop.eup %2615 }
 0x868   :  { %2619 = vrcp.f32 %v1650_v36  ;;  %v1651_v29 = vadd.f32 1.0, %v2616_v25  ;;  %v2618_v35 = vpop.eup %2617  ;;  %v3906_v36 = vld [vmem:[#allocation3 + $0x1e0] sm:$0xff]  ;;  %v3924_v25 = vld [vmem:[#allocation3 + $0x1a8] sm:$0xff] }
 0x869   :  { %2621 = vtanh.f32 %v1640_v33  ;;  %v1652_v32 = vadd.f32 1.0, %v2618_v35  ;;  %v3921_v33 = vld [vmem:[#allocation3 + $0x1d0] sm:$0xff]  ;;  %v3930_v35 = vld [vmem:[#allocation3 + $0x1a0] sm:$0xff] }
 0x86a   :  { %2623 = vrcp.f32 %v1651_v29  ;;  %v3927_v29 = vld [vmem:[#allocation3 + $0x1b8] sm:$0xff] }
 0x86b   :  { %2625 = vrcp.f32 %v1652_v32  ;;  %v3942_v32 = vld [vmem:[#allocation3 + $0x180] sm:$0xff] }
 0x875   :  { %v2620_v28 = vpop.eup %2619 }
 0x876   :  { %v2622_v19 = vpop.eup %2621 }
 0x877   :  { %v2624_v30 = vpop.eup %2623  ;;  %v1661_v26 = vmul.f32 %v2622_v19, %v2620_v28  ;;  %v3933_v28 = vld [vmem:[#allocation3 + $0x1b0] sm:$0xff]  ;;  %v3936_v19 = vld [vmem:[#allocation3 + $0x188] sm:$0xff] }
 0x878   :  { %v1660_v34 = vmul.f32 %v2624_v30, %v3825_v43  ;;  %v2626_v38 = vpop.eup %2625  ;;  %v3912_v43 = vld [vmem:[#allocation3 + $0x1c8] sm:$0xff]  ;;  %v3939_v30 = vld [vmem:[#allocation3 + $0x198] sm:$0xff] }
 0x87a   :  { %v3903_v21 = vadd.f32 %v1661_v26, %v1660_v34  ;;  %v3945_v34 = vld [vmem:[#allocation3 + $0x190] sm:$0xff]  ;;  %v3948_v26 = vld [vmem:[#allocation3 + $0x168] sm:$0xff] }
 0x87c   :  { %2627 = vtanh.f32 %v3903_v21 }
 0x889   :  { %v2628_v23 = vpop.eup %2627 }
 0x88a   :  { %v1664_v24 = vmul.f32 %v2628_v23, %v2626_v38  ;;  %v3951_v38 = vld [vmem:[#allocation3 + $0x178] sm:$0xff]  ;;  %v3954_v23 = vld [vmem:[#allocation3 + $0x160] sm:$0xff] }
 0x88c   :  { %1745 = vmatmul.mubr.f32.vlgmr.msra.gmra.mxu0 %v1664_v24  ;;  %1816 = vmatmul.mubr.f32.vlgmr.msra.gmra.mxu1 %v1664_v24  ;;  %v3957_v24 = vld [vmem:[#allocation3 + $0x170] sm:$0xff] }
 0x88d   :  { %1866 = vmatpush1.msra.mxu0 %v3906_v36  ;;  %1937 = vmatpush1.msra.mxu1 %v3909_v31 }
 0x88e   :  { %1867 = vmatprep.subr.mxu0 %v3912_v43  ;;  %1938 = vmatprep.subr.mxu1 %v3915_v22 }
 0x88f   :  { %1868 = vmatpush1.msra.mxu0 %v3918_v20  ;;  %1939 = vmatpush1.msra.mxu1 %v3921_v33 }
 0x890   :  { %1869 = vmatprep.subr.mxu0 %v3924_v25  ;;  %1940 = vmatprep.subr.mxu1 %v3927_v29 }
 0x891   :  { %1870 = vmatpush1.msra.mxu0 %v3930_v35  ;;  %1941 = vmatpush1.msra.mxu1 %v3933_v28 }
 0x892   :  { %1871 = vmatprep.subr.mxu0 %v3936_v19  ;;  %1942 = vmatprep.subr.mxu1 %v3939_v30 }
 0x893   :  { %1872 = vmatpush1.msra.mxu0 %v3942_v32  ;;  %1943 = vmatpush1.msra.mxu1 %v3945_v34 }
 0x894   :  { %1873 = vmatprep.subr.mxu0 %v3948_v26  ;;  %1944 = vmatprep.subr.mxu1 %v3951_v38 }
 0x895   :  { %1874 = vmatpush1.msra.mxu0 %v3954_v23  ;;  %1945 = vmatpush1.msra.mxu1 %v3957_v24 }
 0x896   :  { %1875 = vmatprep.subr.mxu0 %v3524_v0  ;;  %1946 = vmatprep.subr.mxu1 %v3527_v37  ;;  %v4661_v0 = vld [vmem:[#allocation6_spill] sm:$0xff]  ;;  %v4662_v37 = vld [vmem:[#allocation7_spill] sm:$0xff] }
 0x897   :  { %1876 = vmatpush1.msra.mxu0 %v3530_v39  ;;  %1947 = vmatpush1.msra.mxu1 %v3533_v40  ;;  %v4663_v39 = vld [vmem:[#allocation32_spill] sm:$0xff]  ;;  %v4664_v40 = vmov 0.0  }
 0x898   :  { %1877 = vmatprep.subr.mxu0 %v3536_v41  ;;  %1948 = vmatprep.subr.mxu1 %v3539_v42  ;;  %v4665_v41 = vld [vmem:[#allocation26_spill] sm:$0xff]  ;;  %v4006_v42 = vld [vmem:[#allocation3 + $0x1e8] sm:$0xff] }
 0x899   :  { %1878 = vmatpush1.msra.mxu0 %v3542_v44  ;;  %1949 = vmatpush1.msra.mxu1 %v3545_v45  ;;  %v4009_v44 = vld [vmem:[#allocation3 + $0x1f8] sm:$0xff]  ;;  %v1670_v45 = vpop.permute.xlu1 %1669 }
 0x89a   :  { %1879 = vmatprep.subr.mxu0 %v3548_v46  ;;  %1950 = vmatprep.subr.mxu1 %v3551_v47  ;;  %v4666_v46 = vld [vmem:[#allocation30_spill] sm:$0xff] }
 0x89b   :  { %1880 = vmatpush1.msra.mxu0 %v3554_v48  ;;  %1951 = vmatpush1.msra.mxu1 %v3557_v49  ;;  %v1672_v47 = vmul.f32 %v1670_v45, %v4666_v46  ;;  %v4667_v48 = vld [vmem:[#allocation31_spill] sm:$0xff] }
 0x89c   :  { %1881 = vmatprep.subr.mxu0 %v3560_v55  ;;  %1952 = vmatprep.subr.mxu1 %v3563_v10  ;;  %v1673_v49 = vmul.f32 %v1670_v45, %v4667_v48 }
 0x89d   :  { %1882 = vmatpush1.msra.mxu0 %v3566_v11  ;;  %1953 = vmatpush1.msra.mxu1 %v3569_v12  ;;  %v1676_v55 = vadd.f32 %v1672_v47, %v4543_v53  ;;  %v4668_v12 = vld [vmem:[#allocation33_spill] sm:$0xff] }
 0x89e   :  { %1883 = vmatprep.subr.mxu0 %v3572_v13  ;;  %1954 = vmatprep.subr.mxu1 %v3575_v14  ;;  %v1677_v13 = vadd.f32 %v1673_v49, %v4668_v12  ;;  %v4045_v47 = vld [vmem:[#allocation3 + $0x158] sm:$0xff]  ;;  %v4048_v49 = vld [vmem:[#allocation3 + $0x140] sm:$0xff] }
 0x89f   :  { %1884 = vmatpush1.msra.mxu0 %v3578_v15  ;;  %1955 = vmatpush1.msra.mxu1 %v3581_v16 }
 0x8a0   :  { %1885 = vmatprep.subr.mxu0 %v3584_v17  ;;  %1956 = vmatprep.subr.mxu1 %v3587_v18  ;;  %v1674_v18 = vmul.f32 %v1670_v45, %v4487_v8 }
 0x8a1   :  { %1886 = vmatpush1.msra.mxu0 %v4633_v63  ;;  %1957 = vmatpush1.msra.mxu1 %v4634_v59 }
 0x8a2   :  { %1887 = vmatprep.subr.mxu0 %v4635_v50  ;;  %1958 = vmatprep.subr.mxu1 %v4636_v7  ;;  %v1678_v59 = vadd.f32 %v1674_v18, %v4488_v52  ;;  %v1675_v7 = vmul.f32 %v1670_v45, %v3126_v54  ;;  %v4075_v18 = vld [vmem:[#allocation3 + $0x110] sm:$0xff] }
 0x8a3   :  { %1888 = vmatpush1.msra.mxu0 %v4637_v5  ;;  %1959 = vmatpush1.msra.mxu1 %v4638_v60 }
 0x8a4   :  { %1889 = vmatprep.subr.mxu0 %v4639_v2  ;;  %1960 = vmatprep.subr.mxu1 %v4640_v4  ;;  %v1679_v2 = vadd.f32 %v1675_v7, %v3130_v62  ;;  %v4087_v7 = vld [vmem:[#allocation3 + $0xf0] sm:$0xff] }
 0x8a5   :  { %1890 = vmatpush1.msra.mxu0 %v4641_v51  ;;  %1961 = vmatpush1.msra.mxu1 %v4642_v1 }
 0x8a6   :  { %1891 = vmatprep.subr.mxu0 %v4643_v3  ;;  %1962 = vmatprep.subr.mxu1 %v4644_v6 }
 0x8a7   :  { %1892 = vmatpush1.msra.mxu0 %v4645_v57  ;;  %1963 = vmatpush1.msra.mxu1 %v4646_v9 }
 0x8a8   :  { %1893 = vmatprep.subr.mxu0 %v4647_v58  ;;  %1964 = vmatprep.subr.mxu1 %v4648_v27 }
 0x8a9   :  { %1894 = vmatpush1.msra.mxu0 %v4649_v56  ;;  %1965 = vmatpush1.msra.mxu1 %v4650_v61 }
 0x8aa   :  { %1895 = vmatprep.subr.mxu0 %v4661_v0  ;;  %1966 = vmatprep.subr.mxu1 %v4662_v37 }
 0x8ab   :  { %1896 = vmatpush1.msra.mxu0 %v4663_v39  ;;  %1929 = vmatprep.mubr.f32.mxu0 %v4664_v40 }
 0x8ac   :  { %1967 = vmatpush1.msra.mxu1 %v4665_v41  ;;  %2000 = vmatprep.mubr.f32.mxu1 %v4664_v40 }
 0x8ad   :  { %2050 = vmatprep.subr.mxu0 %v4006_v42  ;;  %2121 = vmatprep.subr.mxu1 %v4009_v44 }
 0x94c   :  { %v1746_v10 = vpop.f32.mrf.mxu0  ;;  %v1817_v63 = vpop.f32.mrf.mxu1 }
 0x94d   :  { %v1822_v11 = vadd.f32 %v1746_v10, %v1676_v55  ;;  %v1824_v50 = vadd.f32 %v1817_v63, %v1678_v59  ;;  %v4051_v55 = vld [vmem:[#allocation3 + $0x150] sm:$0xff]  ;;  %v4054_v10 = vld [vmem:[#allocation3 + $0x128] sm:$0xff]  ;;  %v4081_v59 = vld [vmem:[#allocation3 + $0xf8] sm:$0xff] }
 0x94e   :  { %v1748_v14 = vpop.f32.mrf.mxu0  ;;  %v1819_v5 = vpop.f32.mrf.mxu1  ;;  %v4078_v63 = vld [vmem:[#allocation3 + $0xe8] sm:$0xff] }
 0x94f   :  { %v2462_v15 = vmul.f32 -1.442695, %v1822_v11  ;;  %v1823_v16 = vadd.f32 %v1748_v14, %v1677_v13  ;;  %v2464_v60 = vmul.f32 -1.442695, %v1824_v50  ;;  %v1825_v51 = vadd.f32 %v1819_v5, %v1679_v2  ;;  %v4057_v11 = vld [vmem:[#allocation3 + $0x138] sm:$0xff]  ;;  %v4060_v13 = vld [vmem:[#allocation3 + $0x120] sm:$0xff] }
 0x950   :  { %v4063_v14 = vld [vmem:[#allocation3 + $0x130] sm:$0xff]  ;;  %v4084_v50 = vld [vmem:[#allocation3 + $0xe0] sm:$0xff]  ;;  %v4090_v5 = vld [vmem:[#allocation3 + $0xc8] sm:$0xff] }
 0x951   :  { %2629 = vpow2.f32 %v2462_v15  ;;  %v2463_v17 = vmul.f32 -1.442695, %v1823_v16  ;;  %v4066_v15 = vld [vmem:[#allocation3 + $0x108] sm:$0xff]  ;;  %v4069_v16 = vld [vmem:[#allocation3 + $0x118] sm:$0xff]  ;;  %v4096_v2 = vld [vmem:[#allocation3 + $0xc0] sm:$0xff] }
 0x953   :  { %2631 = vpow2.f32 %v2463_v17  ;;  %v4072_v17 = vld [vmem:[#allocation3 + $0x100] sm:$0xff] }
 0x954   :  { %2633 = vpow2.f32 %v2464_v60  ;;  %v4093_v60 = vld [vmem:[#allocation3 + $0xd8] sm:$0xff] }
 0x95e   :  { %v2630_v4 = vpop.eup %2629 }
 0x95f   :  { %v1835_v1 = vadd.f32 1.0, %v2630_v4  ;;  %v4099_v4 = vld [vmem:[#allocation3 + $0xd0] sm:$0xff] }
 0x960   :  { %v2632_v3 = vpop.eup %2631 }
 0x961   :  { %2635 = vrcp.f32 %v1835_v1  ;;  %v1836_v6 = vadd.f32 1.0, %v2632_v3  ;;  %v2634_v57 = vpop.eup %2633  ;;  %v4105_v1 = vld [vmem:[#allocation3 + $0xb8] sm:$0xff]  ;;  %v4108_v3 = vld [vmem:[#allocation3 + $0xa0] sm:$0xff] }
 0x962   :  { %2637 = vtanh.f32 %v1825_v51  ;;  %v1837_v56 = vadd.f32 1.0, %v2634_v57  ;;  %v4102_v51 = vld [vmem:[#allocation3 + $0xa8] sm:$0xff]  ;;  %4669 = vst [vmem:[#allocation27_spill] sm:$0xff] %v4108_v3 }
 0x963   :  { %2639 = vrcp.f32 %v1836_v6  ;;  %v4111_v6 = vld [vmem:[#allocation3 + $0xb0] sm:$0xff]  ;;  %v4114_v57 = vld [vmem:[#allocation3 + $0x88] sm:$0xff] }
 0x964   :  { %2641 = vrcp.f32 %v1837_v56  ;;  %4670 = vst [vmem:[#allocation28_spill] sm:$0xff] %v4111_v6  ;;  %4671 = vst [vmem:[#allocation29_spill] sm:$0xff] %v4114_v57  ;;  %v4126_v56 = vld [vmem:[#allocation3 + $0x68] sm:$0xff] }
 0x965   :  { %4675 = vst [vmem:[#allocation11_spill] sm:$0xff] %v4126_v56 }
 0x96e   :  { %v2636_v9 = vpop.eup %2635 }
 0x96f   :  { %v2638_v58 = vpop.eup %2637 }
 0x970   :  { %v2640_v27 = vpop.eup %2639  ;;  %v1846_v0 = vmul.f32 %v2638_v58, %v2636_v9  ;;  %v4117_v9 = vld [vmem:[#allocation3 + $0x98] sm:$0xff]  ;;  %v4120_v58 = vld [vmem:[#allocation3 + $0x80] sm:$0xff] }
 0x971   :  { %v1845_v61 = vmul.f32 %v2640_v27, %v3903_v21  ;;  %v2642_v39 = vpop.eup %2641  ;;  %v4042_v21 = vld [vmem:[#allocation3 + $0x148] sm:$0xff]  ;;  %4672 = vst [vmem:[#allocation8_spill] sm:$0xff] %v4117_v9  ;;  %4673 = vst [vmem:[#allocation9_spill] sm:$0xff] %v4120_v58  ;;  %v4123_v27 = vld [vmem:[#allocation3 + $0x90] sm:$0xff] }
 0x972   :  { %4674 = vst [vmem:[#allocation10_spill] sm:$0xff] %v4123_v27 }
 0x973   :  { %v4021_v37 = vadd.f32 %v1846_v0, %v1845_v61  ;;  %v4129_v61 = vld [vmem:[#allocation3 + $0x78] sm:$0xff]  ;;  %v4132_v0 = vld [vmem:[#allocation3 + $0x60] sm:$0xff] }
 0x974   :  { %4676 = vst [vmem:[#allocation12_spill] sm:$0xff] %v4129_v61  ;;  %4677 = vst [vmem:[#allocation13_spill] sm:$0xff] %v4132_v0 }
 0x975   :  { %2643 = vtanh.f32 %v4021_v37 }
 0x982   :  { %v2644_v41 = vpop.eup %2643 }
 0x983   :  { %v1849_v45 = vmul.f32 %v2644_v41, %v2642_v39  ;;  %v4135_v39 = vld [vmem:[#allocation3 + $0x70] sm:$0xff]  ;;  %v4138_v41 = vld [vmem:[#allocation3 + $0x48] sm:$0xff] }
 0x984   :  { %4678 = vst [vmem:[#allocation14_spill] sm:$0xff] %v4135_v39  ;;  %4679 = vst [vmem:[#allocation15_spill] sm:$0xff] %v4138_v41 }
 0x985   :  { %1930 = vmatmul.mubr.f32.vlgmr.msra.gmra.mxu0 %v1849_v45  ;;  %2001 = vmatmul.mubr.f32.vlgmr.msra.gmra.mxu1 %v1849_v45  ;;  %v4141_v45 = vld [vmem:[#allocation3 + $0x58] sm:$0xff] }
 0x986   :  { %2051 = vmatpush1.msra.mxu0 %v3906_v36  ;;  %2122 = vmatpush1.msra.mxu1 %v3909_v31  ;;  %4680 = vst [vmem:[#allocation16_spill] sm:$0xff] %v4141_v45 }
 0x987   :  { %2052 = vmatprep.subr.mxu0 %v3912_v43  ;;  %2123 = vmatprep.subr.mxu1 %v3915_v22 }
 0x988   :  { %2053 = vmatpush1.msra.mxu0 %v3918_v20  ;;  %2124 = vmatpush1.msra.mxu1 %v3921_v33 }
 0x989   :  { %2054 = vmatprep.subr.mxu0 %v3924_v25  ;;  %2125 = vmatprep.subr.mxu1 %v3927_v29 }
 0x98a   :  { %2055 = vmatpush1.msra.mxu0 %v3930_v35  ;;  %2126 = vmatpush1.msra.mxu1 %v3933_v28 }
 0x98b   :  { %2056 = vmatprep.subr.mxu0 %v3936_v19  ;;  %2127 = vmatprep.subr.mxu1 %v3939_v30 }
 0x98c   :  { %2057 = vmatpush1.msra.mxu0 %v3942_v32  ;;  %2128 = vmatpush1.msra.mxu1 %v3945_v34 }
 0x98d   :  { %2058 = vmatprep.subr.mxu0 %v3948_v26  ;;  %2129 = vmatprep.subr.mxu1 %v3951_v38 }
 0x98e   :  { %2059 = vmatpush1.msra.mxu0 %v3954_v23  ;;  %2130 = vmatpush1.msra.mxu1 %v3957_v24 }
 0x98f   :  { %2060 = vmatprep.subr.mxu0 %v4042_v21  ;;  %2131 = vmatprep.subr.mxu1 %v4045_v47 }
 0x990   :  { %2061 = vmatpush1.msra.mxu0 %v4048_v49  ;;  %2132 = vmatpush1.msra.mxu1 %v4051_v55 }
 0x991   :  { %2062 = vmatprep.subr.mxu0 %v4054_v10  ;;  %2133 = vmatprep.subr.mxu1 %v4057_v11 }
 0x992   :  { %2063 = vmatpush1.msra.mxu0 %v4060_v13  ;;  %2134 = vmatpush1.msra.mxu1 %v4063_v14 }
 0x993   :  { %2064 = vmatprep.subr.mxu0 %v4066_v15  ;;  %2135 = vmatprep.subr.mxu1 %v4069_v16 }
 0x994   :  { %2065 = vmatpush1.msra.mxu0 %v4072_v17  ;;  %2136 = vmatpush1.msra.mxu1 %v4075_v18 }
 0x995   :  { %2066 = vmatprep.subr.mxu0 %v4078_v63  ;;  %2137 = vmatprep.subr.mxu1 %v4081_v59 }
 0x996   :  { %2067 = vmatpush1.msra.mxu0 %v4084_v50  ;;  %2138 = vmatpush1.msra.mxu1 %v4087_v7 }
 0x997   :  { %2068 = vmatprep.subr.mxu0 %v4090_v5  ;;  %2139 = vmatprep.subr.mxu1 %v4093_v60 }
 0x998   :  { %2069 = vmatpush1.msra.mxu0 %v4096_v2  ;;  %2140 = vmatpush1.msra.mxu1 %v4099_v4 }
 0x999   :  { %2070 = vmatprep.subr.mxu0 %v4102_v51  ;;  %2141 = vmatprep.subr.mxu1 %v4105_v1 }
 0x99a   :  { %2071 = vmatpush1.msra.mxu0 %v4108_v3  ;;  %2142 = vmatpush1.msra.mxu1 %v4111_v6 }
 0x99b   :  { %2072 = vmatprep.subr.mxu0 %v4114_v57  ;;  %2143 = vmatprep.subr.mxu1 %v4117_v9 }
 0x99c   :  { %2073 = vmatpush1.msra.mxu0 %v4120_v58  ;;  %2144 = vmatpush1.msra.mxu1 %v4123_v27 }
 0x99d   :  { %2074 = vmatprep.subr.mxu0 %v4126_v56  ;;  %2145 = vmatprep.subr.mxu1 %v4129_v61  ;;  %v4144_v56 = vld [vmem:[#allocation3 + $0x40] sm:$0xff]  ;;  %v4147_v61 = vld [vmem:[#allocation3 + $0x50] sm:$0xff] }
 0x99e   :  { %2075 = vmatpush1.msra.mxu0 %v4132_v0  ;;  %2146 = vmatpush1.msra.mxu1 %v4135_v39  ;;  %4681 = vst [vmem:[#allocation17_spill] sm:$0xff] %v4144_v56  ;;  %4682 = vst [vmem:[#allocation18_spill] sm:$0xff] %v4147_v61  ;;  %v4150_v0 = vld [vmem:[#allocation3 + $0x28] sm:$0xff]  ;;  %v4153_v39 = vld [vmem:[#allocation3 + $0x38] sm:$0xff] }
 0x99f   :  { %2076 = vmatprep.subr.mxu0 %v4138_v41  ;;  %2147 = vmatprep.subr.mxu1 %v4141_v45  ;;  %4683 = vst [vmem:[#allocation19_spill] sm:$0xff] %v4150_v0  ;;  %4684 = vst [vmem:[#allocation20_spill] sm:$0xff] %v4153_v39  ;;  %v4156_v41 = vld [vmem:[#allocation3 + $0x20] sm:$0xff]  ;;  %v4159_v45 = vld [vmem:[#allocation3 + $0x30] sm:$0xff] }
 0x9a0   :  { %2077 = vmatpush1.msra.mxu0 %v4144_v56  ;;  %2148 = vmatpush1.msra.mxu1 %v4147_v61  ;;  %4685 = vst [vmem:[#allocation21_spill] sm:$0xff] %v4156_v41  ;;  %4686 = vst [vmem:[#allocation22_spill] sm:$0xff] %v4159_v45  ;;  %v4162_v56 = vld [vmem:[#allocation3 + $0x8] sm:$0xff]  ;;  %v4165_v61 = vld [vmem:[#allocation3 + $0x18] sm:$0xff] }
 0x9a1   :  { %2078 = vmatprep.subr.mxu0 %v4150_v0  ;;  %2149 = vmatprep.subr.mxu1 %v4153_v39  ;;  %4687 = vst [vmem:[#allocation23_spill] sm:$0xff] %v4162_v56  ;;  %4688 = vst [vmem:[#allocation24_spill] sm:$0xff] %v4165_v61  ;;  %v4168_v0 = vld [vmem:[#allocation3] sm:$0xff]  ;;  %v4172_v39 = vld [vmem:[#allocation3 + $0x10] sm:$0xff] }
 0x9a2   :  { %2079 = vmatpush1.msra.mxu0 %v4156_v41  ;;  %2150 = vmatpush1.msra.mxu1 %v4159_v45  ;;  %4689 = vst [vmem:[#allocation25_spill] sm:$0xff] %v4168_v0  ;;  %4690 = vst [vmem:[#allocation34_spill] sm:$0xff] %v4172_v39 }
 0x9a3   :  { %2080 = vmatprep.subr.mxu0 %v4162_v56  ;;  %2151 = vmatprep.subr.mxu1 %v4165_v61  ;;  %v1855_v56 = vpop.permute.xlu0 %1854 }
 0x9a4   :  { %2081 = vmatpush1.msra.mxu0 %v4168_v0  ;;  %2114 = vmatprep.mubr.f32.mxu0 %v4664_v40  ;;  %v1857_v45 = vmul.f32 %v1855_v56, %v4666_v46  ;;  %v1858_v61 = vmul.f32 %v1855_v56, %v4667_v48  ;;  %v1860_v48 = vmul.f32 %v1855_v56, %v3126_v54 }
 0x9a5   :  { %2152 = vmatpush1.msra.mxu1 %v4172_v39  ;;  %2185 = vmatprep.mubr.f32.mxu1 %v4664_v40 }
 0x9a6   :  { %2235 = vmatprep.subr.mxu0 %v4006_v42  ;;  %2306 = vmatprep.subr.mxu1 %v4009_v44  ;;  %v1861_v41 = vadd.f32 %v1857_v45, %v4543_v53  ;;  %v1862_v58 = vadd.f32 %v1858_v61, %v4668_v12  ;;  %v1859_v42 = vmul.f32 %v1855_v56, %v4487_v8 }
 0x9a8   :  { %v1863_v6 = vadd.f32 %v1859_v42, %v4488_v52 }
 0xa45   :  { %v1931_v0 = vpop.f32.mrf.mxu0  ;;  %v2002_v44 = vpop.f32.mrf.mxu1 }
 0xa46   :  { %v2007_v27 = vadd.f32 %v1931_v0, %v1861_v41  ;;  %v2009_v46 = vadd.f32 %v2002_v44, %v1863_v6  ;;  %v1864_v0 = vadd.f32 %v1860_v48, %v3130_v62 }
 0xa47   :  { %v1933_v9 = vpop.f32.mrf.mxu0  ;;  %v2004_v3 = vpop.f32.mrf.mxu1 }
 0xa48   :  { %v2466_v57 = vmul.f32 -1.442695, %v2007_v27  ;;  %v2008_v39 = vadd.f32 %v1933_v9, %v1862_v58  ;;  %v2468_v45 = vmul.f32 -1.442695, %v2009_v46  ;;  %v2010_v61 = vadd.f32 %v2004_v3, %v1864_v0 }
 0xa4a   :  { %2645 = vpow2.f32 %v2466_v57  ;;  %v2467_v40 = vmul.f32 -1.442695, %v2008_v39 }
 0xa4c   :  { %2647 = vpow2.f32 %v2467_v40 }
 0xa4d   :  { %2649 = vpow2.f32 %v2468_v45 }
 0xa57   :  { %v2646_v41 = vpop.eup %2645 }
 0xa58   :  { %v2020_v12 = vadd.f32 1.0, %v2646_v41 }
 0xa59   :  { %v2648_v27 = vpop.eup %2647 }
 0xa5a   :  { %2651 = vrcp.f32 %v2020_v12  ;;  %v2021_v57 = vadd.f32 1.0, %v2648_v27  ;;  %v2650_v40 = vpop.eup %2649  ;;  %v4709_v12 = vld [vmem:[#allocation23_spill] sm:$0xff] }
 0xa5b   :  { %2653 = vtanh.f32 %v2010_v61  ;;  %v2022_v6 = vadd.f32 1.0, %v2650_v40 }
 0xa5c   :  { %2655 = vrcp.f32 %v2021_v57 }
 0xa5d   :  { %2657 = vrcp.f32 %v2022_v6 }
 0xa67   :  { %v2652_v9 = vpop.eup %2651 }
 0xa68   :  { %v2654_v58 = vpop.eup %2653 }
 0xa69   :  { %v2656_v39 = vpop.eup %2655  ;;  %v2031_v42 = vmul.f32 %v2654_v58, %v2652_v9 }
 0xa6a   :  { %v2030_v56 = vmul.f32 %v2656_v39, %v4021_v37  ;;  %v2658_v48 = vpop.eup %2657  ;;  %v4710_v37 = vld [vmem:[#allocation24_spill] sm:$0xff] }
 0xa6c   :  { %v4187_v46 = vadd.f32 %v2031_v42, %v2030_v56 }
 0xa6e   :  { %2659 = vtanh.f32 %v4187_v46 }
 0xa7b   :  { %v2660_v3 = vpop.eup %2659 }
 0xa7c   :  { %v2034_v44 = vmul.f32 %v2660_v3, %v2658_v48 }
 0xa7e   :  { %2115 = vmatmul.mubr.f32.vlgmr.msra.gmra.mxu0 %v2034_v44  ;;  %2186 = vmatmul.mubr.f32.vlgmr.msra.gmra.mxu1 %v2034_v44 }
 0xa7f   :  { %2236 = vmatpush1.msra.mxu0 %v3906_v36  ;;  %2307 = vmatpush1.msra.mxu1 %v3909_v31  ;;  %v4691_v36 = vld [vmem:[#allocation27_spill] sm:$0xff]  ;;  %v4692_v31 = vld [vmem:[#allocation28_spill] sm:$0xff] }
 0xa80   :  { %2237 = vmatprep.subr.mxu0 %v3912_v43  ;;  %2308 = vmatprep.subr.mxu1 %v3915_v22  ;;  %v4693_v43 = vld [vmem:[#allocation29_spill] sm:$0xff]  ;;  %v4694_v22 = vld [vmem:[#allocation8_spill] sm:$0xff] }
 0xa81   :  { %2238 = vmatpush1.msra.mxu0 %v3918_v20  ;;  %2309 = vmatpush1.msra.mxu1 %v3921_v33  ;;  %v4695_v20 = vld [vmem:[#allocation9_spill] sm:$0xff]  ;;  %v4696_v33 = vld [vmem:[#allocation10_spill] sm:$0xff] }
 0xa82   :  { %2239 = vmatprep.subr.mxu0 %v3924_v25  ;;  %2310 = vmatprep.subr.mxu1 %v3927_v29  ;;  %v4697_v25 = vld [vmem:[#allocation11_spill] sm:$0xff]  ;;  %v4698_v29 = vld [vmem:[#allocation12_spill] sm:$0xff] }
 0xa83   :  { %2240 = vmatpush1.msra.mxu0 %v3930_v35  ;;  %2311 = vmatpush1.msra.mxu1 %v3933_v28  ;;  %v4699_v35 = vld [vmem:[#allocation13_spill] sm:$0xff]  ;;  %v4700_v28 = vld [vmem:[#allocation14_spill] sm:$0xff] }
 0xa84   :  { %2241 = vmatprep.subr.mxu0 %v3936_v19  ;;  %2312 = vmatprep.subr.mxu1 %v3939_v30  ;;  %v4701_v19 = vld [vmem:[#allocation15_spill] sm:$0xff]  ;;  %v4702_v30 = vld [vmem:[#allocation16_spill] sm:$0xff] }
 0xa85   :  { %2242 = vmatpush1.msra.mxu0 %v3942_v32  ;;  %2313 = vmatpush1.msra.mxu1 %v3945_v34  ;;  %v4703_v32 = vld [vmem:[#allocation17_spill] sm:$0xff]  ;;  %v4704_v34 = vld [vmem:[#allocation18_spill] sm:$0xff] }
 0xa86   :  { %2243 = vmatprep.subr.mxu0 %v3948_v26  ;;  %2314 = vmatprep.subr.mxu1 %v3951_v38  ;;  %v4705_v26 = vld [vmem:[#allocation19_spill] sm:$0xff]  ;;  %v4706_v38 = vld [vmem:[#allocation20_spill] sm:$0xff] }
 0xa87   :  { %2244 = vmatpush1.msra.mxu0 %v3954_v23  ;;  %2315 = vmatpush1.msra.mxu1 %v3957_v24  ;;  %v4707_v23 = vld [vmem:[#allocation21_spill] sm:$0xff]  ;;  %v4708_v24 = vld [vmem:[#allocation22_spill] sm:$0xff] }
 0xa88   :  { %2245 = vmatprep.subr.mxu0 %v4042_v21  ;;  %2316 = vmatprep.subr.mxu1 %v4045_v47  ;;  %v4711_v21 = vld [vmem:[#allocation25_spill] sm:$0xff]  ;;  %v4712_v47 = vmov 0.0  }
 0xa89   :  { %2246 = vmatpush1.msra.mxu0 %v4048_v49  ;;  %2317 = vmatpush1.msra.mxu1 %v4051_v55  ;;  %v4713_v49 = vld [vmem:[#allocation34_spill] sm:$0xff]  ;;  %v2040_v55 = vpop.permute.xlu1 %2039 }
 0xa8a   :  { %2247 = vmatprep.subr.mxu0 %v4054_v10  ;;  %2318 = vmatprep.subr.mxu1 %v4057_v11  ;;  %v4714_v10 = vld [vmem:[#allocation30_spill] sm:$0xff] }
 0xa8b   :  { %2248 = vmatpush1.msra.mxu0 %v4060_v13  ;;  %2319 = vmatpush1.msra.mxu1 %v4063_v14  ;;  %v2042_v11 = vmul.f32 %v2040_v55, %v4714_v10  ;;  %v4715_v13 = vld [vmem:[#allocation31_spill] sm:$0xff] }
 0xa8c   :  { %2249 = vmatprep.subr.mxu0 %v4066_v15  ;;  %2320 = vmatprep.subr.mxu1 %v4069_v16  ;;  %v2043_v14 = vmul.f32 %v2040_v55, %v4715_v13 }
 0xa8d   :  { %2250 = vmatpush1.msra.mxu0 %v4072_v17  ;;  %2321 = vmatpush1.msra.mxu1 %v4075_v18  ;;  %v2046_v15 = vadd.f32 %v2042_v11, %v4543_v53  ;;  %v4716_v18 = vld [vmem:[#allocation33_spill] sm:$0xff] }
 0xa8e   :  { %2251 = vmatprep.subr.mxu0 %v4078_v63  ;;  %2322 = vmatprep.subr.mxu1 %v4081_v59  ;;  %v2047_v63 = vadd.f32 %v2043_v14, %v4716_v18 }
 0xa8f   :  { %2252 = vmatpush1.msra.mxu0 %v4084_v50  ;;  %2323 = vmatpush1.msra.mxu1 %v4087_v7 }
 0xa90   :  { %2253 = vmatprep.subr.mxu0 %v4090_v5  ;;  %2324 = vmatprep.subr.mxu1 %v4093_v60  ;;  %v2044_v60 = vmul.f32 %v2040_v55, %v4487_v8 }
 0xa91   :  { %2254 = vmatpush1.msra.mxu0 %v4096_v2  ;;  %2325 = vmatpush1.msra.mxu1 %v4099_v4 }
 0xa92   :  { %2255 = vmatprep.subr.mxu0 %v4102_v51  ;;  %2326 = vmatprep.subr.mxu1 %v4105_v1  ;;  %v2048_v4 = vadd.f32 %v2044_v60, %v4488_v52  ;;  %v2045_v1 = vmul.f32 %v2040_v55, %v3126_v54 }
 0xa93   :  { %2256 = vmatpush1.msra.mxu0 %v4691_v36  ;;  %2327 = vmatpush1.msra.mxu1 %v4692_v31 }
 0xa94   :  { %2257 = vmatprep.subr.mxu0 %v4693_v43  ;;  %2328 = vmatprep.subr.mxu1 %v4694_v22  ;;  %v2049_v41 = vadd.f32 %v2045_v1, %v3130_v62  ;;  %v2225_v22 = vpop.permute.xlu0 %2224 }
 0xa95   :  { %2258 = vmatpush1.msra.mxu0 %v4695_v20  ;;  %2329 = vmatpush1.msra.mxu1 %v4696_v33  ;;  %v2227_v20 = vmul.f32 %v2225_v22, %v4714_v10  ;;  %v2228_v33 = vmul.f32 %v2225_v22, %v4715_v13 }
 0xa96   :  { %2259 = vmatprep.subr.mxu0 %v4697_v25  ;;  %2330 = vmatprep.subr.mxu1 %v4698_v29 }
 0xa97   :  { %2260 = vmatpush1.msra.mxu0 %v4699_v35  ;;  %2331 = vmatpush1.msra.mxu1 %v4700_v28  ;;  %v2231_v25 = vadd.f32 %v2227_v20, %v4543_v53 }
 0xa98   :  { %2261 = vmatprep.subr.mxu0 %v4701_v19  ;;  %2332 = vmatprep.subr.mxu1 %v4702_v30 }
 0xa99   :  { %2262 = vmatpush1.msra.mxu0 %v4703_v32  ;;  %2333 = vmatpush1.msra.mxu1 %v4704_v34  ;;  %v2229_v34 = vmul.f32 %v2225_v22, %v4487_v8 }
 0xa9a   :  { %2263 = vmatprep.subr.mxu0 %v4705_v26  ;;  %2334 = vmatprep.subr.mxu1 %v4706_v38 }
 0xa9b   :  { %2264 = vmatpush1.msra.mxu0 %v4707_v23  ;;  %2335 = vmatpush1.msra.mxu1 %v4708_v24  ;;  %v2233_v38 = vadd.f32 %v2229_v34, %v4488_v52  ;;  %v2230_v23 = vmul.f32 %v2225_v22, %v3126_v54 }
 0xa9c   :  { %2265 = vmatprep.subr.mxu0 %v4709_v12  ;;  %2336 = vmatprep.subr.mxu1 %v4710_v37 }
 0xa9d   :  { %2266 = vmatpush1.msra.mxu0 %v4711_v21  ;;  %2299 = vmatprep.mubr.f32.mxu0 %v4712_v47  ;;  %v2234_v37 = vadd.f32 %v2230_v23, %v3130_v62 }
 0xa9e   :  { %2337 = vmatpush1.msra.mxu1 %v4713_v49  ;;  %2370 = vmatprep.mubr.f32.mxu1 %v4712_v47 }
 0xb3e   :  { %v2116_v16 = vpop.f32.mrf.mxu0  ;;  %v2187_v2 = vpop.f32.mrf.mxu1 }
 0xb3f   :  { %v2192_v17 = vadd.f32 %v2116_v16, %v2046_v15  ;;  %v2194_v51 = vadd.f32 %v2187_v2, %v2048_v4 }
 0xb40   :  { %v2118_v59 = vpop.f32.mrf.mxu0  ;;  %v2189_v45 = vpop.f32.mrf.mxu1 }
 0xb41   :  { %v2470_v50 = vmul.f32 -1.442695, %v2192_v17  ;;  %v2193_v7 = vadd.f32 %v2118_v59, %v2047_v63  ;;  %v2472_v0 = vmul.f32 -1.442695, %v2194_v51  ;;  %v2195_v27 = vadd.f32 %v2189_v45, %v2049_v41 }
 0xb43   :  { %2661 = vpow2.f32 %v2470_v50  ;;  %v2471_v5 = vmul.f32 -1.442695, %v2193_v7  ;;  %v2417_v7 = vstv %s4285_s5 }
 0xb45   :  { %2663 = vpow2.f32 %v2471_v5 }
 0xb46   :  { %2665 = vpow2.f32 %v2472_v0 }
 0xb50   :  { %v2662_v61 = vpop.eup %2661 }
 0xb51   :  { %v2205_v57 = vadd.f32 1.0, %v2662_v61 }
 0xb52   :  { %v2664_v40 = vpop.eup %2663 }
 0xb53   :  { %2667 = vrcp.f32 %v2205_v57  ;;  %v2206_v9 = vadd.f32 1.0, %v2664_v40  ;;  %v2666_v58 = vpop.eup %2665 }
 0xb54   :  { %2669 = vtanh.f32 %v2195_v27  ;;  %v2207_v42 = vadd.f32 1.0, %v2666_v58 }
 0xb55   :  { %2671 = vrcp.f32 %v2206_v9 }
 0xb56   :  { %2673 = vrcp.f32 %v2207_v42 }
 0xb60   :  { %v2668_v39 = vpop.eup %2667 }
 0xb61   :  { %v2670_v6 = vpop.eup %2669 }
 0xb62   :  { %v2672_v56 = vpop.eup %2671  ;;  %v2216_v3 = vmul.f32 %v2670_v6, %v2668_v39 }
 0xb63   :  { %v2215_v48 = vmul.f32 %v2672_v56, %v4187_v46  ;;  %v2674_v36 = vpop.eup %2673  ;;  %v2232_v46 = vadd.f32 %v2228_v33, %v4716_v18  ;;  %v2477_v18 = vld [vmem:[%s4284_s4] ss:$0 sm:$0xff] }
 0xb65   :  { %v2217_v44 = vadd.f32 %v2216_v3, %v2215_v48 }
 0xb67   :  { %2675 = vtanh.f32 %v2217_v44 }
 0xb74   :  { %v2676_v31 = vpop.eup %2675 }
 0xb75   :  { %v2219_v43 = vmul.f32 %v2676_v31, %v2674_v36 }
 0xb77   :  { %2300 = vmatmul.mubr.f32.vlgmr.msra.gmra.mxu0 %v2219_v43  ;;  %2371 = vmatmul.mubr.f32.vlgmr.msra.gmra.mxu1 %v2219_v43 }
 0xc37   :  { %v2301_v29 = vpop.f32.mrf.mxu0  ;;  %v2372_v26 = vpop.f32.mrf.mxu1 }
 0xc38   :  { %v2377_v35 = vadd.f32 %v2301_v29, %v2231_v25  ;;  %v2379_v24 = vadd.f32 %v2372_v26, %v2233_v38 }
 0xc39   :  { %v2303_v28 = vpop.f32.mrf.mxu0  ;;  %v2374_v12 = vpop.f32.mrf.mxu1 }
 0xc3a   :  { %v2474_v19 = vmul.f32 -1.442695, %v2377_v35  ;;  %v2378_v30 = vadd.f32 %v2303_v28, %v2232_v46  ;;  %v2476_v53 = vmul.f32 -1.442695, %v2379_v24  ;;  %v2380_v47 = vadd.f32 %v2374_v12, %v2234_v37 }
 0xc3c   :  { %2677 = vpow2.f32 %v2474_v19  ;;  %v2475_v32 = vmul.f32 -1.442695, %v2378_v30 }
 0xc3e   :  { %2679 = vpow2.f32 %v2475_v32 }
 0xc3f   :  { %2681 = vpow2.f32 %v2476_v53 }
 0xc49   :  { %v2678_v21 = vpop.eup %2677 }
 0xc4a   :  { %v2390_v49 = vadd.f32 1.0, %v2678_v21 }
 0xc4b   :  { %v2680_v55 = vpop.eup %2679 }
 0xc4c   :  { %2683 = vrcp.f32 %v2390_v49  ;;  %v2391_v10 = vadd.f32 1.0, %v2680_v55  ;;  %v2682_v8 = vpop.eup %2681 }
 0xc4d   :  { %2685 = vtanh.f32 %v2380_v47  ;;  %v2392_v14 = vadd.f32 1.0, %v2682_v8 }
 0xc4e   :  { %2687 = vrcp.f32 %v2391_v10 }
 0xc4f   :  { %2689 = vrcp.f32 %v2392_v14 }
 0xc59   :  { %v2684_v11 = vpop.eup %2683 }
 0xc5a   :  { %v2686_v13 = vpop.eup %2685 }
 0xc5b   :  { %v2688_v52 = vpop.eup %2687  ;;  %v2401_v15 = vmul.f32 %v2686_v13, %v2684_v11 }
 0xc5c   :  { %v2400_v54 = vmul.f32 %v2688_v52, %v2217_v44  ;;  %v2690_v62 = vpop.eup %2689 }
 0xc5e   :  { %v2402_v16 = vadd.f32 %v2401_v15, %v2400_v54 }
 0xc60   :  { %2691 = vtanh.f32 %v2402_v16 }
 0xc6d   :  { %v2692_v17 = vpop.eup %2691 }
 0xc6e   :  { %v2404_v63 = vmul.f32 %v2692_v17, %v2690_v62 }
 0xc70   :  { %v2411_v59 = vmul.f32 %v2477_v18, %v2404_v63 }
 0xc72   :  { %v2413_v50 = vsel %vm2412_vm0, %v2411_v59, 0.0 }
 0xc73   :  { %2414 = vadd.xlane.f32.xlu1 %v2413_v50 }
 0xcfc   :  { %v2415_v5 = vpop.xlane.xlu1 %2414 }
 0xcfd   :  { %v2418_v60 = vadd.f32 %v2417_v7, %v2415_v5 }
 0xcff   :  { %2420 = vst.msk [vmem:[%s4286_s6] sm:$0x3] %vm2419_vm1, %v2418_v60 }
 0xd00   :  { %2425 = vsyncpa [#allocation4], 1 }

</bundles_post_ra>
